<compile_context>
chip_gen: v7x
topology: tpu7x:2x2x1
jax: 0.10.0
libtpu: 0.0.40
codegen_flags: <defaults>
</compile_context>

<pallas_src>
import functools

import jax
import jax.numpy as jnp
import numpy as np
from jax.experimental import pallas as pl
from jax.experimental.pallas import tpu as pltpu


# ----------------------------------------------------------------------------
# Shared math helpers (pure jnp — used both inside the Pallas kernel and by
# the pure-JAX reference used for verification, so numerics match closely).
# ----------------------------------------------------------------------------
def _mm(a, w):
    """Matmul with bf16 operands and f32 accumulation (MXU-friendly)."""
    return jnp.dot(a.astype(jnp.bfloat16), w.astype(jnp.bfloat16),
                   preferred_element_type=jnp.float32)


def _layer_norm(x, g, b, eps):
    mu = jnp.mean(x, axis=-1, keepdims=True)
    var = jnp.mean(jnp.square(x - mu), axis=-1, keepdims=True)
    return (x - mu) * jax.lax.rsqrt(var + eps) * g + b


def _mha(q3, k3, v3, mask, n_heads, attn_dtype, approx_recip):
    """Multi-head attention on one batch tile, no head transpose.

    q3: (bt, Lq, D) bf16, k3/v3: (bt, Lk, D) bf16 (1/sqrt(dh) is already
    folded into the query projection), mask: (bt, Lq or 1, Lk), 0 == masked.
    Returns (attn weights (bt, H, Lq, Lk) attn_dtype, context (bt, Lq, D) f32).
    """
    bt, Lq, D = q3.shape
    Lk = k3.shape[1]
    H = n_heads
    dh = D // H

    # Additive mask bias, computed once per attention block (not per head).
    # Masks are exact 0/1 values, so the == 0 test is safe in bf16/f32.
    bias = jnp.where(mask.astype(jnp.float32) == 0.0,
                     jnp.float32(-1e9), jnp.float32(0.0))

    attn_heads = []
    ctx_heads = []
    for h in range(H):                       # static unroll: O(H) lane slices
        sl = slice(h * dh, (h + 1) * dh)
        qh = q3[:, :, sl]                    # (bt, Lq, dh)
        kh = k3[:, :, sl]                    # (bt, Lk, dh)
        vh = v3[:, :, sl]                    # (bt, Lk, dh)
        s = jnp.einsum('bqd,bkd->bqk', qh, kh,
                       preferred_element_type=jnp.float32) + bias
        m = jnp.max(s, axis=-1, keepdims=True)
        e = jnp.exp(s - m)
        denom = jnp.sum(e, axis=-1, keepdims=True)
        if approx_recip:
            a = e * pl.reciprocal(denom, approx=True)   # EUP slot, not VALU
        else:
            a = e / denom
        ctx_heads.append(jnp.einsum('bqk,bkd->bqd', a.astype(jnp.bfloat16), vh,
                                    preferred_element_type=jnp.float32))
        attn_heads.append(a.astype(attn_dtype))

    attn = jnp.stack(attn_heads, axis=1)          # (bt, H, Lq, Lk)
    ctx = jnp.concatenate(ctx_heads, axis=-1)     # (bt, Lq, D) f32
    return attn, ctx


def _decoder_block(q, enc, la_mask, pad_mask, fp, n_heads, eps,
                   attn_dtype, approx_recip):
    """Full decoder-layer math on one batch tile.

    q: (bt, Lq, D) bf16, enc: (bt, Lk, D) bf16,
    la_mask: (bt, Lq, Lq), pad_mask: (bt, 1, Lk), fp: fused parameter dict.
    """
    bt, Lq, D = q.shape
    Lk = enc.shape[1]

    qf = q.reshape(bt * Lq, D).astype(jnp.float32)   # residual stream in f32
    ef = enc.reshape(bt * Lk, D)                     # bf16 matmul operand

    # TODO(synk): dropout layers are the identity (eval/inference mode).

    # ---- block 1: pre-norm masked self-attention + residual ----
    x = _layer_norm(qf, fp["norm_g"][0], fp["norm_b"][0], eps)
    qkv = (_mm(x, fp["self_wqkv"]) + fp["self_bqkv"]).astype(jnp.bfloat16)
    q3 = qkv[:, 0 * D:1 * D].reshape(bt, Lq, D)
    k3 = qkv[:, 1 * D:2 * D].reshape(bt, Lq, D)
    v3 = qkv[:, 2 * D:3 * D].reshape(bt, Lq, D)
    self_attn, ctx = _mha(q3, k3, v3, la_mask, n_heads, attn_dtype, approx_recip)
    qf = qf + _mm(ctx.reshape(bt * Lq, D), fp["self_wo"]) + fp["self_bo"]

    # ---- block 2: pre-norm cross-attention with encoder output + residual ----
    x = _layer_norm(qf, fp["norm_g"][1], fp["norm_b"][1], eps)
    qp = (_mm(x, fp["cross_wq"]) + fp["cross_bq"]).astype(jnp.bfloat16)
    kv = (_mm(ef, fp["cross_wkv"]) + fp["cross_bkv"]).astype(jnp.bfloat16)
    q3 = qp.reshape(bt, Lq, D)
    k3 = kv[:, :D].reshape(bt, Lk, D)
    v3 = kv[:, D:].reshape(bt, Lk, D)
    cross_attn, ctx = _mha(q3, k3, v3, pad_mask, n_heads, attn_dtype, approx_recip)
    qf = qf + _mm(ctx.reshape(bt * Lq, D), fp["cross_wo"]) + fp["cross_bo"]

    # ---- block 3: pre-norm feed-forward + residual ----
    x = _layer_norm(qf, fp["norm_g"][2], fp["norm_b"][2], eps)
    h1 = jnp.maximum(_mm(x, fp["ffn_w1"]) + fp["ffn_b1"], 0.0).astype(jnp.bfloat16)
    qf = qf + _mm(h1, fp["ffn_w2"]) + fp["ffn_b2"]

    return qf.reshape(bt, Lq, D), self_attn, cross_attn


# ----------------------------------------------------------------------------
# Pallas kernel: one batch tile per grid step.
# ----------------------------------------------------------------------------
def decoder_layer_kernel(q_ref, enc_ref, lam_ref, pm_ref,
                         ng_ref, nb_ref,
                         swqkv_ref, sbqkv_ref, swo_ref, sbo_ref,
                         cwq_ref, cbq_ref, cwkv_ref, cbkv_ref, cwo_ref, cbo_ref,
                         w1_ref, b1_ref, w2_ref, b2_ref,
                         out_ref, sattn_ref, cattn_ref,
                         *, n_heads, eps):
    fp = dict(
        norm_g=ng_ref[...], norm_b=nb_ref[...],
        self_wqkv=swqkv_ref[...], self_bqkv=sbqkv_ref[...],
        self_wo=swo_ref[...], self_bo=sbo_ref[...],
        cross_wq=cwq_ref[...], cross_bq=cbq_ref[...],
        cross_wkv=cwkv_ref[...], cross_bkv=cbkv_ref[...],
        cross_wo=cwo_ref[...], cross_bo=cbo_ref[...],
        ffn_w1=w1_ref[...], ffn_b1=b1_ref[...],
        ffn_w2=w2_ref[...], ffn_b2=b2_ref[...],
    )
    out, self_attn, cross_attn = _decoder_block(
        q_ref[...], enc_ref[...], lam_ref[...], pm_ref[...], fp,
        n_heads, eps, attn_dtype=sattn_ref.dtype, approx_recip=True)

    out_ref[...] = out.astype(out_ref.dtype)
    sattn_ref[...] = self_attn      # single stacked stores (no per-head loop)
    cattn_ref[...] = cross_attn


# ----------------------------------------------------------------------------
# Parameter fusion (done once, outside the kernel).
# ----------------------------------------------------------------------------
def _fuse_params(params, n_heads):
    f32, bf16 = jnp.float32, jnp.bfloat16
    sW, sb = params["self_W"], params["self_b"]
    cW, cb = params["cross_W"], params["cross_b"]
    d_model = sW.shape[-1]
    # 1/sqrt(dh) folded into the query projections: free at fusion time and
    # removes a VALU multiply on the largest (Lq,Lk) intermediates.
    scale = jnp.float32((d_model // n_heads) ** -0.5)
    return {
        "norm_g": params["norm_g"].astype(f32),
        "norm_b": params["norm_b"].astype(f32),
        "self_wqkv": jnp.concatenate([sW[0] * scale, sW[1], sW[2]], axis=1).astype(bf16),
        "self_bqkv": jnp.concatenate([sb[0] * scale, sb[1], sb[2]])[None, :].astype(f32),
        "self_wo": sW[3].astype(bf16),
        "self_bo": sb[3][None, :].astype(f32),
        "cross_wq": (cW[0] * scale).astype(bf16),
        "cross_bq": (cb[0] * scale)[None, :].astype(f32),
        "cross_wkv": jnp.concatenate([cW[1], cW[2]], axis=1).astype(bf16),
        "cross_bkv": jnp.concatenate([cb[1], cb[2]])[None, :].astype(f32),
        "cross_wo": cW[3].astype(bf16),
        "cross_bo": cb[3][None, :].astype(f32),
        "ffn_w1": params["ffn_w1"].astype(bf16),
        "ffn_b1": params["ffn_b1"].reshape(1, -1).astype(f32),
        "ffn_w2": params["ffn_w2"].astype(bf16),
        "ffn_b2": params["ffn_b2"].reshape(1, -1).astype(f32),
    }


_PARAM_ORDER = ["norm_g", "norm_b",
                "self_wqkv", "self_bqkv", "self_wo", "self_bo",
                "cross_wq", "cross_bq", "cross_wkv", "cross_bkv",
                "cross_wo", "cross_bo",
                "ffn_w1", "ffn_b1", "ffn_w2", "ffn_b2"]


# ----------------------------------------------------------------------------
# Per-generation VMEM budget and batch-tile selection.
# ----------------------------------------------------------------------------
def _vmem_budget_bytes():
    cap = 128 * 1024 * 1024
    try:
        cap = int(getattr(pltpu.get_tpu_info(), "vmem_capacity_bytes", cap))
    except Exception:
        pass
    # ~25% headroom for Mosaic internal scratch / spills (critical on v7x
    # where physical VMEM is only 64 MiB per TensorCore).
    return int(cap * 3 // 4)


def _estimate_tile_vmem_bytes(bt, Lq, Lk, D, H, dff):
    bf, f4 = 2, 4
    # double-buffered bf16 activation + mask inputs
    act_in = 2 * bt * (Lq * D + Lk * D + Lq * Lq + Lk) * bf
    # double-buffered outputs: residual stream f32, attention maps bf16
    outs = 2 * bt * (Lq * D * f4 + H * Lq * (Lq + Lk) * bf)
    # weights (counted double-buffered to be safe even though constant-index)
    w_elems = 3 * D * D + D * D + D * D + 2 * D * D + D * D + 2 * D * dff
    b_elems = 15 * D + dff
    weights = 2 * (w_elems * bf + b_elems * f4)
    # in-kernel f32 working set (QKV, KV, FFN hidden, scores/probs, residual)
    interm = bt * (3 * Lq * D + 2 * Lk * D + Lq * dff
                   + 2 * H * Lq * (Lq + Lk) + 4 * Lq * D) * f4
    return act_in + outs + weights + interm


def _pick_batch_tile(B, Lq, Lk, D, H, dff, vmem_budget):
    divisors = [d for d in range(1, B + 1) if B % d == 0]
    feasible = [d for d in divisors
                if _estimate_tile_vmem_bytes(d, Lq, Lk, D, H, dff) <= vmem_budget]
    if not feasible:
        feasible = [1]

    def score(bt):
        m = bt * Lq
        g = B // bt
        s = -abs(m - 512) / 512.0      # target M = bt*Lq around 512 rows
        if g >= 2:
            s += 0.75                  # keep both v7x TensorCores fed
        if g % 2 == 0:
            s += 0.5                   # balanced split across 2 cores
        return s

    return max(feasible, key=score)


# ----------------------------------------------------------------------------
# Wrapper.
# ----------------------------------------------------------------------------
def decoder_layer(q, enc, look_ahead_mask, padding_mask, params, *,
                  n_heads, eps=1e-6, batch_tile=None):
    """q: (B, Lq, D), enc: (B, Lk, D),
    look_ahead_mask: (B, 1, Lq, Lq), padding_mask: (B, 1, 1, Lk)."""
    B, Lq, D = q.shape
    _, Lk, _ = enc.shape
    H = n_heads
    dff = params["ffn_w1"].shape[-1]

    fp = _fuse_params(params, n_heads)
    # Masks shipped as bf16 (half the HBM read of f32); values are exact 0/1.
    la_mask = look_ahead_mask.reshape(B, Lq, Lq).astype(jnp.bfloat16)
    pad_mask = padding_mask.reshape(B, 1, Lk).astype(jnp.bfloat16)

    vmem_budget = _vmem_budget_bytes()
    if batch_tile is None:
        batch_tile = _pick_batch_tile(B, Lq, Lk, D, H, dff, vmem_budget)
    bt = batch_tile
    assert B % bt == 0, "batch_tile must divide the batch size"
    grid = (B // bt,)

    kernel = functools.partial(decoder_layer_kernel, n_heads=n_heads, eps=eps)

    tile3 = lambda i: (i, 0, 0)
    tile4 = lambda i: (i, 0, 0, 0)
    rep2 = lambda i: (0, 0)

    param_args = [fp[k] for k in _PARAM_ORDER]
    # Constant-index weight blocks: fetched once, not re-DMA'd across steps.
    param_specs = [pl.BlockSpec(fp[k].shape, rep2) for k in _PARAM_ORDER]

    in_specs = [
        pl.BlockSpec((bt, Lq, D), tile3),      # q (bf16)
        pl.BlockSpec((bt, Lk, D), tile3),      # enc_output (bf16)
        pl.BlockSpec((bt, Lq, Lq), tile3),     # look-ahead mask (bf16)
        pl.BlockSpec((bt, 1, Lk), tile3),      # padding mask (bf16)
    ] + param_specs

    out_specs = (
        pl.BlockSpec((bt, Lq, D), tile3),
        pl.BlockSpec((bt, H, Lq, Lq), tile4),
        pl.BlockSpec((bt, H, Lq, Lk), tile4),
    )
    out_shape = (
        jax.ShapeDtypeStruct((B, Lq, D), jnp.float32),
        # Attention maps in bf16: halves the dominant HBM writeback.
        jax.ShapeDtypeStruct((B, H, Lq, Lq), jnp.bfloat16),
        jax.ShapeDtypeStruct((B, H, Lq, Lk), jnp.bfloat16),
    )

    return pl.pallas_call(
        kernel,
        out_shape=out_shape,
        grid=grid,
        in_specs=in_specs,
        out_specs=out_specs,
        compiler_params=pltpu.CompilerParams(
            dimension_semantics=("parallel",),
            vmem_limit_bytes=vmem_budget),
    )(q.astype(jnp.bfloat16), enc.astype(jnp.bfloat16), la_mask, pad_mask,
      *param_args)


# ----------------------------------------------------------------------------
# Pure-JAX reference (same math, no Pallas) for verification.
# ----------------------------------------------------------------------------
def decoder_layer_ref(q, enc, look_ahead_mask, padding_mask, params, *,
                      n_heads, eps=1e-6):
    B, Lq, D = q.shape
    Lk = enc.shape[1]
    fp = _fuse_params(params, n_heads)
    la = look_ahead_mask.reshape(B, Lq, Lq).astype(jnp.bfloat16)
    pm = padding_mask.reshape(B, 1, Lk).astype(jnp.bfloat16)
    return _decoder_block(q.astype(jnp.bfloat16), enc.astype(jnp.bfloat16),
                          la, pm, fp, n_heads, eps,
                          attn_dtype=jnp.float32, approx_recip=False)


if __name__ == "__main__":
    B, Lq, Lk = 2, 8, 16
    D, H, DFF = 32, 4, 64

    key = jax.random.PRNGKey(0)
    ks = jax.random.split(key, 12)

    q = jax.random.normal(ks[0], (B, Lq, D), jnp.float32)
    enc = jax.random.normal(ks[1], (B, Lk, D), jnp.float32)

    # look-ahead (causal) mask: (B, 1, Lq, Lq), 1 = keep, 0 = masked
    la_mask = jnp.broadcast_to(
        jnp.tril(jnp.ones((Lq, Lq), jnp.float32)), (B, 1, Lq, Lq))
    # encoder padding mask: (B, 1, 1, Lk); mask out last 4 positions of batch 1
    pad_mask = jnp.ones((B, 1, 1, Lk), jnp.float32)
    pad_mask = pad_mask.at[1, :, :, Lk - 4:].set(0.0)

    # Deterministic synthetic parameters (norm gammas/betas stacked [n1,n2,n3];
    # attention weights stacked [Wq, Wk, Wv, Wo]).
    params = {
        "norm_g": 1.0 + 0.05 * jax.random.normal(ks[2], (3, D), jnp.float32),
        "norm_b": 0.05 * jax.random.normal(ks[3], (3, D), jnp.float32),
        "self_W": 0.1 * jax.random.normal(ks[4], (4, D, D), jnp.float32),
        "self_b": 0.05 * jax.random.normal(ks[5], (4, D), jnp.float32),
        "cross_W": 0.1 * jax.random.normal(ks[6], (4, D, D), jnp.float32),
        "cross_b": 0.05 * jax.random.normal(ks[7], (4, D), jnp.float32),
        "ffn_w1": 0.1 * jax.random.normal(ks[8], (D, DFF), jnp.float32),
        "ffn_b1": 0.05 * jax.random.normal(ks[9], (1, DFF), jnp.float32),
        "ffn_w2": 0.1 * jax.random.normal(ks[10], (DFF, D), jnp.float32),
        "ffn_b2": 0.05 * jax.random.normal(ks[11], (1, D), jnp.float32),
    }

    out, self_attn, cross_attn = decoder_layer(
        q, enc, la_mask, pad_mask, params, n_heads=H, eps=1e-6)
    jax.block_until_ready(out)
    jax.block_until_ready(self_attn)
    jax.block_until_ready(cross_attn)

    assert out.shape == (B, Lq, D)
    assert self_attn.shape == (B, H, Lq, Lq)
    assert cross_attn.shape == (B, H, Lq, Lk)

    ref_out, ref_sa, ref_ca = decoder_layer_ref(
        q, enc, la_mask, pad_mask, params, n_heads=H, eps=1e-6)

    np.testing.assert_allclose(np.asarray(out.astype(jnp.float32)),
                               np.asarray(ref_out.astype(jnp.float32)),
                               rtol=2e-2, atol=2e-2)
    np.testing.assert_allclose(np.asarray(self_attn.astype(jnp.float32)),
                               np.asarray(ref_sa.astype(jnp.float32)),
                               rtol=2e-2, atol=2e-2)
    np.testing.assert_allclose(np.asarray(cross_attn.astype(jnp.float32)),
                               np.asarray(ref_ca.astype(jnp.float32)),
                               rtol=2e-2, atol=2e-2)

    print("KERNEL_OK")
</pallas_src>

<mosaic_0001>
module attributes {stable_mosaic.version = 11 : i64} {
  func.func @decoder_layer_kernel(%arg0: i32, %arg1: memref<1x8x32xbf16, #tpu.memory_space<vmem>>, %arg2: memref<1x16x32xbf16, #tpu.memory_space<vmem>>, %arg3: memref<1x8x8xbf16, #tpu.memory_space<vmem>>, %arg4: memref<1x1x16xbf16, #tpu.memory_space<vmem>>, %arg5: memref<3x32xf32, #tpu.memory_space<vmem>>, %arg6: memref<3x32xf32, #tpu.memory_space<vmem>>, %arg7: memref<32x96xbf16, #tpu.memory_space<vmem>>, %arg8: memref<1x96xf32, #tpu.memory_space<vmem>>, %arg9: memref<32x32xbf16, #tpu.memory_space<vmem>>, %arg10: memref<1x32xf32, #tpu.memory_space<vmem>>, %arg11: memref<32x32xbf16, #tpu.memory_space<vmem>>, %arg12: memref<1x32xf32, #tpu.memory_space<vmem>>, %arg13: memref<32x64xbf16, #tpu.memory_space<vmem>>, %arg14: memref<1x64xf32, #tpu.memory_space<vmem>>, %arg15: memref<32x32xbf16, #tpu.memory_space<vmem>>, %arg16: memref<1x32xf32, #tpu.memory_space<vmem>>, %arg17: memref<32x64xbf16, #tpu.memory_space<vmem>>, %arg18: memref<1x64xf32, #tpu.memory_space<vmem>>, %arg19: memref<64x32xbf16, #tpu.memory_space<vmem>>, %arg20: memref<1x32xf32, #tpu.memory_space<vmem>>, %arg21: memref<1x8x32xf32, #tpu.memory_space<vmem>>, %arg22: memref<1x4x8x8xbf16, #tpu.memory_space<vmem>>, %arg23: memref<1x4x8x16xbf16, #tpu.memory_space<vmem>>) attributes {dimension_semantics = [#tpu.dimension_semantics<parallel>], iteration_bounds = array<i64: 2>, scalar_prefetch = 0 : i64, scratch_operands = 0 : i64, tpu.core_type = #tpu.core_type<tc>, window_params = [{transform_indices = @transform_0, window_bounds = array<i64: 1, 8, 32>}, {transform_indices = @transform_1, window_bounds = array<i64: 1, 16, 32>}, {transform_indices = @transform_2, window_bounds = array<i64: 1, 8, 8>}, {transform_indices = @transform_3, window_bounds = array<i64: 1, 1, 16>}, {pipeline_mode = #tpu.pipeline_mode<synchronous>, transform_indices = @transform_4, window_bounds = array<i64: 3, 32>}, {pipeline_mode = #tpu.pipeline_mode<synchronous>, transform_indices = @transform_5, window_bounds = array<i64: 3, 32>}, {pipeline_mode = #tpu.pipeline_mode<synchronous>, transform_indices = @transform_6, window_bounds = array<i64: 32, 96>}, {pipeline_mode = #tpu.pipeline_mode<synchronous>, transform_indices = @transform_7, window_bounds = array<i64: 1, 96>}, {pipeline_mode = #tpu.pipeline_mode<synchronous>, transform_indices = @transform_8, window_bounds = array<i64: 32, 32>}, {pipeline_mode = #tpu.pipeline_mode<synchronous>, transform_indices = @transform_9, window_bounds = array<i64: 1, 32>}, {pipeline_mode = #tpu.pipeline_mode<synchronous>, transform_indices = @transform_10, window_bounds = array<i64: 32, 32>}, {pipeline_mode = #tpu.pipeline_mode<synchronous>, transform_indices = @transform_11, window_bounds = array<i64: 1, 32>}, {pipeline_mode = #tpu.pipeline_mode<synchronous>, transform_indices = @transform_12, window_bounds = array<i64: 32, 64>}, {pipeline_mode = #tpu.pipeline_mode<synchronous>, transform_indices = @transform_13, window_bounds = array<i64: 1, 64>}, {pipeline_mode = #tpu.pipeline_mode<synchronous>, transform_indices = @transform_14, window_bounds = array<i64: 32, 32>}, {pipeline_mode = #tpu.pipeline_mode<synchronous>, transform_indices = @transform_15, window_bounds = array<i64: 1, 32>}, {pipeline_mode = #tpu.pipeline_mode<synchronous>, transform_indices = @transform_16, window_bounds = array<i64: 32, 64>}, {pipeline_mode = #tpu.pipeline_mode<synchronous>, transform_indices = @transform_17, window_bounds = array<i64: 1, 64>}, {pipeline_mode = #tpu.pipeline_mode<synchronous>, transform_indices = @transform_18, window_bounds = array<i64: 64, 32>}, {pipeline_mode = #tpu.pipeline_mode<synchronous>, transform_indices = @transform_19, window_bounds = array<i64: 1, 32>}, {transform_indices = @transform_20, window_bounds = array<i64: 1, 8, 32>}, {transform_indices = @transform_21, window_bounds = array<i64: 1, 4, 8, 8>}, {transform_indices = @transform_22, window_bounds = array<i64: 1, 4, 8, 16>}]} {
    %c0 = arith.constant 0 : index
    %c0_0 = arith.constant 0 : index
    %0 = vector.load %arg5[%c0, %c0_0] : memref<3x32xf32, #tpu.memory_space<vmem>>, vector<3x32xf32>
    %c0_1 = arith.constant 0 : index
    %c0_2 = arith.constant 0 : index
    %1 = vector.load %arg6[%c0_1, %c0_2] : memref<3x32xf32, #tpu.memory_space<vmem>>, vector<3x32xf32>
    %c0_3 = arith.constant 0 : index
    %c0_4 = arith.constant 0 : index
    %2 = vector.load %arg7[%c0_3, %c0_4] : memref<32x96xbf16, #tpu.memory_space<vmem>>, vector<32x96xbf16>
    %c0_5 = arith.constant 0 : index
    %c0_6 = arith.constant 0 : index
    %3 = vector.load %arg8[%c0_5, %c0_6] : memref<1x96xf32, #tpu.memory_space<vmem>>, vector<1x96xf32>
    %c0_7 = arith.constant 0 : index
    %c0_8 = arith.constant 0 : index
    %4 = vector.load %arg9[%c0_7, %c0_8] : memref<32x32xbf16, #tpu.memory_space<vmem>>, vector<32x32xbf16>
    %c0_9 = arith.constant 0 : index
    %c0_10 = arith.constant 0 : index
    %5 = vector.load %arg10[%c0_9, %c0_10] : memref<1x32xf32, #tpu.memory_space<vmem>>, vector<1x32xf32>
    %c0_11 = arith.constant 0 : index
    %c0_12 = arith.constant 0 : index
    %6 = vector.load %arg11[%c0_11, %c0_12] : memref<32x32xbf16, #tpu.memory_space<vmem>>, vector<32x32xbf16>
    %c0_13 = arith.constant 0 : index
    %c0_14 = arith.constant 0 : index
    %7 = vector.load %arg12[%c0_13, %c0_14] : memref<1x32xf32, #tpu.memory_space<vmem>>, vector<1x32xf32>
    %c0_15 = arith.constant 0 : index
    %c0_16 = arith.constant 0 : index
    %8 = vector.load %arg13[%c0_15, %c0_16] : memref<32x64xbf16, #tpu.memory_space<vmem>>, vector<32x64xbf16>
    %c0_17 = arith.constant 0 : index
    %c0_18 = arith.constant 0 : index
    %9 = vector.load %arg14[%c0_17, %c0_18] : memref<1x64xf32, #tpu.memory_space<vmem>>, vector<1x64xf32>
    %c0_19 = arith.constant 0 : index
    %c0_20 = arith.constant 0 : index
    %10 = vector.load %arg15[%c0_19, %c0_20] : memref<32x32xbf16, #tpu.memory_space<vmem>>, vector<32x32xbf16>
    %c0_21 = arith.constant 0 : index
    %c0_22 = arith.constant 0 : index
    %11 = vector.load %arg16[%c0_21, %c0_22] : memref<1x32xf32, #tpu.memory_space<vmem>>, vector<1x32xf32>
    %c0_23 = arith.constant 0 : index
    %c0_24 = arith.constant 0 : index
    %12 = vector.load %arg17[%c0_23, %c0_24] : memref<32x64xbf16, #tpu.memory_space<vmem>>, vector<32x64xbf16>
    %c0_25 = arith.constant 0 : index
    %c0_26 = arith.constant 0 : index
    %13 = vector.load %arg18[%c0_25, %c0_26] : memref<1x64xf32, #tpu.memory_space<vmem>>, vector<1x64xf32>
    %c0_27 = arith.constant 0 : index
    %c0_28 = arith.constant 0 : index
    %14 = vector.load %arg19[%c0_27, %c0_28] : memref<64x32xbf16, #tpu.memory_space<vmem>>, vector<64x32xbf16>
    %c0_29 = arith.constant 0 : index
    %c0_30 = arith.constant 0 : index
    %15 = vector.load %arg20[%c0_29, %c0_30] : memref<1x32xf32, #tpu.memory_space<vmem>>, vector<1x32xf32>
    %c0_31 = arith.constant 0 : index
    %c0_32 = arith.constant 0 : index
    %c0_33 = arith.constant 0 : index
    %16 = vector.load %arg1[%c0_31, %c0_32, %c0_33] : memref<1x8x32xbf16, #tpu.memory_space<vmem>>, vector<1x8x32xbf16>
    %c0_34 = arith.constant 0 : index
    %c0_35 = arith.constant 0 : index
    %c0_36 = arith.constant 0 : index
    %17 = vector.load %arg2[%c0_34, %c0_35, %c0_36] : memref<1x16x32xbf16, #tpu.memory_space<vmem>>, vector<1x16x32xbf16>
    %c0_37 = arith.constant 0 : index
    %c0_38 = arith.constant 0 : index
    %c0_39 = arith.constant 0 : index
    %18 = vector.load %arg3[%c0_37, %c0_38, %c0_39] : memref<1x8x8xbf16, #tpu.memory_space<vmem>>, vector<1x8x8xbf16>
    %c0_40 = arith.constant 0 : index
    %c0_41 = arith.constant 0 : index
    %c0_42 = arith.constant 0 : index
    %19 = vector.load %arg4[%c0_40, %c0_41, %c0_42] : memref<1x1x16xbf16, #tpu.memory_space<vmem>>, vector<1x1x16xbf16>
    %20 = vector.shape_cast %16 : vector<1x8x32xbf16> to vector<8x32xbf16>
    %21 = arith.extf %20 : vector<8x32xbf16> to vector<8x32xf32>
    %22 = vector.shape_cast %17 : vector<1x16x32xbf16> to vector<16x32xbf16>
    %23 = vector.extract_strided_slice %0 {offsets = [0, 0], sizes = [1, 32], strides = [1, 1]} : vector<3x32xf32> to vector<1x32xf32>
    %24 = vector.shape_cast %23 : vector<1x32xf32> to vector<32xf32>
    %25 = vector.extract_strided_slice %1 {offsets = [0, 0], sizes = [1, 32], strides = [1, 1]} : vector<3x32xf32> to vector<1x32xf32>
    %26 = vector.shape_cast %25 : vector<1x32xf32> to vector<32xf32>
    %cst = arith.constant dense<0.000000e+00> : vector<8xf32>
    %27 = vector.multi_reduction <add>, %21, %cst [1] : vector<8x32xf32> to vector<8xf32>
    %28 = vector.shape_cast %27 : vector<8xf32> to vector<8x1xf32>
    %cst_43 = arith.constant 3.200000e+01 : f32
    %29 = vector.broadcast %cst_43 : f32 to vector<8x1xf32>
    %30 = arith.divf %28, %29 : vector<8x1xf32>
    %31 = vector.broadcast %30 : vector<8x1xf32> to vector<8x32xf32>
    %32 = arith.subf %21, %31 : vector<8x32xf32>
    %33 = arith.mulf %32, %32 : vector<8x32xf32>
    %cst_44 = arith.constant dense<0.000000e+00> : vector<8xf32>
    %34 = vector.multi_reduction <add>, %33, %cst_44 [1] : vector<8x32xf32> to vector<8xf32>
    %35 = vector.shape_cast %34 : vector<8xf32> to vector<8x1xf32>
    %cst_45 = arith.constant 3.200000e+01 : f32
    %36 = vector.broadcast %cst_45 : f32 to vector<8x1xf32>
    %37 = arith.divf %35, %36 : vector<8x1xf32>
    %38 = vector.broadcast %30 : vector<8x1xf32> to vector<8x32xf32>
    %39 = arith.subf %21, %38 : vector<8x32xf32>
    %cst_46 = arith.constant 9.99999997E-7 : f32
    %40 = vector.broadcast %cst_46 : f32 to vector<8x1xf32>
    %41 = arith.addf %37, %40 : vector<8x1xf32>
    %42 = math.rsqrt %41 : vector<8x1xf32>
    %43 = vector.broadcast %42 : vector<8x1xf32> to vector<8x32xf32>
    %44 = arith.mulf %39, %43 : vector<8x32xf32>
    %45 = vector.shape_cast %24 : vector<32xf32> to vector<1x32xf32>
    %46 = vector.broadcast %45 : vector<1x32xf32> to vector<8x32xf32>
    %47 = arith.mulf %44, %46 : vector<8x32xf32>
    %48 = vector.shape_cast %26 : vector<32xf32> to vector<1x32xf32>
    %49 = vector.broadcast %48 : vector<1x32xf32> to vector<8x32xf32>
    %50 = arith.addf %47, %49 : vector<8x32xf32>
    %51 = arith.truncf %50 : vector<8x32xf32> to vector<8x32xbf16>
    %cst_47 = arith.constant dense<0.000000e+00> : vector<8x96xf32>
    %52 = tpu.matmul %51, %2, %cst_47 {dimension_numbers = #tpu.dot_dimension_numbers<[1], [0], [0], [1], [0, 0, 1, 1], [], []>} : vector<8x32xbf16>, vector<32x96xbf16>, vector<8x96xf32> -> vector<8x96xf32>
    %53 = vector.broadcast %3 : vector<1x96xf32> to vector<8x96xf32>
    %54 = arith.addf %52, %53 : vector<8x96xf32>
    %55 = arith.truncf %54 : vector<8x96xf32> to vector<8x96xbf16>
    %56 = vector.extract_strided_slice %55 {offsets = [0, 0], sizes = [8, 32], strides = [1, 1]} : vector<8x96xbf16> to vector<8x32xbf16>
    %57 = vector.shape_cast %56 : vector<8x32xbf16> to vector<1x8x32xbf16>
    %58 = vector.extract_strided_slice %55 {offsets = [0, 32], sizes = [8, 32], strides = [1, 1]} : vector<8x96xbf16> to vector<8x32xbf16>
    %59 = vector.shape_cast %58 : vector<8x32xbf16> to vector<1x8x32xbf16>
    %60 = vector.extract_strided_slice %55 {offsets = [0, 64], sizes = [8, 32], strides = [1, 1]} : vector<8x96xbf16> to vector<8x32xbf16>
    %61 = vector.shape_cast %60 : vector<8x32xbf16> to vector<1x8x32xbf16>
    %62 = arith.extf %18 : vector<1x8x8xbf16> to vector<1x8x8xf32>
    %cst_48 = arith.constant 0.000000e+00 : f32
    %63 = vector.broadcast %cst_48 : f32 to vector<1x8x8xf32>
    %64 = arith.cmpf oeq, %62, %63 : vector<1x8x8xf32>
    %cst_49 = arith.constant -1.000000e+09 : f32
    %cst_50 = arith.constant 0.000000e+00 : f32
    %65 = vector.broadcast %cst_49 : f32 to vector<1x8x8xf32>
    %66 = vector.broadcast %cst_50 : f32 to vector<1x8x8xf32>
    %67 = arith.select %64, %65, %66 : vector<1x8x8xi1>, vector<1x8x8xf32>
    %68 = vector.extract_strided_slice %57 {offsets = [0, 0, 0], sizes = [1, 8, 8], strides = [1, 1, 1]} : vector<1x8x32xbf16> to vector<1x8x8xbf16>
    %69 = vector.extract_strided_slice %59 {offsets = [0, 0, 0], sizes = [1, 8, 8], strides = [1, 1, 1]} : vector<1x8x32xbf16> to vector<1x8x8xbf16>
    %70 = vector.extract_strided_slice %61 {offsets = [0, 0, 0], sizes = [1, 8, 8], strides = [1, 1, 1]} : vector<1x8x32xbf16> to vector<1x8x8xbf16>
    "tpu.trace_start"() <{level = 10 : i32, message = "bqd,bkd->bqk"}> : () -> ()
    %cst_51 = arith.constant dense<0.000000e+00> : vector<1x8x8xf32>
    %71 = tpu.matmul %68, %69, %cst_51 {dimension_numbers = #tpu.dot_dimension_numbers<[2], [2], [1], [1], [0, 0, 0, 1, 1, 1], [0], [0]>} : vector<1x8x8xbf16>, vector<1x8x8xbf16>, vector<1x8x8xf32> -> vector<1x8x8xf32>
    "tpu.trace_stop"() : () -> ()
    %72 = arith.addf %71, %67 : vector<1x8x8xf32>
    %cst_52 = arith.constant dense<0xFF800000> : vector<1x8xf32>
    %73 = vector.multi_reduction <maximumf>, %72, %cst_52 [2] : vector<1x8x8xf32> to vector<1x8xf32>
    %74 = vector.shape_cast %73 : vector<1x8xf32> to vector<1x8x1xf32>
    %75 = vector.broadcast %74 : vector<1x8x1xf32> to vector<1x8x8xf32>
    %76 = arith.subf %72, %75 : vector<1x8x8xf32>
    %77 = math.exp %76 : vector<1x8x8xf32>
    %cst_53 = arith.constant dense<0.000000e+00> : vector<1x8xf32>
    %78 = vector.multi_reduction <add>, %77, %cst_53 [2] : vector<1x8x8xf32> to vector<1x8xf32>
    %79 = vector.shape_cast %78 : vector<1x8xf32> to vector<1x8x1xf32>
    %80 = tpu.reciprocal %79 {approx = true} : vector<1x8x1xf32> -> vector<1x8x1xf32>
    %81 = vector.broadcast %80 : vector<1x8x1xf32> to vector<1x8x8xf32>
    %82 = arith.mulf %77, %81 : vector<1x8x8xf32>
    %83 = arith.truncf %82 : vector<1x8x8xf32> to vector<1x8x8xbf16>
    "tpu.trace_start"() <{level = 10 : i32, message = "bqk,bkd->bqd"}> : () -> ()
    %cst_54 = arith.constant dense<0.000000e+00> : vector<1x8x8xf32>
    %84 = tpu.matmul %83, %70, %cst_54 {dimension_numbers = #tpu.dot_dimension_numbers<[2], [1], [1], [2], [0, 0, 0, 1, 1, 2], [0], [0]>} : vector<1x8x8xbf16>, vector<1x8x8xbf16>, vector<1x8x8xf32> -> vector<1x8x8xf32>
    "tpu.trace_stop"() : () -> ()
    %85 = arith.truncf %82 : vector<1x8x8xf32> to vector<1x8x8xbf16>
    %86 = vector.extract_strided_slice %57 {offsets = [0, 0, 8], sizes = [1, 8, 8], strides = [1, 1, 1]} : vector<1x8x32xbf16> to vector<1x8x8xbf16>
    %87 = vector.extract_strided_slice %59 {offsets = [0, 0, 8], sizes = [1, 8, 8], strides = [1, 1, 1]} : vector<1x8x32xbf16> to vector<1x8x8xbf16>
    %88 = vector.extract_strided_slice %61 {offsets = [0, 0, 8], sizes = [1, 8, 8], strides = [1, 1, 1]} : vector<1x8x32xbf16> to vector<1x8x8xbf16>
    "tpu.trace_start"() <{level = 10 : i32, message = "bqd,bkd->bqk"}> : () -> ()
    %cst_55 = arith.constant dense<0.000000e+00> : vector<1x8x8xf32>
    %89 = tpu.matmul %86, %87, %cst_55 {dimension_numbers = #tpu.dot_dimension_numbers<[2], [2], [1], [1], [0, 0, 0, 1, 1, 1], [0], [0]>} : vector<1x8x8xbf16>, vector<1x8x8xbf16>, vector<1x8x8xf32> -> vector<1x8x8xf32>
    "tpu.trace_stop"() : () -> ()
    %90 = arith.addf %89, %67 : vector<1x8x8xf32>
    %cst_56 = arith.constant dense<0xFF800000> : vector<1x8xf32>
    %91 = vector.multi_reduction <maximumf>, %90, %cst_56 [2] : vector<1x8x8xf32> to vector<1x8xf32>
    %92 = vector.shape_cast %91 : vector<1x8xf32> to vector<1x8x1xf32>
    %93 = vector.broadcast %92 : vector<1x8x1xf32> to vector<1x8x8xf32>
    %94 = arith.subf %90, %93 : vector<1x8x8xf32>
    %95 = math.exp %94 : vector<1x8x8xf32>
    %cst_57 = arith.constant dense<0.000000e+00> : vector<1x8xf32>
    %96 = vector.multi_reduction <add>, %95, %cst_57 [2] : vector<1x8x8xf32> to vector<1x8xf32>
    %97 = vector.shape_cast %96 : vector<1x8xf32> to vector<1x8x1xf32>
    %98 = tpu.reciprocal %97 {approx = true} : vector<1x8x1xf32> -> vector<1x8x1xf32>
    %99 = vector.broadcast %98 : vector<1x8x1xf32> to vector<1x8x8xf32>
    %100 = arith.mulf %95, %99 : vector<1x8x8xf32>
    %101 = arith.truncf %100 : vector<1x8x8xf32> to vector<1x8x8xbf16>
    "tpu.trace_start"() <{level = 10 : i32, message = "bqk,bkd->bqd"}> : () -> ()
    %cst_58 = arith.constant dense<0.000000e+00> : vector<1x8x8xf32>
    %102 = tpu.matmul %101, %88, %cst_58 {dimension_numbers = #tpu.dot_dimension_numbers<[2], [1], [1], [2], [0, 0, 0, 1, 1, 2], [0], [0]>} : vector<1x8x8xbf16>, vector<1x8x8xbf16>, vector<1x8x8xf32> -> vector<1x8x8xf32>
    "tpu.trace_stop"() : () -> ()
    %103 = arith.truncf %100 : vector<1x8x8xf32> to vector<1x8x8xbf16>
    %104 = vector.extract_strided_slice %57 {offsets = [0, 0, 16], sizes = [1, 8, 8], strides = [1, 1, 1]} : vector<1x8x32xbf16> to vector<1x8x8xbf16>
    %105 = vector.extract_strided_slice %59 {offsets = [0, 0, 16], sizes = [1, 8, 8], strides = [1, 1, 1]} : vector<1x8x32xbf16> to vector<1x8x8xbf16>
    %106 = vector.extract_strided_slice %61 {offsets = [0, 0, 16], sizes = [1, 8, 8], strides = [1, 1, 1]} : vector<1x8x32xbf16> to vector<1x8x8xbf16>
    "tpu.trace_start"() <{level = 10 : i32, message = "bqd,bkd->bqk"}> : () -> ()
    %cst_59 = arith.constant dense<0.000000e+00> : vector<1x8x8xf32>
    %107 = tpu.matmul %104, %105, %cst_59 {dimension_numbers = #tpu.dot_dimension_numbers<[2], [2], [1], [1], [0, 0, 0, 1, 1, 1], [0], [0]>} : vector<1x8x8xbf16>, vector<1x8x8xbf16>, vector<1x8x8xf32> -> vector<1x8x8xf32>
    "tpu.trace_stop"() : () -> ()
    %108 = arith.addf %107, %67 : vector<1x8x8xf32>
    %cst_60 = arith.constant dense<0xFF800000> : vector<1x8xf32>
    %109 = vector.multi_reduction <maximumf>, %108, %cst_60 [2] : vector<1x8x8xf32> to vector<1x8xf32>
    %110 = vector.shape_cast %109 : vector<1x8xf32> to vector<1x8x1xf32>
    %111 = vector.broadcast %110 : vector<1x8x1xf32> to vector<1x8x8xf32>
    %112 = arith.subf %108, %111 : vector<1x8x8xf32>
    %113 = math.exp %112 : vector<1x8x8xf32>
    %cst_61 = arith.constant dense<0.000000e+00> : vector<1x8xf32>
    %114 = vector.multi_reduction <add>, %113, %cst_61 [2] : vector<1x8x8xf32> to vector<1x8xf32>
    %115 = vector.shape_cast %114 : vector<1x8xf32> to vector<1x8x1xf32>
    %116 = tpu.reciprocal %115 {approx = true} : vector<1x8x1xf32> -> vector<1x8x1xf32>
    %117 = vector.broadcast %116 : vector<1x8x1xf32> to vector<1x8x8xf32>
    %118 = arith.mulf %113, %117 : vector<1x8x8xf32>
    %119 = arith.truncf %118 : vector<1x8x8xf32> to vector<1x8x8xbf16>
    "tpu.trace_start"() <{level = 10 : i32, message = "bqk,bkd->bqd"}> : () -> ()
    %cst_62 = arith.constant dense<0.000000e+00> : vector<1x8x8xf32>
    %120 = tpu.matmul %119, %106, %cst_62 {dimension_numbers = #tpu.dot_dimension_numbers<[2], [1], [1], [2], [0, 0, 0, 1, 1, 2], [0], [0]>} : vector<1x8x8xbf16>, vector<1x8x8xbf16>, vector<1x8x8xf32> -> vector<1x8x8xf32>
    "tpu.trace_stop"() : () -> ()
    %121 = arith.truncf %118 : vector<1x8x8xf32> to vector<1x8x8xbf16>
    %122 = vector.extract_strided_slice %57 {offsets = [0, 0, 24], sizes = [1, 8, 8], strides = [1, 1, 1]} : vector<1x8x32xbf16> to vector<1x8x8xbf16>
    %123 = vector.extract_strided_slice %59 {offsets = [0, 0, 24], sizes = [1, 8, 8], strides = [1, 1, 1]} : vector<1x8x32xbf16> to vector<1x8x8xbf16>
    %124 = vector.extract_strided_slice %61 {offsets = [0, 0, 24], sizes = [1, 8, 8], strides = [1, 1, 1]} : vector<1x8x32xbf16> to vector<1x8x8xbf16>
    "tpu.trace_start"() <{level = 10 : i32, message = "bqd,bkd->bqk"}> : () -> ()
    %cst_63 = arith.constant dense<0.000000e+00> : vector<1x8x8xf32>
    %125 = tpu.matmul %122, %123, %cst_63 {dimension_numbers = #tpu.dot_dimension_numbers<[2], [2], [1], [1], [0, 0, 0, 1, 1, 1], [0], [0]>} : vector<1x8x8xbf16>, vector<1x8x8xbf16>, vector<1x8x8xf32> -> vector<1x8x8xf32>
    "tpu.trace_stop"() : () -> ()
    %126 = arith.addf %125, %67 : vector<1x8x8xf32>
    %cst_64 = arith.constant dense<0xFF800000> : vector<1x8xf32>
    %127 = vector.multi_reduction <maximumf>, %126, %cst_64 [2] : vector<1x8x8xf32> to vector<1x8xf32>
    %128 = vector.shape_cast %127 : vector<1x8xf32> to vector<1x8x1xf32>
    %129 = vector.broadcast %128 : vector<1x8x1xf32> to vector<1x8x8xf32>
    %130 = arith.subf %126, %129 : vector<1x8x8xf32>
    %131 = math.exp %130 : vector<1x8x8xf32>
    %cst_65 = arith.constant dense<0.000000e+00> : vector<1x8xf32>
    %132 = vector.multi_reduction <add>, %131, %cst_65 [2] : vector<1x8x8xf32> to vector<1x8xf32>
    %133 = vector.shape_cast %132 : vector<1x8xf32> to vector<1x8x1xf32>
    %134 = tpu.reciprocal %133 {approx = true} : vector<1x8x1xf32> -> vector<1x8x1xf32>
    %135 = vector.broadcast %134 : vector<1x8x1xf32> to vector<1x8x8xf32>
    %136 = arith.mulf %131, %135 : vector<1x8x8xf32>
    %137 = arith.truncf %136 : vector<1x8x8xf32> to vector<1x8x8xbf16>
    "tpu.trace_start"() <{level = 10 : i32, message = "bqk,bkd->bqd"}> : () -> ()
    %cst_66 = arith.constant dense<0.000000e+00> : vector<1x8x8xf32>
    %138 = tpu.matmul %137, %124, %cst_66 {dimension_numbers = #tpu.dot_dimension_numbers<[2], [1], [1], [2], [0, 0, 0, 1, 1, 2], [0], [0]>} : vector<1x8x8xbf16>, vector<1x8x8xbf16>, vector<1x8x8xf32> -> vector<1x8x8xf32>
    "tpu.trace_stop"() : () -> ()
    %139 = arith.truncf %136 : vector<1x8x8xf32> to vector<1x8x8xbf16>
    %140 = vector.shape_cast %85 : vector<1x8x8xbf16> to vector<1x1x8x8xbf16>
    %141 = vector.shape_cast %103 : vector<1x8x8xbf16> to vector<1x1x8x8xbf16>
    %142 = vector.shape_cast %121 : vector<1x8x8xbf16> to vector<1x1x8x8xbf16>
    %143 = vector.shape_cast %139 : vector<1x8x8xbf16> to vector<1x1x8x8xbf16>
    %144 = tpu.concatenate %140, %141, %142, %143 in 1 : vector<1x1x8x8xbf16>, vector<1x1x8x8xbf16>, vector<1x1x8x8xbf16>, vector<1x1x8x8xbf16> -> vector<1x4x8x8xbf16>
    %145 = tpu.concatenate %84, %102, %120, %138 in 2 : vector<1x8x8xf32>, vector<1x8x8xf32>, vector<1x8x8xf32>, vector<1x8x8xf32> -> vector<1x8x32xf32>
    %146 = vector.shape_cast %145 : vector<1x8x32xf32> to vector<8x32xf32>
    %147 = arith.truncf %146 : vector<8x32xf32> to vector<8x32xbf16>
    %cst_67 = arith.constant dense<0.000000e+00> : vector<8x32xf32>
    %148 = tpu.matmul %147, %4, %cst_67 {dimension_numbers = #tpu.dot_dimension_numbers<[1], [0], [0], [1], [0, 0, 1, 1], [], []>} : vector<8x32xbf16>, vector<32x32xbf16>, vector<8x32xf32> -> vector<8x32xf32>
    %149 = arith.addf %21, %148 : vector<8x32xf32>
    %150 = vector.broadcast %5 : vector<1x32xf32> to vector<8x32xf32>
    %151 = arith.addf %149, %150 : vector<8x32xf32>
    %152 = vector.extract_strided_slice %0 {offsets = [1, 0], sizes = [1, 32], strides = [1, 1]} : vector<3x32xf32> to vector<1x32xf32>
    %153 = vector.shape_cast %152 : vector<1x32xf32> to vector<32xf32>
    %154 = vector.extract_strided_slice %1 {offsets = [1, 0], sizes = [1, 32], strides = [1, 1]} : vector<3x32xf32> to vector<1x32xf32>
    %155 = vector.shape_cast %154 : vector<1x32xf32> to vector<32xf32>
    %cst_68 = arith.constant dense<0.000000e+00> : vector<8xf32>
    %156 = vector.multi_reduction <add>, %151, %cst_68 [1] : vector<8x32xf32> to vector<8xf32>
    %157 = vector.shape_cast %156 : vector<8xf32> to vector<8x1xf32>
    %cst_69 = arith.constant 3.200000e+01 : f32
    %158 = vector.broadcast %cst_69 : f32 to vector<8x1xf32>
    %159 = arith.divf %157, %158 : vector<8x1xf32>
    %160 = vector.broadcast %159 : vector<8x1xf32> to vector<8x32xf32>
    %161 = arith.subf %151, %160 : vector<8x32xf32>
    %162 = arith.mulf %161, %161 : vector<8x32xf32>
    %cst_70 = arith.constant dense<0.000000e+00> : vector<8xf32>
    %163 = vector.multi_reduction <add>, %162, %cst_70 [1] : vector<8x32xf32> to vector<8xf32>
    %164 = vector.shape_cast %163 : vector<8xf32> to vector<8x1xf32>
    %cst_71 = arith.constant 3.200000e+01 : f32
    %165 = vector.broadcast %cst_71 : f32 to vector<8x1xf32>
    %166 = arith.divf %164, %165 : vector<8x1xf32>
    %167 = vector.broadcast %159 : vector<8x1xf32> to vector<8x32xf32>
    %168 = arith.subf %151, %167 : vector<8x32xf32>
    %cst_72 = arith.constant 9.99999997E-7 : f32
    %169 = vector.broadcast %cst_72 : f32 to vector<8x1xf32>
    %170 = arith.addf %166, %169 : vector<8x1xf32>
    %171 = math.rsqrt %170 : vector<8x1xf32>
    %172 = vector.broadcast %171 : vector<8x1xf32> to vector<8x32xf32>
    %173 = arith.mulf %168, %172 : vector<8x32xf32>
    %174 = vector.shape_cast %153 : vector<32xf32> to vector<1x32xf32>
    %175 = vector.broadcast %174 : vector<1x32xf32> to vector<8x32xf32>
    %176 = arith.mulf %173, %175 : vector<8x32xf32>
    %177 = vector.shape_cast %155 : vector<32xf32> to vector<1x32xf32>
    %178 = vector.broadcast %177 : vector<1x32xf32> to vector<8x32xf32>
    %179 = arith.addf %176, %178 : vector<8x32xf32>
    %180 = arith.truncf %179 : vector<8x32xf32> to vector<8x32xbf16>
    %cst_73 = arith.constant dense<0.000000e+00> : vector<8x32xf32>
    %181 = tpu.matmul %180, %6, %cst_73 {dimension_numbers = #tpu.dot_dimension_numbers<[1], [0], [0], [1], [0, 0, 1, 1], [], []>} : vector<8x32xbf16>, vector<32x32xbf16>, vector<8x32xf32> -> vector<8x32xf32>
    %182 = vector.broadcast %7 : vector<1x32xf32> to vector<8x32xf32>
    %183 = arith.addf %181, %182 : vector<8x32xf32>
    %184 = arith.truncf %183 : vector<8x32xf32> to vector<8x32xbf16>
    %cst_74 = arith.constant dense<0.000000e+00> : vector<16x64xf32>
    %185 = tpu.matmul %22, %8, %cst_74 {dimension_numbers = #tpu.dot_dimension_numbers<[1], [0], [0], [1], [0, 0, 1, 1], [], []>} : vector<16x32xbf16>, vector<32x64xbf16>, vector<16x64xf32> -> vector<16x64xf32>
    %186 = vector.broadcast %9 : vector<1x64xf32> to vector<16x64xf32>
    %187 = arith.addf %185, %186 : vector<16x64xf32>
    %188 = arith.truncf %187 : vector<16x64xf32> to vector<16x64xbf16>
    %189 = vector.shape_cast %184 : vector<8x32xbf16> to vector<1x8x32xbf16>
    %190 = vector.extract_strided_slice %188 {offsets = [0, 0], sizes = [16, 32], strides = [1, 1]} : vector<16x64xbf16> to vector<16x32xbf16>
    %191 = vector.shape_cast %190 : vector<16x32xbf16> to vector<1x16x32xbf16>
    %192 = vector.extract_strided_slice %188 {offsets = [0, 32], sizes = [16, 32], strides = [1, 1]} : vector<16x64xbf16> to vector<16x32xbf16>
    %193 = vector.shape_cast %192 : vector<16x32xbf16> to vector<1x16x32xbf16>
    %194 = arith.extf %19 : vector<1x1x16xbf16> to vector<1x1x16xf32>
    %cst_75 = arith.constant 0.000000e+00 : f32
    %195 = vector.broadcast %cst_75 : f32 to vector<1x1x16xf32>
    %196 = arith.cmpf oeq, %194, %195 : vector<1x1x16xf32>
    %cst_76 = arith.constant -1.000000e+09 : f32
    %cst_77 = arith.constant 0.000000e+00 : f32
    %197 = vector.broadcast %cst_76 : f32 to vector<1x1x16xf32>
    %198 = vector.broadcast %cst_77 : f32 to vector<1x1x16xf32>
    %199 = arith.select %196, %197, %198 : vector<1x1x16xi1>, vector<1x1x16xf32>
    %200 = vector.extract_strided_slice %189 {offsets = [0, 0, 0], sizes = [1, 8, 8], strides = [1, 1, 1]} : vector<1x8x32xbf16> to vector<1x8x8xbf16>
    %201 = vector.extract_strided_slice %191 {offsets = [0, 0, 0], sizes = [1, 16, 8], strides = [1, 1, 1]} : vector<1x16x32xbf16> to vector<1x16x8xbf16>
    %202 = vector.extract_strided_slice %193 {offsets = [0, 0, 0], sizes = [1, 16, 8], strides = [1, 1, 1]} : vector<1x16x32xbf16> to vector<1x16x8xbf16>
    "tpu.trace_start"() <{level = 10 : i32, message = "bqd,bkd->bqk"}> : () -> ()
    %cst_78 = arith.constant dense<0.000000e+00> : vector<1x8x16xf32>
    %203 = tpu.matmul %200, %201, %cst_78 {dimension_numbers = #tpu.dot_dimension_numbers<[2], [2], [1], [1], [0, 0, 0, 1, 1, 1], [0], [0]>} : vector<1x8x8xbf16>, vector<1x16x8xbf16>, vector<1x8x16xf32> -> vector<1x8x16xf32>
    "tpu.trace_stop"() : () -> ()
    %204 = vector.broadcast %199 : vector<1x1x16xf32> to vector<1x8x16xf32>
    %205 = arith.addf %203, %204 : vector<1x8x16xf32>
    %cst_79 = arith.constant dense<0xFF800000> : vector<1x8xf32>
    %206 = vector.multi_reduction <maximumf>, %205, %cst_79 [2] : vector<1x8x16xf32> to vector<1x8xf32>
    %207 = vector.shape_cast %206 : vector<1x8xf32> to vector<1x8x1xf32>
    %208 = vector.broadcast %207 : vector<1x8x1xf32> to vector<1x8x16xf32>
    %209 = arith.subf %205, %208 : vector<1x8x16xf32>
    %210 = math.exp %209 : vector<1x8x16xf32>
    %cst_80 = arith.constant dense<0.000000e+00> : vector<1x8xf32>
    %211 = vector.multi_reduction <add>, %210, %cst_80 [2] : vector<1x8x16xf32> to vector<1x8xf32>
    %212 = vector.shape_cast %211 : vector<1x8xf32> to vector<1x8x1xf32>
    %213 = tpu.reciprocal %212 {approx = true} : vector<1x8x1xf32> -> vector<1x8x1xf32>
    %214 = vector.broadcast %213 : vector<1x8x1xf32> to vector<1x8x16xf32>
    %215 = arith.mulf %210, %214 : vector<1x8x16xf32>
    %216 = arith.truncf %215 : vector<1x8x16xf32> to vector<1x8x16xbf16>
    "tpu.trace_start"() <{level = 10 : i32, message = "bqk,bkd->bqd"}> : () -> ()
    %cst_81 = arith.constant dense<0.000000e+00> : vector<1x8x8xf32>
    %217 = tpu.matmul %216, %202, %cst_81 {dimension_numbers = #tpu.dot_dimension_numbers<[2], [1], [1], [2], [0, 0, 0, 1, 1, 2], [0], [0]>} : vector<1x8x16xbf16>, vector<1x16x8xbf16>, vector<1x8x8xf32> -> vector<1x8x8xf32>
    "tpu.trace_stop"() : () -> ()
    %218 = arith.truncf %215 : vector<1x8x16xf32> to vector<1x8x16xbf16>
    %219 = vector.extract_strided_slice %189 {offsets = [0, 0, 8], sizes = [1, 8, 8], strides = [1, 1, 1]} : vector<1x8x32xbf16> to vector<1x8x8xbf16>
    %220 = vector.extract_strided_slice %191 {offsets = [0, 0, 8], sizes = [1, 16, 8], strides = [1, 1, 1]} : vector<1x16x32xbf16> to vector<1x16x8xbf16>
    %221 = vector.extract_strided_slice %193 {offsets = [0, 0, 8], sizes = [1, 16, 8], strides = [1, 1, 1]} : vector<1x16x32xbf16> to vector<1x16x8xbf16>
    "tpu.trace_start"() <{level = 10 : i32, message = "bqd,bkd->bqk"}> : () -> ()
    %cst_82 = arith.constant dense<0.000000e+00> : vector<1x8x16xf32>
    %222 = tpu.matmul %219, %220, %cst_82 {dimension_numbers = #tpu.dot_dimension_numbers<[2], [2], [1], [1], [0, 0, 0, 1, 1, 1], [0], [0]>} : vector<1x8x8xbf16>, vector<1x16x8xbf16>, vector<1x8x16xf32> -> vector<1x8x16xf32>
    "tpu.trace_stop"() : () -> ()
    %223 = vector.broadcast %199 : vector<1x1x16xf32> to vector<1x8x16xf32>
    %224 = arith.addf %222, %223 : vector<1x8x16xf32>
    %cst_83 = arith.constant dense<0xFF800000> : vector<1x8xf32>
    %225 = vector.multi_reduction <maximumf>, %224, %cst_83 [2] : vector<1x8x16xf32> to vector<1x8xf32>
    %226 = vector.shape_cast %225 : vector<1x8xf32> to vector<1x8x1xf32>
    %227 = vector.broadcast %226 : vector<1x8x1xf32> to vector<1x8x16xf32>
    %228 = arith.subf %224, %227 : vector<1x8x16xf32>
    %229 = math.exp %228 : vector<1x8x16xf32>
    %cst_84 = arith.constant dense<0.000000e+00> : vector<1x8xf32>
    %230 = vector.multi_reduction <add>, %229, %cst_84 [2] : vector<1x8x16xf32> to vector<1x8xf32>
    %231 = vector.shape_cast %230 : vector<1x8xf32> to vector<1x8x1xf32>
    %232 = tpu.reciprocal %231 {approx = true} : vector<1x8x1xf32> -> vector<1x8x1xf32>
    %233 = vector.broadcast %232 : vector<1x8x1xf32> to vector<1x8x16xf32>
    %234 = arith.mulf %229, %233 : vector<1x8x16xf32>
    %235 = arith.truncf %234 : vector<1x8x16xf32> to vector<1x8x16xbf16>
    "tpu.trace_start"() <{level = 10 : i32, message = "bqk,bkd->bqd"}> : () -> ()
    %cst_85 = arith.constant dense<0.000000e+00> : vector<1x8x8xf32>
    %236 = tpu.matmul %235, %221, %cst_85 {dimension_numbers = #tpu.dot_dimension_numbers<[2], [1], [1], [2], [0, 0, 0, 1, 1, 2], [0], [0]>} : vector<1x8x16xbf16>, vector<1x16x8xbf16>, vector<1x8x8xf32> -> vector<1x8x8xf32>
    "tpu.trace_stop"() : () -> ()
    %237 = arith.truncf %234 : vector<1x8x16xf32> to vector<1x8x16xbf16>
    %238 = vector.extract_strided_slice %189 {offsets = [0, 0, 16], sizes = [1, 8, 8], strides = [1, 1, 1]} : vector<1x8x32xbf16> to vector<1x8x8xbf16>
    %239 = vector.extract_strided_slice %191 {offsets = [0, 0, 16], sizes = [1, 16, 8], strides = [1, 1, 1]} : vector<1x16x32xbf16> to vector<1x16x8xbf16>
    %240 = vector.extract_strided_slice %193 {offsets = [0, 0, 16], sizes = [1, 16, 8], strides = [1, 1, 1]} : vector<1x16x32xbf16> to vector<1x16x8xbf16>
    "tpu.trace_start"() <{level = 10 : i32, message = "bqd,bkd->bqk"}> : () -> ()
    %cst_86 = arith.constant dense<0.000000e+00> : vector<1x8x16xf32>
    %241 = tpu.matmul %238, %239, %cst_86 {dimension_numbers = #tpu.dot_dimension_numbers<[2], [2], [1], [1], [0, 0, 0, 1, 1, 1], [0], [0]>} : vector<1x8x8xbf16>, vector<1x16x8xbf16>, vector<1x8x16xf32> -> vector<1x8x16xf32>
    "tpu.trace_stop"() : () -> ()
    %242 = vector.broadcast %199 : vector<1x1x16xf32> to vector<1x8x16xf32>
    %243 = arith.addf %241, %242 : vector<1x8x16xf32>
    %cst_87 = arith.constant dense<0xFF800000> : vector<1x8xf32>
    %244 = vector.multi_reduction <maximumf>, %243, %cst_87 [2] : vector<1x8x16xf32> to vector<1x8xf32>
    %245 = vector.shape_cast %244 : vector<1x8xf32> to vector<1x8x1xf32>
    %246 = vector.broadcast %245 : vector<1x8x1xf32> to vector<1x8x16xf32>
    %247 = arith.subf %243, %246 : vector<1x8x16xf32>
    %248 = math.exp %247 : vector<1x8x16xf32>
    %cst_88 = arith.constant dense<0.000000e+00> : vector<1x8xf32>
    %249 = vector.multi_reduction <add>, %248, %cst_88 [2] : vector<1x8x16xf32> to vector<1x8xf32>
    %250 = vector.shape_cast %249 : vector<1x8xf32> to vector<1x8x1xf32>
    %251 = tpu.reciprocal %250 {approx = true} : vector<1x8x1xf32> -> vector<1x8x1xf32>
    %252 = vector.broadcast %251 : vector<1x8x1xf32> to vector<1x8x16xf32>
    %253 = arith.mulf %248, %252 : vector<1x8x16xf32>
    %254 = arith.truncf %253 : vector<1x8x16xf32> to vector<1x8x16xbf16>
    "tpu.trace_start"() <{level = 10 : i32, message = "bqk,bkd->bqd"}> : () -> ()
    %cst_89 = arith.constant dense<0.000000e+00> : vector<1x8x8xf32>
    %255 = tpu.matmul %254, %240, %cst_89 {dimension_numbers = #tpu.dot_dimension_numbers<[2], [1], [1], [2], [0, 0, 0, 1, 1, 2], [0], [0]>} : vector<1x8x16xbf16>, vector<1x16x8xbf16>, vector<1x8x8xf32> -> vector<1x8x8xf32>
    "tpu.trace_stop"() : () -> ()
    %256 = arith.truncf %253 : vector<1x8x16xf32> to vector<1x8x16xbf16>
    %257 = vector.extract_strided_slice %189 {offsets = [0, 0, 24], sizes = [1, 8, 8], strides = [1, 1, 1]} : vector<1x8x32xbf16> to vector<1x8x8xbf16>
    %258 = vector.extract_strided_slice %191 {offsets = [0, 0, 24], sizes = [1, 16, 8], strides = [1, 1, 1]} : vector<1x16x32xbf16> to vector<1x16x8xbf16>
    %259 = vector.extract_strided_slice %193 {offsets = [0, 0, 24], sizes = [1, 16, 8], strides = [1, 1, 1]} : vector<1x16x32xbf16> to vector<1x16x8xbf16>
    "tpu.trace_start"() <{level = 10 : i32, message = "bqd,bkd->bqk"}> : () -> ()
    %cst_90 = arith.constant dense<0.000000e+00> : vector<1x8x16xf32>
    %260 = tpu.matmul %257, %258, %cst_90 {dimension_numbers = #tpu.dot_dimension_numbers<[2], [2], [1], [1], [0, 0, 0, 1, 1, 1], [0], [0]>} : vector<1x8x8xbf16>, vector<1x16x8xbf16>, vector<1x8x16xf32> -> vector<1x8x16xf32>
    "tpu.trace_stop"() : () -> ()
    %261 = vector.broadcast %199 : vector<1x1x16xf32> to vector<1x8x16xf32>
    %262 = arith.addf %260, %261 : vector<1x8x16xf32>
    %cst_91 = arith.constant dense<0xFF800000> : vector<1x8xf32>
    %263 = vector.multi_reduction <maximumf>, %262, %cst_91 [2] : vector<1x8x16xf32> to vector<1x8xf32>
    %264 = vector.shape_cast %263 : vector<1x8xf32> to vector<1x8x1xf32>
    %265 = vector.broadcast %264 : vector<1x8x1xf32> to vector<1x8x16xf32>
    %266 = arith.subf %262, %265 : vector<1x8x16xf32>
    %267 = math.exp %266 : vector<1x8x16xf32>
    %cst_92 = arith.constant dense<0.000000e+00> : vector<1x8xf32>
    %268 = vector.multi_reduction <add>, %267, %cst_92 [2] : vector<1x8x16xf32> to vector<1x8xf32>
    %269 = vector.shape_cast %268 : vector<1x8xf32> to vector<1x8x1xf32>
    %270 = tpu.reciprocal %269 {approx = true} : vector<1x8x1xf32> -> vector<1x8x1xf32>
    %271 = vector.broadcast %270 : vector<1x8x1xf32> to vector<1x8x16xf32>
    %272 = arith.mulf %267, %271 : vector<1x8x16xf32>
    %273 = arith.truncf %272 : vector<1x8x16xf32> to vector<1x8x16xbf16>
    "tpu.trace_start"() <{level = 10 : i32, message = "bqk,bkd->bqd"}> : () -> ()
    %cst_93 = arith.constant dense<0.000000e+00> : vector<1x8x8xf32>
    %274 = tpu.matmul %273, %259, %cst_93 {dimension_numbers = #tpu.dot_dimension_numbers<[2], [1], [1], [2], [0, 0, 0, 1, 1, 2], [0], [0]>} : vector<1x8x16xbf16>, vector<1x16x8xbf16>, vector<1x8x8xf32> -> vector<1x8x8xf32>
    "tpu.trace_stop"() : () -> ()
    %275 = arith.truncf %272 : vector<1x8x16xf32> to vector<1x8x16xbf16>
    %276 = vector.shape_cast %218 : vector<1x8x16xbf16> to vector<1x1x8x16xbf16>
    %277 = vector.shape_cast %237 : vector<1x8x16xbf16> to vector<1x1x8x16xbf16>
    %278 = vector.shape_cast %256 : vector<1x8x16xbf16> to vector<1x1x8x16xbf16>
    %279 = vector.shape_cast %275 : vector<1x8x16xbf16> to vector<1x1x8x16xbf16>
    %280 = tpu.concatenate %276, %277, %278, %279 in 1 : vector<1x1x8x16xbf16>, vector<1x1x8x16xbf16>, vector<1x1x8x16xbf16>, vector<1x1x8x16xbf16> -> vector<1x4x8x16xbf16>
    %281 = tpu.concatenate %217, %236, %255, %274 in 2 : vector<1x8x8xf32>, vector<1x8x8xf32>, vector<1x8x8xf32>, vector<1x8x8xf32> -> vector<1x8x32xf32>
    %282 = vector.shape_cast %281 : vector<1x8x32xf32> to vector<8x32xf32>
    %283 = arith.truncf %282 : vector<8x32xf32> to vector<8x32xbf16>
    %cst_94 = arith.constant dense<0.000000e+00> : vector<8x32xf32>
    %284 = tpu.matmul %283, %10, %cst_94 {dimension_numbers = #tpu.dot_dimension_numbers<[1], [0], [0], [1], [0, 0, 1, 1], [], []>} : vector<8x32xbf16>, vector<32x32xbf16>, vector<8x32xf32> -> vector<8x32xf32>
    %285 = arith.addf %151, %284 : vector<8x32xf32>
    %286 = vector.broadcast %11 : vector<1x32xf32> to vector<8x32xf32>
    %287 = arith.addf %285, %286 : vector<8x32xf32>
    %288 = vector.extract_strided_slice %0 {offsets = [2, 0], sizes = [1, 32], strides = [1, 1]} : vector<3x32xf32> to vector<1x32xf32>
    %289 = vector.shape_cast %288 : vector<1x32xf32> to vector<32xf32>
    %290 = vector.extract_strided_slice %1 {offsets = [2, 0], sizes = [1, 32], strides = [1, 1]} : vector<3x32xf32> to vector<1x32xf32>
    %291 = vector.shape_cast %290 : vector<1x32xf32> to vector<32xf32>
    %cst_95 = arith.constant dense<0.000000e+00> : vector<8xf32>
    %292 = vector.multi_reduction <add>, %287, %cst_95 [1] : vector<8x32xf32> to vector<8xf32>
    %293 = vector.shape_cast %292 : vector<8xf32> to vector<8x1xf32>
    %cst_96 = arith.constant 3.200000e+01 : f32
    %294 = vector.broadcast %cst_96 : f32 to vector<8x1xf32>
    %295 = arith.divf %293, %294 : vector<8x1xf32>
    %296 = vector.broadcast %295 : vector<8x1xf32> to vector<8x32xf32>
    %297 = arith.subf %287, %296 : vector<8x32xf32>
    %298 = arith.mulf %297, %297 : vector<8x32xf32>
    %cst_97 = arith.constant dense<0.000000e+00> : vector<8xf32>
    %299 = vector.multi_reduction <add>, %298, %cst_97 [1] : vector<8x32xf32> to vector<8xf32>
    %300 = vector.shape_cast %299 : vector<8xf32> to vector<8x1xf32>
    %cst_98 = arith.constant 3.200000e+01 : f32
    %301 = vector.broadcast %cst_98 : f32 to vector<8x1xf32>
    %302 = arith.divf %300, %301 : vector<8x1xf32>
    %303 = vector.broadcast %295 : vector<8x1xf32> to vector<8x32xf32>
    %304 = arith.subf %287, %303 : vector<8x32xf32>
    %cst_99 = arith.constant 9.99999997E-7 : f32
    %305 = vector.broadcast %cst_99 : f32 to vector<8x1xf32>
    %306 = arith.addf %302, %305 : vector<8x1xf32>
    %307 = math.rsqrt %306 : vector<8x1xf32>
    %308 = vector.broadcast %307 : vector<8x1xf32> to vector<8x32xf32>
    %309 = arith.mulf %304, %308 : vector<8x32xf32>
    %310 = vector.shape_cast %289 : vector<32xf32> to vector<1x32xf32>
    %311 = vector.broadcast %310 : vector<1x32xf32> to vector<8x32xf32>
    %312 = arith.mulf %309, %311 : vector<8x32xf32>
    %313 = vector.shape_cast %291 : vector<32xf32> to vector<1x32xf32>
    %314 = vector.broadcast %313 : vector<1x32xf32> to vector<8x32xf32>
    %315 = arith.addf %312, %314 : vector<8x32xf32>
    %316 = arith.truncf %315 : vector<8x32xf32> to vector<8x32xbf16>
    %cst_100 = arith.constant dense<0.000000e+00> : vector<8x64xf32>
    %317 = tpu.matmul %316, %12, %cst_100 {dimension_numbers = #tpu.dot_dimension_numbers<[1], [0], [0], [1], [0, 0, 1, 1], [], []>} : vector<8x32xbf16>, vector<32x64xbf16>, vector<8x64xf32> -> vector<8x64xf32>
    %318 = vector.broadcast %13 : vector<1x64xf32> to vector<8x64xf32>
    %319 = arith.addf %317, %318 : vector<8x64xf32>
    %cst_101 = arith.constant 0.000000e+00 : f32
    %320 = vector.broadcast %cst_101 : f32 to vector<8x64xf32>
    %321 = arith.maximumf %319, %320 : vector<8x64xf32>
    %322 = arith.truncf %321 : vector<8x64xf32> to vector<8x64xbf16>
    %cst_102 = arith.constant dense<0.000000e+00> : vector<8x32xf32>
    %323 = tpu.matmul %322, %14, %cst_102 {dimension_numbers = #tpu.dot_dimension_numbers<[1], [0], [0], [1], [0, 0, 1, 1], [], []>} : vector<8x64xbf16>, vector<64x32xbf16>, vector<8x32xf32> -> vector<8x32xf32>
    %324 = arith.addf %287, %323 : vector<8x32xf32>
    %325 = vector.broadcast %15 : vector<1x32xf32> to vector<8x32xf32>
    %326 = arith.addf %324, %325 : vector<8x32xf32>
    %327 = vector.shape_cast %326 : vector<8x32xf32> to vector<1x8x32xf32>
    %c0_103 = arith.constant 0 : index
    %c0_104 = arith.constant 0 : index
    %c0_105 = arith.constant 0 : index
    %328 = vector.load %arg21[%c0_103, %c0_104, %c0_105] : memref<1x8x32xf32, #tpu.memory_space<vmem>>, vector<1x8x32xf32>
    tpu.vector_store %arg21[%c0_103, %c0_104, %c0_105], %327 {strides = array<i32>} : memref<1x8x32xf32, #tpu.memory_space<vmem>>, vector<1x8x32xf32>,
    %c0_106 = arith.constant 0 : index
    %c0_107 = arith.constant 0 : index
    %c0_108 = arith.constant 0 : index
    %c0_109 = arith.constant 0 : index
    %329 = vector.load %arg22[%c0_106, %c0_107, %c0_108, %c0_109] : memref<1x4x8x8xbf16, #tpu.memory_space<vmem>>, vector<1x4x8x8xbf16>
    tpu.vector_store %arg22[%c0_106, %c0_107, %c0_108, %c0_109], %144 {strides = array<i32>} : memref<1x4x8x8xbf16, #tpu.memory_space<vmem>>, vector<1x4x8x8xbf16>,
    %c0_110 = arith.constant 0 : index
    %c0_111 = arith.constant 0 : index
    %c0_112 = arith.constant 0 : index
    %c0_113 = arith.constant 0 : index
    %330 = vector.load %arg23[%c0_110, %c0_111, %c0_112, %c0_113] : memref<1x4x8x16xbf16, #tpu.memory_space<vmem>>, vector<1x4x8x16xbf16>
    tpu.vector_store %arg23[%c0_110, %c0_111, %c0_112, %c0_113], %280 {strides = array<i32>} : memref<1x4x8x16xbf16, #tpu.memory_space<vmem>>, vector<1x4x8x16xbf16>,
    return
  }
  func.func @transform_0(%arg0: i32) -> (i32, i32, i32) {
    %c0_i32 = arith.constant 0 : i32
    %c0_i32_0 = arith.constant 0 : i32
    %c0_i32_1 = arith.constant 0 : i32
    return %arg0, %c0_i32, %c0_i32_0 : i32, i32, i32
  }
  func.func @transform_1(%arg0: i32) -> (i32, i32, i32) {
    %c0_i32 = arith.constant 0 : i32
    %c0_i32_0 = arith.constant 0 : i32
    %c0_i32_1 = arith.constant 0 : i32
    return %arg0, %c0_i32, %c0_i32_0 : i32, i32, i32
  }
  func.func @transform_2(%arg0: i32) -> (i32, i32, i32) {
    %c0_i32 = arith.constant 0 : i32
    %c0_i32_0 = arith.constant 0 : i32
    %c0_i32_1 = arith.constant 0 : i32
    return %arg0, %c0_i32, %c0_i32_0 : i32, i32, i32
  }
  func.func @transform_3(%arg0: i32) -> (i32, i32, i32) {
    %c0_i32 = arith.constant 0 : i32
    %c0_i32_0 = arith.constant 0 : i32
    %c0_i32_1 = arith.constant 0 : i32
    return %arg0, %c0_i32, %c0_i32_0 : i32, i32, i32
  }
  func.func @transform_4(%arg0: i32) -> (i32, i32) {
    %c0_i32 = arith.constant 0 : i32
    %c0_i32_0 = arith.constant 0 : i32
    %c0_i32_1 = arith.constant 0 : i32
    return %c0_i32, %c0_i32_0 : i32, i32
  }
  func.func @transform_5(%arg0: i32) -> (i32, i32) {
    %c0_i32 = arith.constant 0 : i32
    %c0_i32_0 = arith.constant 0 : i32
    %c0_i32_1 = arith.constant 0 : i32
    return %c0_i32, %c0_i32_0 : i32, i32
  }
  func.func @transform_6(%arg0: i32) -> (i32, i32) {
    %c0_i32 = arith.constant 0 : i32
    %c0_i32_0 = arith.constant 0 : i32
    %c0_i32_1 = arith.constant 0 : i32
    return %c0_i32, %c0_i32_0 : i32, i32
  }
  func.func @transform_7(%arg0: i32) -> (i32, i32) {
    %c0_i32 = arith.constant 0 : i32
    %c0_i32_0 = arith.constant 0 : i32
    %c0_i32_1 = arith.constant 0 : i32
    return %c0_i32, %c0_i32_0 : i32, i32
  }
  func.func @transform_8(%arg0: i32) -> (i32, i32) {
    %c0_i32 = arith.constant 0 : i32
    %c0_i32_0 = arith.constant 0 : i32
    %c0_i32_1 = arith.constant 0 : i32
    return %c0_i32, %c0_i32_0 : i32, i32
  }
  func.func @transform_9(%arg0: i32) -> (i32, i32) {
    %c0_i32 = arith.constant 0 : i32
    %c0_i32_0 = arith.constant 0 : i32
    %c0_i32_1 = arith.constant 0 : i32
    return %c0_i32, %c0_i32_0 : i32, i32
  }
  func.func @transform_10(%arg0: i32) -> (i32, i32) {
    %c0_i32 = arith.constant 0 : i32
    %c0_i32_0 = arith.constant 0 : i32
    %c0_i32_1 = arith.constant 0 : i32
    return %c0_i32, %c0_i32_0 : i32, i32
  }
  func.func @transform_11(%arg0: i32) -> (i32, i32) {
    %c0_i32 = arith.constant 0 : i32
    %c0_i32_0 = arith.constant 0 : i32
    %c0_i32_1 = arith.constant 0 : i32
    return %c0_i32, %c0_i32_0 : i32, i32
  }
  func.func @transform_12(%arg0: i32) -> (i32, i32) {
    %c0_i32 = arith.constant 0 : i32
    %c0_i32_0 = arith.constant 0 : i32
    %c0_i32_1 = arith.constant 0 : i32
    return %c0_i32, %c0_i32_0 : i32, i32
  }
  func.func @transform_13(%arg0: i32) -> (i32, i32) {
    %c0_i32 = arith.constant 0 : i32
    %c0_i32_0 = arith.constant 0 : i32
    %c0_i32_1 = arith.constant 0 : i32
    return %c0_i32, %c0_i32_0 : i32, i32
  }
  func.func @transform_14(%arg0: i32) -> (i32, i32) {
    %c0_i32 = arith.constant 0 : i32
    %c0_i32_0 = arith.constant 0 : i32
    %c0_i32_1 = arith.constant 0 : i32
    return %c0_i32, %c0_i32_0 : i32, i32
  }
  func.func @transform_15(%arg0: i32) -> (i32, i32) {
    %c0_i32 = arith.constant 0 : i32
    %c0_i32_0 = arith.constant 0 : i32
    %c0_i32_1 = arith.constant 0 : i32
    return %c0_i32, %c0_i32_0 : i32, i32
  }
  func.func @transform_16(%arg0: i32) -> (i32, i32) {
    %c0_i32 = arith.constant 0 : i32
    %c0_i32_0 = arith.constant 0 : i32
    %c0_i32_1 = arith.constant 0 : i32
    return %c0_i32, %c0_i32_0 : i32, i32
  }
  func.func @transform_17(%arg0: i32) -> (i32, i32) {
    %c0_i32 = arith.constant 0 : i32
    %c0_i32_0 = arith.constant 0 : i32
    %c0_i32_1 = arith.constant 0 : i32
    return %c0_i32, %c0_i32_0 : i32, i32
  }
  func.func @transform_18(%arg0: i32) -> (i32, i32) {
    %c0_i32 = arith.constant 0 : i32
    %c0_i32_0 = arith.constant 0 : i32
    %c0_i32_1 = arith.constant 0 : i32
    return %c0_i32, %c0_i32_0 : i32, i32
  }
  func.func @transform_19(%arg0: i32) -> (i32, i32) {
    %c0_i32 = arith.constant 0 : i32
    %c0_i32_0 = arith.constant 0 : i32
    %c0_i32_1 = arith.constant 0 : i32
    return %c0_i32, %c0_i32_0 : i32, i32
  }
  func.func @transform_20(%arg0: i32) -> (i32, i32, i32) {
    %c0_i32 = arith.constant 0 : i32
    %c0_i32_0 = arith.constant 0 : i32
    %c0_i32_1 = arith.constant 0 : i32
    return %arg0, %c0_i32, %c0_i32_0 : i32, i32, i32
  }
  func.func @transform_21(%arg0: i32) -> (i32, i32, i32, i32) {
    %c0_i32 = arith.constant 0 : i32
    %c0_i32_0 = arith.constant 0 : i32
    %c0_i32_1 = arith.constant 0 : i32
    %c0_i32_2 = arith.constant 0 : i32
    return %arg0, %c0_i32, %c0_i32_0, %c0_i32_1 : i32, i32, i32, i32
  }
  func.func @transform_22(%arg0: i32) -> (i32, i32, i32, i32) {
    %c0_i32 = arith.constant 0 : i32
    %c0_i32_0 = arith.constant 0 : i32
    %c0_i32_1 = arith.constant 0 : i32
    %c0_i32_2 = arith.constant 0 : i32
    return %arg0, %c0_i32, %c0_i32_0, %c0_i32_1 : i32, i32, i32, i32
  }
}

</mosaic_0001>

<bundles_post_ra>
// kernel: tpu_custom_call.1
= control target key start
LH: loop header
LB: loop body
LE: loop exit
PB: predicated region body
PF: predicated region fallthrough
CT: control target
= control target key end

     0   :  { %s5471_s0 = inlined_call_operand.hbm [shape: bf16[2,8,32], index: 0, kind: input, shape index: {}]   ;;  %s5472_s1 = inlined_call_operand.hbm [shape: bf16[2,16,32], index: 1, kind: input, shape index: {}]   ;;  %s5473_s2 = inlined_call_operand.hbm [shape: bf16[2,8,8], index: 2, kind: input, shape index: {}]   ;;  %s5474_s3 = inlined_call_operand.hbm [shape: bf16[2,1,16], index: 3, kind: input, shape index: {}]   ;;  %s5475_s4 = inlined_call_operand.hbm [shape: f32[3,32], index: 4, kind: input, shape index: {}]   ;;  %s5476_s5 = inlined_call_operand.hbm [shape: f32[3,32], index: 5, kind: input, shape index: {}]   ;;  %s5477_s6 = inlined_call_operand.hbm [shape: bf16[32,96], index: 6, kind: input, shape index: {}]   ;;  %s5478_s7 = inlined_call_operand.hbm [shape: f32[1,96], index: 7, kind: input, shape index: {}]   ;;  %s5479_s8 = inlined_call_operand.hbm [shape: bf16[32,32], index: 8, kind: input, shape index: {}]   ;;  %s5480_s9 = inlined_call_operand.hbm [shape: f32[1,32], index: 9, kind: input, shape index: {}]   ;;  %s5481_s10 = inlined_call_operand.hbm [shape: bf16[32,32], index: 10, kind: input, shape index: {}]   ;;  %s5482_s11 = inlined_call_operand.hbm [shape: f32[1,32], index: 11, kind: input, shape index: {}]   ;;  %s5483_s12 = inlined_call_operand.hbm [shape: bf16[32,64], index: 12, kind: input, shape index: {}]   ;;  %s5484_s13 = inlined_call_operand.hbm [shape: f32[1,64], index: 13, kind: input, shape index: {}]   ;;  %s5485_s14 = inlined_call_operand.hbm [shape: bf16[32,32], index: 14, kind: input, shape index: {}]   ;;  %s5486_s15 = inlined_call_operand.hbm [shape: f32[1,32], index: 15, kind: input, shape index: {}]   ;;  %s5487_s16 = inlined_call_operand.hbm [shape: bf16[32,64], index: 16, kind: input, shape index: {}]   ;;  %s5488_s17 = inlined_call_operand.hbm [shape: f32[1,64], index: 17, kind: input, shape index: {}]   ;;  %s5489_s18 = inlined_call_operand.hbm [shape: bf16[64,32], index: 18, kind: input, shape index: {}]   ;;  %s5490_s19 = inlined_call_operand.hbm [shape: f32[1,32], index: 19, kind: input, shape index: {}]   ;;  %s5491_s20 = inlined_call_operand.hbm [shape: f32[2,8,32], index: 20, kind: output, shape index: {0}]   ;;  %s5492_s21 = inlined_call_operand.hbm [shape: bf16[2,4,8,8], index: 21, kind: output, shape index: {1}]   ;;  %s5493_s22 = inlined_call_operand.hbm [shape: bf16[2,4,8,16], index: 22, kind: output, shape index: {2}]  }
   0x1   :  { %5531 = sst [smem:[#allocation57_spill]] %s5471_s0 }
   0x2   :  { %5532 = sst [smem:[#allocation58_spill]] %s5472_s1 }
   0x3   :  { %5533 = sst [smem:[#allocation59_spill]] %s5473_s2 }
   0x4   :  { %5534 = sst [smem:[#allocation60_spill]] %s5474_s3 }
   0x5   :  { %5535 = sst [smem:[#allocation61_spill]] %s5475_s4 }
   0x6   :  { %5536 = sst [smem:[#allocation62_spill]] %s5476_s5 }
   0x7   :  { %5537 = sst [smem:[#allocation63_spill]] %s5477_s6 }
   0x8   :  { %5538 = sst [smem:[#allocation64_spill]] %s5478_s7 }
   0x9   :  { %5539 = sst [smem:[#allocation65_spill]] %s5479_s8 }
   0xa   :  { %5540 = sst [smem:[#allocation66_spill]] %s5480_s9 }
   0xb   :  { %5541 = sst [smem:[#allocation67_spill]] %s5481_s10 }
   0xc   :  { %5542 = sst [smem:[#allocation68_spill]] %s5482_s11 }
   0xd   :  { %5543 = sst [smem:[#allocation69_spill]] %s5484_s13 }
   0xe   :  { %5544 = sst [smem:[#allocation70_spill]] %s5485_s14 }
   0xf   :  { %5545 = sst [smem:[#allocation71_spill]] %s5486_s15 }
  0x10   :  { %5546 = sst [smem:[#allocation72_spill]] %s5487_s16 }
  0x11   :  { %5547 = sst [smem:[#allocation73_spill]] %s5488_s17 }
  0x12   :  { %5548 = sst [smem:[#allocation74_spill]] %s5489_s18 }
  0x13   :  { %5549 = sst [smem:[#allocation75_spill]] %s5490_s19 }
  0x14   :  { %5550 = sst [smem:[#allocation76_spill]] %s5491_s20 }
  0x15   :  { %5551 = sst [smem:[#allocation77_spill]] %s5492_s21 }
  0x16   :  { %5552 = sst [smem:[#allocation78_spill]] %s5493_s22 }
  0x17   :  { %28 = vsyncpa [#allocation3], 0 }
  0x18   :  { %30 = vsyncpa [#allocation3 + $0x1], 0 }
  0x19   :  { %31 = vsyncpa [#allocation6], 0 }
  0x1a   :  { %33 = vsyncpa [#allocation6 + $0x1], 0 }
  0x1b   :  { %34 = vsyncpa [#allocation9], 0 }
  0x1c   :  { %36 = vsyncpa [#allocation9 + $0x1], 0 }
  0x1d   :  { %37 = vsyncpa [#allocation12], 0 }
  0x1e   :  { %38 = vsyncpa [#allocation15], 0 }
  0x1f   :  { %39 = vsyncpa [#allocation18], 0 }
  0x20   :  { %40 = vsyncpa [#allocation21], 0 }
  0x21   :  { %41 = vsyncpa [#allocation24], 0 }
  0x22   :  { %42 = vsyncpa [#allocation27], 0 }
  0x23   :  { %43 = vsyncpa [#allocation30], 0 }
  0x24   :  { %44 = vsyncpa [#allocation33], 0 }
  0x25   :  { %45 = vsyncpa [#allocation4], 0 }
  0x26   :  { %47 = vsyncpa [#allocation4 + $0x1], 0 }
  0x27   :  { %48 = vsyncpa [#allocation36], 0 }
  0x28   :  { %50 = vsyncpa [#allocation36 + $0x1], 0  ;;  %s4470_s3 = smov 0   ;;  %s4472_s28 = smov 0  }
  0x29   :  { %s4474_s29 = smov 0   ;;  %s4476_s30 = smov 0  }
  0x2a LB: > { %5553 = sst [smem:[#allocation52_spill]] %s4307_s29  ;;  %s4313_s4 = smov [#allocation10]   ;;  %s4311_s30 = sphi %s4476_s30, %s5624_s30   ;;  %s4307_s29 = sphi %s4474_s29, %s5626_s29   ;;  %s4303_s28 = sphi %s4472_s28, %s5628_s28   ;;  %s4299_s3 = sphi %s4470_s3, %s5627_s3  }
  0x2b   : > { %s592_s0 = sshll.u32 %s4313_s4, 4  ;;  %s4491_s23 = sadd.s32 4294967295, %s4311_s30   ;;  %s4496_s0 = int_to_ptr.vmem [resolvable:$true] %s592_s0 }
  0x2c   : > { %p2947_p0 = scmp.ge.s32.totalorder %s4311_s30, 1  ;;  %p5509_p1 = scmp.eq.s32.totalorder %s4491_s23, 0 }
  0x2d   : > { %p579_p2 = scmp.lt.s32.totalorder %s4311_s30, 3  ;;  %s4314_s5 = smov [#allocation11]  }
  0x2e   : > { %s603_s24 = sshll.u32 %s4314_s5, 4  ;;  %s4315_s6 = smov [#allocation14]   ;;  %s4505_s24 = int_to_ptr.vmem [resolvable:$true] %s603_s24 }
  0x2f   : > { %p4498_p3 = pnand %p2947_p0, %p579_p2  ;;  %s627_s25 = sshll.u32 %s4315_s6, 4  ;;  %s4513_s25 = int_to_ptr.vmem [resolvable:$true] %s627_s25 }
  0x30   : > { %s4316_s2 = smov [#allocation17]   ;;  %s5557_s22 = sld [smem:[#allocation61_spill]] }
  0x31   : > { %s5554_s1 = scalar_select %p4498_p3, 1, 0 }
  0x32   : > { %p3345_p5 = pneg %p4498_p3  ;;  %s4515_s27 = sshll.u32 %s4316_s2, 4  ;;  %s652_s27 = int_to_ptr.vmem [resolvable:$true] %s4515_s27 }
  0x33   : > { %5555 = sst [smem:[#allocation53_spill]] %s5554_s1 }
  0x34   : > { %p4509_p6 = pnand %p3345_p5, %p5509_p1 }
  0x36   : > { %s5556_s26 = scalar_select %p4509_p6, 1, 0 }
  0x37   : > { %s3573_s21 = scalar_lea.hbm %s5557_s22, 64  ;;  %p4525_p8 = pneg %p4509_p6 }
  0x38   : > { %p3574_p7 = scmp.ne.s32.totalorder %s5557_s22, %s3573_s21  ;;  %p3580_p11 = scmp.lt.u32.totalorder %s3573_s21, %s5557_s22 }
  0x39   : > { %s5558_s6 = scalar_select %p4525_p8, 1, 0 }
  0x3a   : > { %p3576_p9 = pnand %p4525_p8, %p3574_p7 }
  0x3c   : > { %p3577_p10 = pneg %p3576_p9 }
  0x3e   : > { %p3582_p12 = pnand %p3580_p11, %p3577_p10 }
  0x40   : > { %3585 = shalt.err (!%p3582_p12)
}
  0x41   : > { %s3586_s20 = scalar_lea.vmem %s4496_s0, 64  ;;  %p3594_p5 = scmp.lt.s32.totalorder %s4496_s0, %s4496_s0 }
  0x42   : > { %p3587_p13 = scmp.ne.s32.totalorder %s4496_s0, %s3586_s20  ;;  %p3595_p4 = scmp.lt.s32.totalorder %s3586_s20, %s3586_s20 }
  0x44   : > { %p3589_p0 = pnand %p3587_p13, %p4525_p8  ;;  %p3596_p7 = por %p3595_p4, %p3594_p5 }
  0x46   : > { %p3590_p2 = pneg %p3589_p0 }
  0x48   : > { %p3597_p9 = pnand %p3596_p7, %p3590_p2 }
  0x4a   : > { %3600 = shalt.err (!%p3597_p9)
}
  0x4b   : > { %3348 = dma.hbm_to_vmem [thread:$0]  (!%p4509_p6), %s5557_s22, 64, %s4496_s0, [#allocation9]  }
  0x4c   : > { %s5559_s5 = sld [smem:[#allocation62_spill]] }
  0x52   : > { %s3601_s2 = scalar_lea.hbm %s5559_s5, 64 }
  0x53   : > { %p3602_p10 = scmp.ne.s32.totalorder %s5559_s5, %s3601_s2  ;;  %p3608_p12 = scmp.lt.u32.totalorder %s3601_s2, %s5559_s5 }
  0x55   : > { %p3604_p4 = pnand %p3602_p10, %p4525_p8 }
  0x57   : > { %p3605_p11 = pneg %p3604_p4 }
  0x59   : > { %p3610_p13 = pnand %p3608_p12, %p3605_p11 }
  0x5b   : > { %3613 = shalt.err (!%p3610_p13)
}
  0x5c   : > { %s3614_s0 = scalar_lea.vmem %s4505_s24, 64  ;;  %p3622_p7 = scmp.lt.s32.totalorder %s4505_s24, %s4505_s24 }
  0x5d   : > { %p3615_p0 = scmp.ne.s32.totalorder %s4505_s24, %s3614_s0  ;;  %p3623_p9 = scmp.lt.s32.totalorder %s3614_s0, %s3614_s0 }
  0x5f   : > { %p3617_p2 = pnand %p3615_p0, %p4525_p8  ;;  %p3624_p10 = por %p3623_p9, %p3622_p7 }
  0x61   : > { %p3618_p5 = pneg %p3617_p2 }
  0x63   : > { %p3625_p4 = pnand %p3624_p10, %p3618_p5 }
  0x65   : > { %3628 = shalt.err (!%p3625_p4)
}
  0x66   : > { %3351 = dma.hbm_to_vmem [thread:$0]  (!%p4509_p6), %s5559_s5, 64, %s4505_s24, [#allocation12]  }
  0x67   : > { %s5560_s7 = sld [smem:[#allocation64_spill]] }
  0x6d   : > { %s3629_s21 = scalar_lea.hbm %s5560_s7, 16 }
  0x6e   : > { %p3630_p11 = scmp.ne.s32.totalorder %s5560_s7, %s3629_s21  ;;  %p3636_p0 = scmp.lt.u32.totalorder %s3629_s21, %s5560_s7 }
  0x70   : > { %p3632_p12 = pnand %p3630_p11, %p4525_p8 }
  0x72   : > { %p3633_p13 = pneg %p3632_p12 }
  0x74   : > { %p3638_p2 = pnand %p3636_p0, %p3633_p13 }
  0x76   : > { %3641 = shalt.err (!%p3638_p2)
}
  0x77   : > { %s3642_s24 = scalar_lea.vmem %s4513_s25, 16  ;;  %s3649_s0 = scalar_lea.vmem %s4513_s25, 32 }
  0x78   : > { %p3643_p5 = scmp.ne.s32.totalorder %s4513_s25, %s3642_s24  ;;  %p3650_p10 = scmp.lt.s32.totalorder %s4513_s25, %s4513_s25 }
  0x79   : > { %p3651_p4 = scmp.lt.s32.totalorder %s3649_s0, %s3642_s24 }
  0x7a   : > { %p3645_p7 = pnand %p3643_p5, %p4525_p8 }
  0x7b   : > { %p3652_p11 = por %p3651_p4, %p3650_p10 }
  0x7c   : > { %p3646_p9 = pneg %p3645_p7 }
  0x7e   : > { %p3653_p12 = pnand %p3652_p11, %p3646_p9 }
  0x80   : > { %3656 = shalt.err (!%p3653_p12)
}
  0x81   : > { %3357 = dma.hbm_to_vmem [thread:$0]  (!%p4509_p6), %s5560_s7, 16, %s4513_s25, [#allocation15]  }
  0x82   : > { %s4317_s18 = smov [#allocation20]   ;;  %s5561_s9 = sld [smem:[#allocation66_spill]] }
  0x83   : > { %s675_s19 = sshll.u32 %s4317_s18, 4  ;;  %s676_s19 = int_to_ptr.vmem [resolvable:$true] %s675_s19 }
  0x88   : > { %s3657_s4 = scalar_lea.hbm %s5561_s9, 16 }
  0x89   : > { %p3658_p13 = scmp.ne.s32.totalorder %s5561_s9, %s3657_s4  ;;  %p3664_p5 = scmp.lt.u32.totalorder %s3657_s4, %s5561_s9 }
  0x8b   : > { %p3660_p0 = pnand %p3658_p13, %p4525_p8 }
  0x8d   : > { %p3661_p2 = pneg %p3660_p0 }
  0x8f   : > { %p3666_p7 = pnand %p3664_p5, %p3661_p2 }
  0x91   : > { %3669 = shalt.err (!%p3666_p7)
}
  0x92   : > { %s3670_s25 = scalar_lea.vmem %s652_s27, 16  ;;  %s3677_s14 = scalar_lea.vmem %s652_s27, 32 }
  0x93   : > { %p3671_p9 = scmp.ne.s32.totalorder %s652_s27, %s3670_s25  ;;  %p3678_p11 = scmp.lt.s32.totalorder %s652_s27, %s652_s27 }
  0x94   : > { %p3679_p12 = scmp.lt.s32.totalorder %s3677_s14, %s3670_s25 }
  0x95   : > { %p3673_p10 = pnand %p3671_p9, %p4525_p8 }
  0x96   : > { %p3680_p1 = por %p3679_p12, %p3678_p11 }
  0x97   : > { %p3674_p4 = pneg %p3673_p10 }
  0x99   : > { %p3681_p3 = pnand %p3680_p1, %p3674_p4 }
  0x9b   : > { %3684 = shalt.err (!%p3681_p3)
}
  0x9c   : > { %3363 = dma.hbm_to_vmem [thread:$0]  (!%p4509_p6), %s5561_s9, 16, %s652_s27, [#allocation18]  }
  0x9d   : > { %s5562_s11 = sld [smem:[#allocation68_spill]] }
  0xa3   : > { %s3685_s4 = scalar_lea.hbm %s5562_s11, 16 }
  0xa4   : > { %p3686_p13 = scmp.ne.s32.totalorder %s5562_s11, %s3685_s4  ;;  %p3692_p3 = scmp.lt.u32.totalorder %s3685_s4, %s5562_s11 }
  0xa6   : > { %p3688_p0 = pnand %p3686_p13, %p4525_p8 }
  0xa8   : > { %p3689_p1 = pneg %p3688_p0 }
  0xaa   : > { %p3694_p2 = pnand %p3692_p3, %p3689_p1 }
  0xac   : > { %3697 = shalt.err (!%p3694_p2)
}
  0xad   : > { %s3698_s25 = scalar_lea.vmem %s676_s19, 16  ;;  %s3705_s27 = scalar_lea.vmem %s676_s19, 32 }
  0xae   : > { %p3699_p5 = scmp.ne.s32.totalorder %s676_s19, %s3698_s25  ;;  %p3706_p10 = scmp.lt.s32.totalorder %s676_s19, %s676_s19 }
  0xaf   : > { %p3707_p4 = scmp.lt.s32.totalorder %s3705_s27, %s3698_s25 }
  0xb0   : > { %p3701_p7 = pnand %p3699_p5, %p4525_p8 }
  0xb1   : > { %p3708_p11 = por %p3707_p4, %p3706_p10 }
  0xb2   : > { %p3702_p9 = pneg %p3701_p7 }
  0xb4   : > { %p3709_p12 = pnand %p3708_p11, %p3702_p9 }
  0xb6   : > { %3712 = shalt.err (!%p3709_p12)
}
  0xb7   : > { %3369 = dma.hbm_to_vmem [thread:$0]  (!%p4509_p6), %s5562_s11, 16, %s676_s19, [#allocation21]  }
  0xb8   : > { %s4318_s18 = smov [#allocation23]   ;;  %s4319_s1 = smov [#allocation26]  }
  0xb9   : > { %s699_s21 = sshll.u32 %s4318_s18, 4  ;;  %s723_s4 = sshll.u32 %s4319_s1, 4  ;;  %s700_s21 = int_to_ptr.vmem [resolvable:$true] %s699_s21  ;;  %s724_s4 = int_to_ptr.vmem [resolvable:$true] %s723_s4 }
  0xba   : > { %s5563_s13 = sld [smem:[#allocation69_spill]] }
  0xc0   : > { %s3713_s24 = scalar_lea.hbm %s5563_s13, 16 }
  0xc1   : > { %p3714_p13 = scmp.ne.s32.totalorder %s5563_s13, %s3713_s24  ;;  %p3720_p3 = scmp.lt.u32.totalorder %s3713_s24, %s5563_s13 }
  0xc3   : > { %p3716_p0 = pnand %p3714_p13, %p4525_p8 }
  0xc5   : > { %p3717_p1 = pneg %p3716_p0 }
  0xc7   : > { %p3722_p2 = pnand %p3720_p3, %p3717_p1 }
  0xc9   : > { %3725 = shalt.err (!%p3722_p2)
}
  0xca   : > { %s3726_s19 = scalar_lea.vmem %s700_s21, 16  ;;  %s3733_s16 = scalar_lea.vmem %s700_s21, 32 }
  0xcb   : > { %p3727_p5 = scmp.ne.s32.totalorder %s700_s21, %s3726_s19  ;;  %p3734_p10 = scmp.lt.s32.totalorder %s700_s21, %s700_s21 }
  0xcc   : > { %p3735_p4 = scmp.lt.s32.totalorder %s3733_s16, %s3726_s19 }
  0xcd   : > { %p3729_p7 = pnand %p3727_p5, %p4525_p8 }
  0xce   : > { %p3736_p11 = por %p3735_p4, %p3734_p10 }
  0xcf   : > { %p3730_p9 = pneg %p3729_p7 }
  0xd1   : > { %p3737_p12 = pnand %p3736_p11, %p3730_p9 }
  0xd3   : > { %3740 = shalt.err (!%p3737_p12)
}
  0xd4   : > { %3375 = dma.hbm_to_vmem [thread:$0]  (!%p4509_p6), %s5563_s13, 16, %s700_s21, [#allocation24]  }
  0xd5   : > { %s5564_s15 = sld [smem:[#allocation71_spill]] }
  0xdb   : > { %s3741_s24 = scalar_lea.hbm %s5564_s15, 16 }
  0xdc   : > { %p3742_p13 = scmp.ne.s32.totalorder %s5564_s15, %s3741_s24  ;;  %p3748_p3 = scmp.lt.u32.totalorder %s3741_s24, %s5564_s15 }
  0xde   : > { %p3744_p0 = pnand %p3742_p13, %p4525_p8 }
  0xe0   : > { %p3745_p1 = pneg %p3744_p0 }
  0xe2   : > { %p3750_p2 = pnand %p3748_p3, %p3745_p1 }
  0xe4   : > { %3753 = shalt.err (!%p3750_p2)
}
  0xe5   : > { %s3754_s19 = scalar_lea.vmem %s724_s4, 16  ;;  %s3761_s21 = scalar_lea.vmem %s724_s4, 32 }
  0xe6   : > { %p3755_p5 = scmp.ne.s32.totalorder %s724_s4, %s3754_s19  ;;  %p3762_p10 = scmp.lt.s32.totalorder %s724_s4, %s724_s4 }
  0xe7   : > { %p3763_p4 = scmp.lt.s32.totalorder %s3761_s21, %s3754_s19 }
  0xe8   : > { %p3757_p7 = pnand %p3755_p5, %p4525_p8 }
  0xe9   : > { %p3764_p11 = por %p3763_p4, %p3762_p10 }
  0xea   : > { %p3758_p9 = pneg %p3757_p7 }
  0xec   : > { %p3765_p12 = pnand %p3764_p11, %p3758_p9 }
  0xee   : > { %3768 = shalt.err (!%p3765_p12)
}
  0xef   : > { %3381 = dma.hbm_to_vmem [thread:$0]  (!%p4509_p6), %s5564_s15, 16, %s724_s4, [#allocation27]  }
  0xf0   : > { %s4320_s1 = smov [#allocation29]   ;;  %s5565_s17 = sld [smem:[#allocation73_spill]] }
  0xf1   : > { %s747_s2 = sshll.u32 %s4320_s1, 4  ;;  %s748_s2 = int_to_ptr.vmem [resolvable:$true] %s747_s2 }
  0xf6   : > { %s3769_s0 = scalar_lea.hbm %s5565_s17, 16 }
  0xf7   : > { %p3770_p13 = scmp.ne.s32.totalorder %s5565_s17, %s3769_s0  ;;  %p3776_p3 = scmp.lt.u32.totalorder %s3769_s0, %s5565_s17 }
  0xf9   : > { %p3772_p0 = pnand %p3770_p13, %p4525_p8 }
  0xfb   : > { %p3773_p1 = pneg %p3772_p0 }
  0xfd   : > { %p3778_p2 = pnand %p3776_p3, %p3773_p1 }
  0xff   : > { %3781 = shalt.err (!%p3778_p2)
}
 0x100   : > { %s3782_s4 = scalar_lea.vmem %s748_s2, 16  ;;  %s3789_s21 = scalar_lea.vmem %s748_s2, 32 }
 0x101   : > { %p3783_p5 = scmp.ne.s32.totalorder %s748_s2, %s3782_s4  ;;  %p3790_p10 = scmp.lt.s32.totalorder %s748_s2, %s748_s2 }
 0x102   : > { %p3791_p4 = scmp.lt.s32.totalorder %s3789_s21, %s3782_s4 }
 0x103   : > { %p3785_p7 = pnand %p3783_p5, %p4525_p8 }
 0x104   : > { %p3792_p11 = por %p3791_p4, %p3790_p10 }
 0x105   : > { %p3786_p9 = pneg %p3785_p7 }
 0x107   : > { %p3793_p12 = pnand %p3792_p11, %p3786_p9 }
 0x109   : > { %3796 = shalt.err (!%p3793_p12)
}
 0x10a   : > { %3387 = dma.hbm_to_vmem [thread:$0]  (!%p4509_p6), %s5565_s17, 16, %s748_s2, [#allocation30]  }
 0x10b   : > { %s5511_s1 = sadd.s32 4294967294, %s4311_s30   ;;  %s4686_s20 = sadd.s32 1, %s4311_s30  }
 0x10c   : > { %5566 = sst [smem:[#allocation54_spill]] %s4686_s20  ;;  %s60_s24 = ssub.s32 %s4311_s30, %s4686_s20 }
 0x10d   : > { %s63_s0 = sadd.s32 1, %s4307_s29  ;;  %p61_p13 = scmp.eq.s32.totalorder %s60_s24, 0 }
 0x10e   : > { %p70_p0 = scmp.ne.s32.totalorder %s4307_s29, %s4303_s28  ;;  %p71_p1 = scmp.eq.s32.totalorder %s4311_s30, 0 }
 0x10f   : > { %p76_p3 = scmp.ne.s32.totalorder %s4303_s28, %s4299_s3  ;;  %p5568_p5 = scmp.eq.s32.totalorder %s4491_s23, 0 }
 0x110   : > { %s4697_s25 = scalar_select %p61_p13, %s4307_s29, %s63_s0  }
 0x111   : > { %p72_p2 = por %p71_p1, %p70_p0  ;;  %p4701_p7 = por %p5568_p5, %p76_p3 }
 0x112   : > { %5567 = sst [smem:[#allocation55_spill]] %s4697_s25  ;;  %p514_p9 = scmp.eq.s32.totalorder %s4491_s23, 1 }
 0x113   : > { %s5569_s2 = scalar_select %p4701_p7, 1, 0 }
 0x114   : > { %p520_p10 = scmp.eq.s32.totalorder %s5511_s1, 1  ;;  %p4708_p4 = por %p514_p9, %p70_p0 }
 0x115   : > { %p3433_p12 = scmp.lt.s32.totalorder %s4311_s30, 2  ;;  %s4718_s19 = sand.u32 1, %s4307_s29  }
 0x116   : > { %s5570_s27 = scalar_select %p4708_p4, 1, 0 }
 0x117   : > { %p4712_p11 = por %p520_p10, %p76_p3  ;;  %s2967_s21 = sshll.u32 %s4718_s19, 3 }
 0x118   : > { %p4722_p13 = pnand %p3433_p12, %p72_p2  ;;  %s3053_s18 = sshll.u32 %s4311_s30, 7 }
 0x119   : > { %s5571_s14 = scalar_select %p4712_p11, 1, 0 }
 0x11a   : > { %s5573_s16 = scalar_select %p4722_p13, 1, 0 }
 0x11b   : > { %5572 = sst [smem:[#allocation56_spill]] %s5571_s14  ;;  %s5574_s1 = sld [smem:[#allocation58_spill]] }
 0x11c   : > { %s804_s7 = scalar_lea.vmem [#allocation5], %s2967_s21  ;;  %s4321_s4 = smov [#allocation13]  }
 0x11d   : > { %s811_s9 = sshll.u32 %s804_s7, 4  ;;  %s4734_s11 = sshll.u32 %s4321_s4, 4  ;;  %s4732_s9 = int_to_ptr.vmem [resolvable:$true] %s811_s9  ;;  %s614_s11 = int_to_ptr.vmem [resolvable:$true] %s4734_s11 }
 0x11e   : > { %s5575_s13 = sand.u32 1, %s4311_s30   ;;  %p4744_p1 = pneg %p4722_p13 }
 0x11f   : > { %s4738_s15 = scalar_lea.sflag [#allocation6], %s5575_s13 }
 0x121   : > { %s4730_s5 = scalar_lea.hbm %s5574_s1, %s3053_s18  ;;  %s3802_s24 = scalar_lea.hbm %s5574_s1, 256 }
 0x122   : > { %s3797_s17 = scalar_lea.hbm %s4730_s5, 128  ;;  %p3803_p5 = scmp.lt.u32.totalorder %s4730_s5, %s5574_s1 }
 0x123   : > { %p3798_p0 = scmp.ne.s32.totalorder %s4730_s5, %s3797_s17  ;;  %p3804_p9 = scmp.lt.u32.totalorder %s3802_s24, %s3797_s17 }
 0x124   : > { %s5576_s18 = scalar_select %p4744_p1, 1, 0 }
 0x125   : > { %p3800_p3 = pnand %p4744_p1, %p3798_p0  ;;  %p3805_p10 = por %p3804_p9, %p3803_p5 }
 0x126   : > { %p3806_p12 = scmp.lt.u32.totalorder %s3797_s17, %s4730_s5 }
 0x127   : > { %p3801_p2 = pneg %p3800_p3 }
 0x128   : > { %p3807_p11 = por %p3806_p12, %p3805_p10 }
 0x12a   : > { %p3808_p4 = pnand %p3807_p11, %p3801_p2 }
 0x12c   : > { %3811 = shalt.err (!%p3808_p4)
}
 0x12d   : > { %s3812_s13 = scalar_lea.vmem %s4732_s9, 128  ;;  %s4322_s7 = smov [#allocation5]  }
 0x12e   : > { %p3813_p0 = scmp.ne.s32.totalorder %s4732_s9, %s3812_s13  ;;  %s3817_s21 = sshll.u32 %s4322_s7, 4  ;;  %s3818_s21 = int_to_ptr.vmem [resolvable:$false] %s3817_s21 }
 0x12f   : > { %s3819_s4 = scalar_lea.vmem %s3818_s21, 256  ;;  %p3820_p6 = scmp.lt.s32.totalorder %s4732_s9, %s3818_s21 }
 0x130   : > { %p3815_p3 = pnand %p3813_p0, %p4744_p1  ;;  %p3821_p8 = scmp.lt.s32.totalorder %s3819_s4, %s3812_s13 }
 0x132   : > { %p3816_p7 = pneg %p3815_p3  ;;  %p3822_p5 = por %p3821_p8, %p3820_p6 }
 0x134   : > { %p3823_p9 = pnand %p3822_p5, %p3816_p7 }
 0x136   : > { %3826 = shalt.err (!%p3823_p9)
}
 0x137   : > { %s4323_s17 = smov 64   ;;  %s4324_s24 = smov 4  }
 0x138   : > { %3400 = dma.hbm_to_vmem [thread:$0]  (!%p4722_p13), %s4730_s5, 128, %s4732_s9, %s4738_s15, %s4323_s17, %s4323_s17, %s4324_s24  }
 0x139   : > { %s5577_s13 = sld [smem:[#allocation63_spill]]  ;;  %p5578_p8 = scmp.ne.s32.totalorder %s5558_s6, 0 }
 0x13f   : > { %s3827_s21 = scalar_lea.hbm %s5577_s13, 256 }
 0x140   : > { %p3828_p6 = scmp.ne.s32.totalorder %s5577_s13, %s3827_s21  ;;  %p3834_p11 = scmp.lt.u32.totalorder %s3827_s21, %s5577_s13 }
 0x142   : > { %p3830_p7 = pnand %p3828_p6, %p5578_p8 }
 0x144   : > { %p3831_p4 = pneg %p3830_p7 }
 0x146   : > { %p3836_p2 = pnand %p3834_p11, %p3831_p4 }
 0x148   : > { %3839 = shalt.err (!%p3836_p2)
}
 0x149   : > { %s3840_s29 = scalar_lea.vmem %s614_s11, 256  ;;  %p3848_p3 = scmp.lt.s32.totalorder %s614_s11, %s614_s11 }
 0x14a   : > { %p3841_p10 = scmp.ne.s32.totalorder %s614_s11, %s3840_s29  ;;  %p3849_p5 = scmp.lt.s32.totalorder %s3840_s29, %s3840_s29 }
 0x14c   : > { %p3843_p12 = pnand %p3841_p10, %p5578_p8  ;;  %p3850_p9 = por %p3849_p5, %p3848_p3 }
 0x14e   : > { %p3844_p0 = pneg %p3843_p12 }
 0x150   : > { %p3851_p13 = pnand %p3850_p9, %p3844_p0 }
 0x152   : > { %3854 = shalt.err (!%p3851_p13)
}
 0x153   : > { %p5579_p6 = scmp.ne.s32.totalorder %s5556_s26, 0  ;;  %s4325_s5 = smov [#allocation16]  }
 0x154   : > { %s637_s1 = sshll.u32 %s4325_s5, 4  ;;  %s4326_s25 = smov [#allocation19]   ;;  %s638_s1 = int_to_ptr.vmem [resolvable:$true] %s637_s1 }
 0x155   : > { %3354 = dma.hbm_to_vmem [thread:$0]  (!%p5579_p6), %s5577_s13, 256, %s614_s11, [#allocation12], %s4323_s17, %s4323_s17, %s4324_s24  }
 0x156   : > { %s661_s0 = sshll.u32 %s4326_s25, 4  ;;  %s5580_s8 = sld [smem:[#allocation65_spill]]  ;;  %s662_s0 = int_to_ptr.vmem [resolvable:$true] %s661_s0 }
 0x15c   : > { %s3855_s21 = scalar_lea.hbm %s5580_s8, 256 }
 0x15d   : > { %p3856_p13 = scmp.ne.s32.totalorder %s5580_s8, %s3855_s21  ;;  %p3862_p11 = scmp.lt.u32.totalorder %s3855_s21, %s5580_s8 }
 0x15f   : > { %p3858_p7 = pnand %p3856_p13, %p5578_p8 }
 0x161   : > { %p3859_p4 = pneg %p3858_p7 }
 0x163   : > { %p3864_p2 = pnand %p3862_p11, %p3859_p4 }
 0x165   : > { %3867 = shalt.err (!%p3864_p2)
}
 0x166   : > { %s3868_s11 = scalar_lea.vmem %s638_s1, 256  ;;  %p3876_p3 = scmp.lt.s32.totalorder %s638_s1, %s638_s1 }
 0x167   : > { %p3869_p10 = scmp.ne.s32.totalorder %s638_s1, %s3868_s11  ;;  %p3877_p5 = scmp.lt.s32.totalorder %s3868_s11, %s3868_s11 }
 0x169   : > { %p3871_p12 = pnand %p3869_p10, %p5578_p8  ;;  %p3878_p9 = por %p3877_p5, %p3876_p3 }
 0x16b   : > { %p3872_p0 = pneg %p3871_p12 }
 0x16d   : > { %p3879_p1 = pnand %p3878_p9, %p3872_p0 }
 0x16f   : > { %3882 = shalt.err (!%p3879_p1)
}
 0x170   : > { %3360 = dma.hbm_to_vmem [thread:$0]  (!%p5579_p6), %s5580_s8, 256, %s638_s1, [#allocation15], %s4323_s17, %s4323_s17, %s4324_s24  }
 0x171   : > { %s5581_s10 = sld [smem:[#allocation67_spill]] }
 0x177   : > { %s3883_s25 = scalar_lea.hbm %s5581_s10, 256 }
 0x178   : > { %p3884_p13 = scmp.ne.s32.totalorder %s5581_s10, %s3883_s25  ;;  %p3890_p4 = scmp.lt.u32.totalorder %s3883_s25, %s5581_s10 }
 0x17a   : > { %p3886_p1 = pnand %p3884_p13, %p5578_p8 }
 0x17c   : > { %p3887_p7 = pneg %p3886_p1 }
 0x17e   : > { %p3892_p11 = pnand %p3890_p4, %p3887_p7 }
 0x180   : > { %3895 = shalt.err (!%p3892_p11)
}
 0x181   : > { %s3896_s9 = scalar_lea.vmem %s662_s0, 256  ;;  %p3904_p0 = scmp.lt.s32.totalorder %s662_s0, %s662_s0 }
 0x182   : > { %p3897_p2 = scmp.ne.s32.totalorder %s662_s0, %s3896_s9  ;;  %p3905_p3 = scmp.lt.s32.totalorder %s3896_s9, %s3896_s9 }
 0x184   : > { %p3899_p10 = pnand %p3897_p2, %p5578_p8  ;;  %p3906_p5 = por %p3905_p3, %p3904_p0 }
 0x186   : > { %p3900_p12 = pneg %p3899_p10 }
 0x188   : > { %p3907_p9 = pnand %p3906_p5, %p3900_p12 }
 0x18a   : > { %3910 = shalt.err (!%p3907_p9)
}
 0x18b   : > { %3366 = dma.hbm_to_vmem [thread:$0]  (!%p5579_p6), %s5581_s10, 256, %s662_s0, [#allocation18], %s4323_s17, %s4323_s17, %s4324_s24  }
 0x18c   : > { %s4327_s20 = smov [#allocation22]   ;;  %s4328_s22 = smov [#allocation25]  }
 0x18d   : > { %s685_s14 = sshll.u32 %s4327_s20, 4  ;;  %s709_s5 = sshll.u32 %s4328_s22, 4  ;;  %s686_s14 = int_to_ptr.vmem [resolvable:$true] %s685_s14  ;;  %s710_s5 = int_to_ptr.vmem [resolvable:$true] %s709_s5 }
 0x18e   : > { %s3911_s29 = scalar_lea.hbm %s5483_s12, 256 }
 0x18f   : > { %p3912_p13 = scmp.ne.s32.totalorder %s5483_s12, %s3911_s29  ;;  %p3918_p4 = scmp.lt.u32.totalorder %s3911_s29, %s5483_s12 }
 0x191   : > { %p3914_p1 = pnand %p3912_p13, %p5578_p8 }
 0x193   : > { %p3915_p7 = pneg %p3914_p1 }
 0x195   : > { %p3920_p11 = pnand %p3918_p4, %p3915_p7 }
 0x197   : > { %3923 = shalt.err (!%p3920_p11)
}
 0x198   : > { %s3924_s0 = scalar_lea.vmem %s686_s14, 256  ;;  %p3932_p0 = scmp.lt.s32.totalorder %s686_s14, %s686_s14 }
 0x199   : > { %p3925_p2 = scmp.ne.s32.totalorder %s686_s14, %s3924_s0  ;;  %p3933_p3 = scmp.lt.s32.totalorder %s3924_s0, %s3924_s0 }
 0x19b   : > { %p3927_p10 = pnand %p3925_p2, %p5578_p8  ;;  %p3934_p5 = por %p3933_p3, %p3932_p0 }
 0x19d   : > { %p3928_p12 = pneg %p3927_p10 }
 0x19f   : > { %p3935_p9 = pnand %p3934_p5, %p3928_p12 }
 0x1a1   : > { %3938 = shalt.err (!%p3935_p9)
}
 0x1a2   : > { %3372 = dma.hbm_to_vmem [thread:$0]  (!%p5579_p6), %s5483_s12, 256, %s686_s14, [#allocation21], %s4323_s17, %s4323_s17, %s4324_s24  }
 0x1a3   : > { %s5582_s7 = sld [smem:[#allocation70_spill]] }
 0x1a9   : > { %s3939_s29 = scalar_lea.hbm %s5582_s7, 256 }
 0x1aa   : > { %p3940_p13 = scmp.ne.s32.totalorder %s5582_s7, %s3939_s29  ;;  %p3946_p4 = scmp.lt.u32.totalorder %s3939_s29, %s5582_s7 }
 0x1ac   : > { %p3942_p1 = pnand %p3940_p13, %p5578_p8 }
 0x1ae   : > { %p3943_p7 = pneg %p3942_p1 }
 0x1b0   : > { %p3948_p11 = pnand %p3946_p4, %p3943_p7 }
 0x1b2   : > { %3951 = shalt.err (!%p3948_p11)
}
 0x1b3   : > { %s3952_s0 = scalar_lea.vmem %s710_s5, 256  ;;  %p3960_p0 = scmp.lt.s32.totalorder %s710_s5, %s710_s5 }
 0x1b4   : > { %p3953_p2 = scmp.ne.s32.totalorder %s710_s5, %s3952_s0  ;;  %p3961_p3 = scmp.lt.s32.totalorder %s3952_s0, %s3952_s0 }
 0x1b6   : > { %p3955_p10 = pnand %p3953_p2, %p5578_p8  ;;  %p3962_p5 = por %p3961_p3, %p3960_p0 }
 0x1b8   : > { %p3956_p12 = pneg %p3955_p10 }
 0x1ba   : > { %p3963_p9 = pnand %p3962_p5, %p3956_p12 }
 0x1bc   : > { %3966 = shalt.err (!%p3963_p9)
}
 0x1bd   : > { %3378 = dma.hbm_to_vmem [thread:$0]  (!%p5579_p6), %s5582_s7, 256, %s710_s5, [#allocation24], %s4323_s17, %s4323_s17, %s4324_s24  }
 0x1be   : > { %s4329_s20 = smov [#allocation28]   ;;  %s4330_s25 = smov [#allocation31]  }
 0x1bf   : > { %s733_s22 = sshll.u32 %s4329_s20, 4  ;;  %s757_s29 = sshll.u32 %s4330_s25, 4  ;;  %s734_s22 = int_to_ptr.vmem [resolvable:$true] %s733_s22  ;;  %s758_s29 = int_to_ptr.vmem [resolvable:$true] %s757_s29 }
 0x1c0   : > { %s5583_s9 = sld [smem:[#allocation72_spill]] }
 0x1c6   : > { %s3967_s1 = scalar_lea.hbm %s5583_s9, 256 }
 0x1c7   : > { %p3968_p13 = scmp.ne.s32.totalorder %s5583_s9, %s3967_s1  ;;  %p3974_p4 = scmp.lt.u32.totalorder %s3967_s1, %s5583_s9 }
 0x1c9   : > { %p3970_p1 = pnand %p3968_p13, %p5578_p8 }
 0x1cb   : > { %p3971_p7 = pneg %p3970_p1 }
 0x1cd   : > { %p3976_p11 = pnand %p3974_p4, %p3971_p7 }
 0x1cf   : > { %3979 = shalt.err (!%p3976_p11)
}
 0x1d0   : > { %s3980_s5 = scalar_lea.vmem %s734_s22, 256  ;;  %p3988_p0 = scmp.lt.s32.totalorder %s734_s22, %s734_s22 }
 0x1d1   : > { %p3981_p2 = scmp.ne.s32.totalorder %s734_s22, %s3980_s5  ;;  %p3989_p3 = scmp.lt.s32.totalorder %s3980_s5, %s3980_s5 }
 0x1d3   : > { %p3983_p10 = pnand %p3981_p2, %p5578_p8  ;;  %p3990_p5 = por %p3989_p3, %p3988_p0 }
 0x1d5   : > { %p3984_p12 = pneg %p3983_p10 }
 0x1d7   : > { %p3991_p9 = pnand %p3990_p5, %p3984_p12 }
 0x1d9   : > { %3994 = shalt.err (!%p3991_p9)
}
 0x1da   : > { %3384 = dma.hbm_to_vmem [thread:$0]  (!%p5579_p6), %s5583_s9, 256, %s734_s22, [#allocation27], %s4323_s17, %s4323_s17, %s4324_s24  }
 0x1db   : > { %s5584_s25 = sld [smem:[#allocation74_spill]] }
 0x1e1   : > { %s3995_s21 = scalar_lea.hbm %s5584_s25, 512 }
 0x1e2   : > { %p3996_p13 = scmp.ne.s32.totalorder %s5584_s25, %s3995_s21  ;;  %p4002_p4 = scmp.lt.u32.totalorder %s3995_s21, %s5584_s25 }
 0x1e4   : > { %p3998_p1 = pnand %p3996_p13, %p5578_p8 }
 0x1e6   : > { %p3999_p7 = pneg %p3998_p1 }
 0x1e8   : > { %p4004_p11 = pnand %p4002_p4, %p3999_p7 }
 0x1ea   : > { %4007 = shalt.err (!%p4004_p11)
}
 0x1eb   : > { %s4008_s5 = scalar_lea.vmem %s758_s29, 512  ;;  %p4016_p0 = scmp.lt.s32.totalorder %s758_s29, %s758_s29 }
 0x1ec   : > { %p4009_p2 = scmp.ne.s32.totalorder %s758_s29, %s4008_s5  ;;  %p4017_p3 = scmp.lt.s32.totalorder %s4008_s5, %s4008_s5 }
 0x1ee   : > { %p4011_p10 = pnand %p4009_p2, %p5578_p8  ;;  %p4018_p5 = por %p4017_p3, %p4016_p0 }
 0x1f0   : > { %p4012_p12 = pneg %p4011_p10 }
 0x1f2   : > { %p4019_p9 = pnand %p4018_p5, %p4012_p12 }
 0x1f4   : > { %4022 = shalt.err (!%p4019_p9)
}
 0x1f5   : > { %3390 = dma.hbm_to_vmem [thread:$0]  (!%p5579_p6), %s5584_s25, 512, %s758_s29, [#allocation30], %s4323_s17, %s4323_s17, %s4324_s24  }
 0x1f6   : > { %s4331_s10 = smov [#allocation32]   ;;  %s2965_s20 = sshll.u32 %s4718_s19, 2 }
 0x1f7   : > { %s771_s11 = sshll.u32 %s4331_s10, 4  ;;  %s5585_s1 = sld [smem:[#allocation75_spill]]  ;;  %s772_s11 = int_to_ptr.vmem [resolvable:$true] %s771_s11 }
 0x1fd   : > { %s4023_s0 = scalar_lea.hbm %s5585_s1, 16 }
 0x1fe   : > { %p4024_p13 = scmp.ne.s32.totalorder %s5585_s1, %s4023_s0  ;;  %p4030_p4 = scmp.lt.u32.totalorder %s4023_s0, %s5585_s1 }
 0x200   : > { %p4026_p1 = pnand %p4024_p13, %p5578_p8 }
 0x202   : > { %p4027_p7 = pneg %p4026_p1 }
 0x204   : > { %p4032_p11 = pnand %p4030_p4, %p4027_p7 }
 0x206   : > { %4035 = shalt.err (!%p4032_p11)
}
 0x207   : > { %s4036_s17 = scalar_lea.vmem %s772_s11, 16  ;;  %s4043_s24 = scalar_lea.vmem %s772_s11, 32 }
 0x208   : > { %p4037_p2 = scmp.ne.s32.totalorder %s772_s11, %s4036_s17  ;;  %p4044_p0 = scmp.lt.s32.totalorder %s772_s11, %s772_s11 }
 0x209   : > { %p4045_p3 = scmp.lt.s32.totalorder %s4043_s24, %s4036_s17 }
 0x20a   : > { %p4039_p10 = pnand %p4037_p2, %p5578_p8 }
 0x20b   : > { %p4046_p5 = por %p4045_p3, %p4044_p0 }
 0x20c   : > { %p4040_p12 = pneg %p4039_p10 }
 0x20e   : > { %p4047_p9 = pnand %p4046_p5, %p4040_p12 }
 0x210   : > { %4050 = shalt.err (!%p4047_p9)
}
 0x211   : > { %3393 = dma.hbm_to_vmem [thread:$0]  (!%p5579_p6), %s5585_s1, 16, %s772_s11, [#allocation33]  }
 0x212   : > { %s2966_s6 = sshll.u32 %s4311_s30, 6  ;;  %s5586_s21 = sld [smem:[#allocation57_spill]] }
 0x213   : > { %s786_s26 = scalar_lea.vmem [#allocation2], %s2965_s20  ;;  %s783_s14 = scalar_lea.sflag [#allocation3], %s4718_s19 }
 0x214   : > { %s793_s0 = sshll.u32 %s786_s26, 4  ;;  %p5587_p13 = scmp.ne.s32.totalorder %s5576_s18, 0  ;;  %s794_s0 = int_to_ptr.vmem [resolvable:$true] %s793_s0 }
 0x218   : > { %s4944_s4 = scalar_lea.hbm %s5586_s21, %s2966_s6  ;;  %s4056_s17 = scalar_lea.hbm %s5586_s21, 128 }
 0x219   : > { %s4051_s5 = scalar_lea.hbm %s4944_s4, 64  ;;  %p4057_p7 = scmp.lt.u32.totalorder %s4944_s4, %s5586_s21 }
 0x21a   : > { %p4052_p8 = scmp.ne.s32.totalorder %s4944_s4, %s4051_s5  ;;  %p4058_p4 = scmp.lt.u32.totalorder %s4056_s17, %s4051_s5 }
 0x21b   : > { %p4060_p2 = scmp.lt.u32.totalorder %s4051_s5, %s4944_s4 }
 0x21c   : > { %p4054_p6 = pnand %p4052_p8, %p5587_p13  ;;  %p4059_p11 = por %p4058_p4, %p4057_p7 }
 0x21e   : > { %p4055_p1 = pneg %p4054_p6  ;;  %p4061_p10 = por %p4060_p2, %p4059_p11 }
 0x220   : > { %p4062_p12 = pnand %p4061_p10, %p4055_p1 }
 0x222   : > { %4065 = shalt.err (!%p4062_p12)
}
 0x223   : > { %s4066_s8 = scalar_lea.vmem %s794_s0, 64  ;;  %s4332_s7 = smov [#allocation2]  }
 0x224   : > { %p4067_p0 = scmp.ne.s32.totalorder %s794_s0, %s4066_s8  ;;  %s4071_s10 = sshll.u32 %s4332_s7, 4  ;;  %s4072_s10 = int_to_ptr.vmem [resolvable:$false] %s4071_s10 }
 0x225   : > { %s4073_s26 = scalar_lea.vmem %s4072_s10, 128  ;;  %p4074_p9 = scmp.lt.s32.totalorder %s794_s0, %s4072_s10 }
 0x226   : > { %p4069_p3 = pnand %p4067_p0, %p5587_p13  ;;  %p4075_p8 = scmp.lt.s32.totalorder %s4073_s26, %s4066_s8 }
 0x228   : > { %p4070_p5 = pneg %p4069_p3  ;;  %p4076_p6 = por %p4075_p8, %p4074_p9 }
 0x22a   : > { %p4077_p4 = pnand %p4076_p6, %p4070_p5 }
 0x22c   : > { %4080 = shalt.err (!%p4077_p4)
}
 0x22d   : > { %p5588_p7 = scmp.ne.s32.totalorder %s5573_s16, 0  ;;  %s5589_s22 = sld [smem:[#allocation59_spill]] }
 0x22e   : > { %s825_s24 = scalar_lea.vmem [#allocation7], %s2965_s20 }
 0x22f   : > { %3397 = dma.hbm_to_vmem [thread:$0]  (!%p5588_p7), %s4944_s4, 64, %s794_s0, %s783_s14  }
 0x230   : > { %s832_s29 = sshll.u32 %s825_s24, 4  ;;  %s833_s29 = int_to_ptr.vmem [resolvable:$true] %s832_s29 }
 0x233   : > { %s4971_s17 = scalar_lea.hbm %s5589_s22, %s2966_s6  ;;  %s4086_s14 = scalar_lea.hbm %s5589_s22, 128 }
 0x234   : > { %s4081_s8 = scalar_lea.hbm %s4971_s17, 64  ;;  %p4087_p10 = scmp.lt.u32.totalorder %s4971_s17, %s5589_s22 }
 0x235   : > { %p4082_p1 = scmp.ne.s32.totalorder %s4971_s17, %s4081_s8  ;;  %p4088_p12 = scmp.lt.u32.totalorder %s4086_s14, %s4081_s8 }
 0x236   : > { %p4090_p3 = scmp.lt.u32.totalorder %s4081_s8, %s4971_s17 }
 0x237   : > { %p4084_p11 = pnand %p4082_p1, %p5587_p13  ;;  %p4089_p0 = por %p4088_p12, %p4087_p10 }
 0x239   : > { %p4085_p2 = pneg %p4084_p11  ;;  %p4091_p5 = por %p4090_p3, %p4089_p0 }
 0x23b   : > { %p4092_p9 = pnand %p4091_p5, %p4085_p2 }
 0x23d   : > { %4095 = shalt.err (!%p4092_p9)
}
 0x23e   : > { %s4096_s20 = scalar_lea.vmem %s833_s29, 64  ;;  %s4333_s10 = smov [#allocation7]  }
 0x23f   : > { %p4097_p8 = scmp.ne.s32.totalorder %s833_s29, %s4096_s20  ;;  %s4101_s26 = sshll.u32 %s4333_s10, 4  ;;  %s4102_s26 = int_to_ptr.vmem [resolvable:$false] %s4101_s26 }
 0x240   : > { %s4103_s5 = scalar_lea.vmem %s4102_s26, 128  ;;  %p4104_p1 = scmp.lt.s32.totalorder %s833_s29, %s4102_s26 }
 0x241   : > { %p4099_p6 = pnand %p4097_p8, %p5587_p13  ;;  %p4105_p11 = scmp.lt.s32.totalorder %s4103_s5, %s4096_s20 }
 0x243   : > { %p4100_p4 = pneg %p4099_p6  ;;  %p4106_p7 = por %p4105_p11, %p4104_p1 }
 0x245   : > { %p4107_p10 = pnand %p4106_p7, %p4100_p4 }
 0x247   : > { %4110 = shalt.err (!%p4107_p10)
}
 0x248   : > { %p5590_p12 = scmp.ne.s32.totalorder %s5573_s16, 0  ;;  %s2972_s11 = sshll.u32 %s4311_s30, 4 }
 0x249   : > { %s5591_s4 = sld [smem:[#allocation60_spill]]  ;;  %s842_s14 = scalar_lea.vmem [#allocation8], %s4718_s19 }
 0x24a   : > { %3403 = dma.hbm_to_vmem [thread:$0]  (!%p5590_p12), %s4971_s17, 64, %s833_s29, %s4738_s15  }
 0x24b   : > { %s849_s7 = sshll.u32 %s842_s14, 4  ;;  %s5592_s6 = sand.u32 1, %s4311_s30   ;;  %s850_s7 = int_to_ptr.vmem [resolvable:$true] %s849_s7 }
 0x24c   : > { %s840_s20 = scalar_lea.sflag [#allocation9], %s5592_s6 }
 0x24f   : > { %s4997_s0 = scalar_lea.hbm %s5591_s4, %s2972_s11  ;;  %s4116_s29 = scalar_lea.hbm %s5591_s4, 32 }
 0x250   : > { %s4111_s10 = scalar_lea.hbm %s4997_s0, 16  ;;  %p4117_p3 = scmp.lt.u32.totalorder %s4997_s0, %s5591_s4 }
 0x251   : > { %p4112_p7 = scmp.ne.s32.totalorder %s4997_s0, %s4111_s10  ;;  %p4118_p5 = scmp.lt.u32.totalorder %s4116_s29, %s4111_s10 }
 0x252   : > { %p4120_p8 = scmp.lt.u32.totalorder %s4111_s10, %s4997_s0 }
 0x253   : > { %p4114_p2 = pnand %p4112_p7, %p5587_p13  ;;  %p4119_p9 = por %p4118_p5, %p4117_p3 }
 0x255   : > { %p4115_p0 = pneg %p4114_p2  ;;  %p4121_p6 = por %p4120_p8, %p4119_p9 }
 0x257   : > { %p4122_p4 = pnand %p4121_p6, %p4115_p0 }
 0x259   : > { %4125 = shalt.err (!%p4122_p4)
}
 0x25a   : > { %s4126_s19 = scalar_lea.vmem %s850_s7, 16  ;;  %s4334_s11 = smov [#allocation8]  }
 0x25b   : > { %p4127_p1 = scmp.ne.s32.totalorder %s850_s7, %s4126_s19  ;;  %s4131_s24 = sshll.u32 %s4334_s11, 4  ;;  %s4132_s24 = int_to_ptr.vmem [resolvable:$false] %s4131_s24 }
 0x25c   : > { %s4133_s8 = scalar_lea.vmem %s4132_s24, 32  ;;  %p4134_p7 = scmp.lt.s32.totalorder %s850_s7, %s4132_s24 }
 0x25d   : > { %p4129_p11 = pnand %p4127_p1, %p5587_p13  ;;  %p4135_p2 = scmp.lt.s32.totalorder %s4133_s8, %s4126_s19 }
 0x25f   : > { %p4130_p10 = pneg %p4129_p11  ;;  %p4136_p12 = por %p4135_p2, %p4134_p7 }
 0x261   : > { %p4137_p3 = pnand %p4136_p12, %p4130_p10 }
 0x263   : > { %4140 = shalt.err (!%p4137_p3)
}
 0x264   : > { %p5593_p5 = scmp.ne.s32.totalorder %s5573_s16, 0  ;;  %s5594_s14 = sld [smem:[#allocation53_spill]] }
 0x266   : > { %3406 = dma.hbm_to_vmem [thread:$0]  (!%p5593_p5), %s4997_s0, 16, %s850_s7, %s840_s20  }
 0x26a   : > { %p5595_p0 = scmp.ne.s32.totalorder %s5594_s14, 0 }
 0x26b   : > { %s5022_s18 = sand.u32 (!%p5595_p0), 1, %s4303_s28   ;;  %p5596_p13 = scmp.ne.s32.totalorder (!%p5595_p0), %s5569_s2, 0 }
 0x26c   : > { %858 = sbr.rel (%p5595_p0) target bundleno = 4996 (0x1384), region = 100  ;;  %s2974_s6 = sshll.u32 (!%p5595_p0), %s5022_s18, 2 }
 0x26d   : > { %s861_s10 = scalar_lea.sflag (!%p5595_p0), [#allocation3], %s5022_s18  ;;  %s5026_s15 = scalar_lea.vmem (!%p5595_p0), [#allocation2], %s2974_s6 }
 0x273   : > { %4242 = dma.done.wait (%p5596_p13), %s861_s10, 64  }
 0x274   : > { %4244 = vsyncadd (%p5596_p13), %s861_s10, 4294967232  ;;  %s5033_s16 = sand.u32 1, %s4491_s23   ;;  %s5530_s0 = sshll.u32 %s5022_s18, 3 }
 0x275   : > { %s870_s7 = scalar_lea.sflag [#allocation6], %s5033_s16  ;;  %s5039_s20 = scalar_lea.vmem [#allocation5], %s5530_s0 }
 0x276   : > { %4246 = dma.done.wait (%p5596_p13), %s870_s7, 192  }
 0x277   : > { %4248 = vsyncadd (%p5596_p13), %s870_s7, 4294967104  ;;  %s5045_s17 = scalar_lea.vmem [#allocation7], %s2974_s6  ;;  %s888_s29 = scalar_lea.sflag [#allocation9], %s5033_s16 }
 0x278   : > { %s890_s26 = scalar_lea.vmem [#allocation8], %s5022_s18 }
 0x279   : > { %4250 = dma.done.wait (%p5596_p13), %s888_s29, 16  }
 0x27a   : > { %4252 = vsyncadd (%p5596_p13), %s888_s29, 4294967280  ;;  %p5597_p12 = scmp.eq.s32.totalorder %s4491_s23, 0 }
 0x27c   : > { %4254 = dma.done.wait (%p5597_p12), [#allocation9], 64   ;;  %p5598_p9 = pmov %p5597_p12 }
 0x27e   : > { %4256 = vsyncadd (%p5598_p9), [#allocation9], 4294967232  ;;  %p5599_p8 = pmov %p5598_p9 }
 0x280   : > { %4258 = dma.done.wait (%p5599_p8), [#allocation12], 320   ;;  %p5600_p6 = pmov %p5599_p8 }
 0x282   : > { %4260 = vsyncadd (%p5600_p6), [#allocation12], 4294966976  ;;  %p5601_p4 = pmov %p5600_p6 }
 0x284   : > { %4262 = dma.done.wait (%p5601_p4), [#allocation15], 272   ;;  %p5602_p1 = pmov %p5601_p4 }
 0x286   : > { %4264 = vsyncadd (%p5602_p1), [#allocation15], 4294967024  ;;  %p5603_p11 = pmov %p5602_p1 }
 0x287   : > { %p5604_p10 = pmov %p5602_p1 }
 0x288   : > { %4266 = dma.done.wait (%p5603_p11), [#allocation18], 272  }
 0x289   : > { %4268 = vsyncadd (%p5604_p10), [#allocation18], 4294967024  ;;  %p5605_p7 = pmov %p5602_p1 }
 0x28a   : > { %p5606_p2 = pmov %p5602_p1 }
 0x28b   : > { %4270 = dma.done.wait (%p5605_p7), [#allocation21], 272  }
 0x28c   : > { %4272 = vsyncadd (%p5606_p2), [#allocation21], 4294967024  ;;  %p5607_p3 = pmov %p5602_p1 }
 0x28d   : > { %p5608_p5 = pmov %p5602_p1 }
 0x28e   : > { %4274 = dma.done.wait (%p5607_p3), [#allocation24], 272  }
 0x28f   : > { %4276 = vsyncadd (%p5608_p5), [#allocation24], 4294967024  ;;  %p5609_p0 = pmov %p5602_p1 }
 0x291   : > { %4278 = dma.done.wait (%p5609_p0), [#allocation27], 272   ;;  %p5610_p13 = pmov %p5609_p0 }
 0x292   : > { %p5611_p12 = pmov %p5609_p0 }
 0x293   : > { %4280 = vsyncadd (%p5610_p13), [#allocation27], 4294967024 }
 0x294   : > { %4282 = dma.done.wait (%p5611_p12), [#allocation30], 528   ;;  %p5612_p9 = pmov %p5609_p0 }
 0x295   : > { %p5613_p8 = pmov %p5609_p0 }
 0x296   : > { %4284 = vsyncadd (%p5612_p9), [#allocation30], 4294966768 }
 0x297   : > { %4286 = dma.done.wait (%p5613_p8), [#allocation33], 16   ;;  %p5614_p6 = pmov %p5609_p0 }
 0x298   : > { %vm1087_vm0 = vcmask 261120   ;;  %v1081_v0 = vld [vmem:[%s5026_s15] sm:$0xf]  ;;  %v3518_v8 = vld [vmem:[#allocation13] sm:$0xff]   ;;  %v4335_v9 = vmov 0.0   ;;  %vm4336_vm1 = vmmov 0   ;;  %v1102_v13 = vlaneseq }
 0x299   : > { %4288 = vsyncadd (%p5614_p6), [#allocation33], 4294967280  ;;  %v5090_v1 = vunpack.c.l.bf16 %v1081_v0  ;;  %3111 = vmatprep.subr.bf16.mxu1 %v4335_v9  ;;  %3115 = vmatprep.mubr.msk.bf16.mxu1 %vm4336_vm1, %v4335_v9  ;;  %v3519_v10 = vld [vmem:[#allocation13 + $0x8] sm:$0xff]   ;;  %v5109_v17 = vld [vmem:[#allocation10] sm:$0x7]  ;;  %s4337_s2 = smov 120  }
 0x29a   : > { %3112 = vmatpush3.bf16.msra.mxu1 %v3518_v8  ;;  %3125 = vmatprep.subr.bf16.mxu0 %v4335_v9  ;;  %v5104_v15 = vshrl.u32 %v1102_v13, 7  ;;  %v5111_v18 = vld [vmem:[#allocation11] sm:$0x7]  ;;  %v2996_v26 = vld [vmem:[#allocation14] ss:$0 sm:$0xff]  ;;  %s4338_s5 = smov 96  }
 0x29b   : > { %v1088_v2 = vsel %vm1087_vm0, %v5090_v1, 0.0  ;;  %3113 = vmatprep.subr.bf16.mxu1 %v4335_v9  ;;  %3127 = vmatprep.mubr.msk.bf16.mxu0 %vm4336_vm1, %v4335_v9  ;;  %s4339_s19 = smov 88   ;;  %s4340_s11 = smov 80   ;;  %vm1181_vm2 = vcmask 64512   ;;  %v1084_v44 = vld [vmem:[%s5045_s17] sm:$0xf] }
 0x29c   : > { %1089 = vadd.xlane.f32.xlu0 %v1088_v2  ;;  %v5107_v16 = vsub.s32 0, %v5104_v15  ;;  %s4341_s24 = smov 112   ;;  %s4342_s8 = smov 72   ;;  %v1175_v45 = vunpack.c.l.bf16 %v1084_v44  ;;  %vm1245_vm4 = vcmask 1043456   ;;  %vm2534_vm5 = vcmask 60416  }
 0x29d   : > { %s4343_s14 = smov 104   ;;  %s4344_s6 = smov 64   ;;  %vm1632_vm6 = vcmask 130048   ;;  %vm1634_vm7 = vcmask 195584   ;;  %vm2539_vm9 = vcmask 125952   ;;  %vm2481_vm10 = vcmask 523264  }
 0x29e   : > { %3114 = vmatpush3.bf16.msra.mxu1 %v3519_v10  ;;  %v1105_v19 = vrot.slane %v5109_v17, %v5107_v16  ;;  %v1110_v22 = vrot.slane %v5111_v18, %v5107_v16  ;;  %vm1176_vm3 = vcmp.eq.f32.partialorder %v1175_v45, 0.0  ;;  %s4345_s10 = smov 56   ;;  %s4346_s15 = smov 48  }
 0x29f   : > { %3119 = vmatprep.subr.bf16.mxu1 %v4335_v9  ;;  %v1177_v46 = vsel %vm1176_vm3, -1e+09, %v4335_v9  ;;  %s4347_s7 = smov 40   ;;  %s2994_s17 = sshll.u32 %s5022_s18, 4 }
 0x2a0   : > { %s5178_s29 = scalar_lea.vmem [#allocation35], %s2994_s17  ;;  %p5616_p1 = scmp.ne.s32.totalorder %s5570_s27, 0 }
 0x329   : > { %v1090_v3 = vpop.xlane.xlu0 %1089 }
 0x32a   : > { %v1092_v4 = vmul.f32 0.03125, %v1090_v3 }
 0x32c   : > { %v1093_v5 = vsub.f32 %v5090_v1, %v1092_v4 }
 0x32e   : > { %v1094_v6 = vmul.f32 %v1093_v5, %v1093_v5 }
 0x330   : > { %v1095_v7 = vsel %vm1087_vm0, %v1094_v6, 0.0 }
 0x331   : > { %1096 = vadd.xlane.f32.xlu0 %v1095_v7 }
 0x3be   : > { %v1097_v11 = vpop.xlane.xlu0 %1096 }
 0x3bf   : > { %v1098_v12 = vmul.f32 0.03125, %v1097_v11 }
 0x3c1   : > { %v1099_v14 = vadd.f32 1e-06, %v1098_v12 }
 0x3c3   : > { %3535 = vrsqrt.f32 %v1099_v14 }
 0x3cd   : > { %v3536_v20 = vpop.eup %3535 }
 0x3ce   : > { %v1101_v21 = vmul.f32 %v3536_v20, %v1093_v5 }
 0x3d0   : > { %v1106_v23 = vmul.f32 %v1105_v19, %v1101_v21 }
 0x3d2   : > { %v1111_v24 = vadd.f32 %v1110_v22, %v1106_v23 }
 0x3d4   : > { %v1112_v25 = vpack.c.bf16 %v1111_v24, %v1111_v24 }
 0x3d6   : > { %3116 = vmatmul.mubr.msk.bf16.vlgmr.msra.gmra.mrb[0].mxu1 %vm1087_vm0, %v1112_v25 }
 0x3d7   : > { %3121 = vmatprep.mubr.msk.bf16.mxu1 %vm4336_vm1, %v4335_v9 }
 0x4a9   : > { %v1168_v27 = vpop.f32.mrb[0].mxu1 }
 0x4aa   : > { %v1169_v28 = vadd.f32 %v2996_v26, %v1168_v27  ;;  %v3117_v29 = vpop.f32.mrb[1].mxu1 }
 0x4ab   : > { %v1171_v30 = vpop.f32.mrb[2].mxu1 }
 0x4ac   : > { %v5120_v31 = vpack.c.bf16 %v1169_v28, %v1169_v28  ;;  %v3118_v32 = vpop.f32.mrb[3].mxu1 }
 0x4ae   : > { %1289 = vrot.lane.b32.xlu0 %v5120_v31, %s4337_s2  ;;  %1179 = vrot.lane.b32.xlu1 %v5120_v31, %s4338_s5 }
 0x4b2   : > { %1291 = vrot.lane.b32.xlu1 %v5120_v31, %s4339_s19 }
 0x4b6   : > { %1401 = vrot.lane.b32.xlu1 %v5120_v31, %s4340_s11 }
 0x4ba   : > { %1399 = vrot.lane.b32.xlu1 %v5120_v31, %s4341_s24 }
 0x4be   : > { %1511 = vrot.lane.b32.xlu1 %v5120_v31, %s4342_s8 }
 0x4c2   : > { %1509 = vrot.lane.b32.xlu1 %v5120_v31, %s4343_s14 }
 0x520   : > { %v1180_v33 = vpop.permute.xlu1 %1179  ;;  %v1290_v38 = vpop.permute.xlu0 %1289 }
 0x521   : > { %v1186_v34 = vsel %vm1181_vm2, %v1180_v33, 0 }
 0x522   : > { %3120 = vmatpush3.bf16.xpose.msra.mxu1 %v1186_v34 }
 0x523   : > { %3131 = vmatprep.subr.bf16.mxu1 %v4335_v9 }
 0x524   : > { %v1292_v35 = vpop.permute.xlu1 %1291 }
 0x525   : > { %v1297_v36 = vsel %vm1181_vm2, %v1292_v35, 0 }
 0x528   : > { %v1402_v37 = vpop.permute.xlu1 %1401 }
 0x529   : > { %3122 = vmatmul.mubr.msk.bf16.vlgmr.msra.gmra.mrb[4].mxu1 %vm1181_vm2, %v5120_v31  ;;  %v1407_v40 = vsel %vm1181_vm2, %v1402_v37, 0 }
 0x52a   : > { %3132 = vmatpush3.bf16.xpose.msra.mxu1 %v1297_v36  ;;  %3133 = vmatprep.mubr.msk.bf16.mxu1 %vm4336_vm1, %v4335_v9 }
 0x52b   : > { %3143 = vmatprep.subr.bf16.mxu1 %v4335_v9 }
 0x52c   : > { %v1400_v39 = vpop.permute.xlu1 %1399 }
 0x530   : > { %v1512_v41 = vpop.permute.xlu1 %1511 }
 0x531   : > { %3134 = vmatmul.mubr.msk.bf16.vlgmr.msra.gmra.mrb[8].mxu1 %vm1181_vm2, %v1290_v38  ;;  %v1517_v42 = vsel %vm1181_vm2, %v1512_v41, 0 }
 0x532   : > { %3144 = vmatpush3.bf16.xpose.msra.mxu1 %v1407_v40  ;;  %3145 = vmatprep.mubr.msk.bf16.mxu1 %vm4336_vm1, %v4335_v9 }
 0x533   : > { %3155 = vmatprep.subr.bf16.mxu1 %v4335_v9 }
 0x534   : > { %v1510_v43 = vpop.permute.xlu1 %1509 }
 0x539   : > { %3146 = vmatmul.mubr.msk.bf16.vlgmr.msra.gmra.mrb[12].mxu1 %vm1181_vm2, %v1400_v39 }
 0x53a   : > { %3156 = vmatpush3.bf16.xpose.msra.mxu1 %v1517_v42  ;;  %3157 = vmatprep.mubr.msk.bf16.mxu1 %vm4336_vm1, %v4335_v9 }
 0x53b   : > { %3167 = vmatprep.subr.bf16.mxu1 %v4335_v9 }
 0x541   : > { %3158 = vmatmul.mubr.msk.bf16.vlgmr.msra.gmra.mrb[16].mxu1 %vm1181_vm2, %v1510_v43 }
 0x542   : > { %3171 = vmatprep.mubr.msk.bf16.mxu1 %vm4336_vm1, %v4335_v9 }
 0x5fc   : > { %v1222_v47 = vpop.f32.mrb[4].mxu1 }
 0x5fd   : > { %v1223_v48 = vadd.f32 %v1222_v47, %v1177_v46  ;;  %v3123_v49 = vpop.f32.mrb[5].mxu1 }
 0x5fe   : > { %v1225_v50 = vpop.f32.mrb[6].mxu1 }
 0x5ff   : > { %v3124_v51 = vpop.f32.mrb[7].mxu1  ;;  %v1228_v52 = vsel %vm1181_vm2, %v1223_v48, -inf }
 0x600   : > { %1229 = vmax.xlane.f32.xlu1 %v1228_v52 }
 0x604   : > { %v1333_v53 = vpop.f32.mrb[8].mxu1 }
 0x605   : > { %v1334_v54 = vadd.f32 %v1333_v53, %v1177_v46  ;;  %v3135_v55 = vpop.f32.mrb[9].mxu1 }
 0x606   : > { %v1336_v56 = vpop.f32.mrb[10].mxu1 }
 0x607   : > { %v3136_v57 = vpop.f32.mrb[11].mxu1  ;;  %v1339_v58 = vsel %vm1181_vm2, %v1334_v54, -inf }
 0x608   : > { %1340 = vmax.xlane.f32.xlu0 %v1339_v58 }
 0x60c   : > { %v1443_v59 = vpop.f32.mrb[12].mxu1 }
 0x60d   : > { %v1444_v60 = vadd.f32 %v1443_v59, %v1177_v46  ;;  %v3147_v61 = vpop.f32.mrb[13].mxu1 }
 0x60e   : > { %v1446_v62 = vpop.f32.mrb[14].mxu1 }
 0x60f   : > { %v3148_v63 = vpop.f32.mrb[15].mxu1  ;;  %v1449_v0 = vsel %vm1181_vm2, %v1444_v60, -inf }
 0x610   : > { %1450 = vmax.xlane.f32.xlu1 %v1449_v0 }
 0x614   : > { %v1553_v2 = vpop.f32.mrb[16].mxu1 }
 0x615   : > { %v1554_v3 = vadd.f32 %v1553_v2, %v1177_v46  ;;  %v3159_v4 = vpop.f32.mrb[17].mxu1  ;;  %v3520_v2 = vld [vmem:[#allocation16] sm:$0xff]  }
 0x616   : > { %v1556_v5 = vpop.f32.mrb[18].mxu1  ;;  %3168 = vmatpush3.bf16.msra.mxu1 %v3520_v2 }
 0x617   : > { %v3160_v6 = vpop.f32.mrb[19].mxu1  ;;  %v1559_v7 = vsel %vm1181_vm2, %v1554_v3, -inf  ;;  %3169 = vmatprep.subr.bf16.mxu1 %v4335_v9 }
 0x618   : > { %1560 = vmax.xlane.f32.xlu0 %v1559_v7 }
 0x68d   : > { %v1230_v8 = vpop.xlane.xlu1 %1229 }
 0x68e   : > { %v1231_v10 = vsub.f32 %v1223_v48, %v1230_v8 }
 0x690   : > { %v1232_v11 = vmul.f32 1.442695, %v1231_v10 }
 0x692   : > { %3537 = vpow2.f32 %v1232_v11 }
 0x695   : > { %v1341_v12 = vpop.xlane.xlu0 %1340 }
 0x696   : > { %v1342_v13 = vsub.f32 %v1334_v54, %v1341_v12 }
 0x698   : > { %v1343_v14 = vmul.f32 1.442695, %v1342_v13 }
 0x69a   : > { %3539 = vpow2.f32 %v1343_v14 }
 0x69c   : > { %v3538_v19 = vpop.eup %3537 }
 0x69d   : > { %v1234_v20 = vsel %vm1181_vm2, %v3538_v19, 0.0  ;;  %v1451_v28 = vpop.xlane.xlu1 %1450 }
 0x69e   : > { %1235 = vadd.xlane.f32.xlu1 %v1234_v20  ;;  %v1452_v29 = vsub.f32 %v1444_v60, %v1451_v28 }
 0x6a0   : > { %v1453_v30 = vmul.f32 1.442695, %v1452_v29 }
 0x6a4   : > { %v3540_v21 = vpop.eup %3539 }
 0x6a5   : > { %v1561_v22 = vpop.xlane.xlu0 %1560  ;;  %v1345_v23 = vsel %vm1181_vm2, %v3540_v21, 0.0 }
 0x6a6   : > { %v1562_v24 = vsub.f32 %v1554_v3, %v1561_v22  ;;  %1346 = vadd.xlane.f32.xlu0 %v1345_v23  ;;  %v3521_v3 = vld [vmem:[#allocation16 + $0x8] sm:$0xff]  }
 0x6a7   : > { %3170 = vmatpush3.bf16.msra.mxu1 %v3521_v3 }
 0x6a8   : > { %v1563_v25 = vmul.f32 1.442695, %v1562_v24  ;;  %3183 = vmatprep.subr.bf16.mxu1 %v4335_v9  ;;  %v3011_v24 = vld [vmem:[#allocation17] ss:$0 sm:$0xff] }
 0x6aa   : > { %3541 = vpow2.f32 %v1563_v25 }
 0x6ab   : > { %3543 = vpow2.f32 %v1453_v30 }
 0x6af   : > { %1240 = vrot.lane.b32.xlu1 %v5120_v31, %s4344_s6 }
 0x6b4   : > { %v3542_v26 = vpop.eup %3541 }
 0x6b5   : > { %v1565_v27 = vsel %vm1181_vm2, %v3542_v26, 0.0  ;;  %v3544_v32 = vpop.eup %3543 }
 0x6b6   : > { %1566 = vadd.xlane.f32.xlu0 %v1565_v27  ;;  %v1455_v33 = vsel %vm1181_vm2, %v3544_v32, 0.0 }
 0x6cc   : > { %1351 = vrot.lane.b32.xlu0 %v5120_v31, %s4345_s10  ;;  %s4348_s10 = smov 8  }
 0x6d3   : > { %1456 = vadd.xlane.f32.xlu1 %v1455_v33 }
 0x6e4   : > { %1461 = vrot.lane.b32.xlu1 %v5120_v31, %s4346_s15  ;;  %s4349_s15 = smov 16  }
 0x6e8   : > { %1571 = vrot.lane.b32.xlu1 %v5120_v31, %s4347_s7  ;;  %s4350_s7 = smov 24  }
 0x72b   : > { %v1236_v34 = vpop.xlane.xlu1 %1235 }
 0x72c   : > { %3545 = vrcp.f32 %v1236_v34 }
 0x72f   : > { %v1241_v35 = vpop.permute.xlu1 %1240 }
 0x730   : > { %v1247_v36 = vsel %vm1245_vm4, %v1241_v35, 0 }
 0x731   : > { %3126 = vmatpush3.bf16.msra.mxu0 %v1247_v36 }
 0x732   : > { %3137 = vmatprep.subr.bf16.mxu0 %v4335_v9 }
 0x733   : > { %v1347_v37 = vpop.xlane.xlu0 %1346 }
 0x734   : > { %3547 = vrcp.f32 %v1347_v37 }
 0x736   : > { %v3546_v38 = vpop.eup %3545 }
 0x737   : > { %v1238_v39 = vmul.f32 %v3546_v38, %v3538_v19  ;;  %v3522_v38 = vld [vmem:[#allocation22] sm:$0xff]  }
 0x739   : > { %v1239_v40 = vpack.c.bf16 %v1238_v39, %v1238_v39  ;;  %v3524_v39 = vld [vmem:[%s5039_s20] sm:$0xff]   ;;  %s5288_s20 = scalar_lea.vmem [#allocation37], %s2994_s17  ;;  %s4351_s17 = smov [#allocation35]  }
 0x73b   : > { %3128 = vmatmul.mubr.msk.bf16.vlgmr.msra.gmra.mrb[0].mxu0 %vm1181_vm2, %v1239_v40  ;;  %2535 = vst.msk [vmem:[%s5178_s29] sm:$0xf] %vm2534_vm5, %v1239_v40  ;;  %v3525_v40 = vld [vmem:[#allocation19] sm:$0xff]  }
 0x73c   : > { %3139 = vmatprep.mubr.msk.bf16.mxu0 %vm4336_vm1, %v4335_v9 }
 0x73e   : > { %v3548_v31 = vpop.eup %3547 }
 0x73f   : > { %v1349_v41 = vmul.f32 %v3548_v31, %v3540_v21  ;;  %v3526_v31 = vld [vmem:[#allocation19 + $0x8] sm:$0xff]  }
 0x741   : > { %v1350_v42 = vpack.c.bf16 %v1349_v41, %v1349_v41 }
 0x743   : > { %v1567_v43 = vpop.xlane.xlu0 %1566  ;;  %2536 = vst.msk [vmem:[%s5178_s29 + $0x4] sm:$0xf] %vm2534_vm5, %v1350_v42 }
 0x744   : > { %3549 = vrcp.f32 %v1567_v43 }
 0x747   : > { %v1352_v44 = vpop.permute.xlu0 %1351 }
 0x748   : > { %v1357_v45 = vsel %vm1245_vm4, %v1352_v44, 0  ;;  %v1715_v44 = vsub.s32 1, %v5104_v15 }
 0x749   : > { %3138 = vmatpush3.bf16.msra.mxu0 %v1357_v45 }
 0x74a   : > { %3149 = vmatprep.subr.bf16.mxu0 %v4335_v9  ;;  %v1716_v45 = vrot.slane %v5109_v17, %v1715_v44 }
 0x74c   : > { %3140 = vmatmul.mubr.msk.bf16.vlgmr.msra.gmra.mrb[4].mxu0 %vm1181_vm2, %v1350_v42 }
 0x74d   : > { %3151 = vmatprep.mubr.msk.bf16.mxu0 %vm4336_vm1, %v4335_v9 }
 0x74e   : > { %v3550_v46 = vpop.eup %3549 }
 0x74f   : > { %v1569_v47 = vmul.f32 %v3550_v46, %v3542_v26 }
 0x751   : > { %v1570_v48 = vpack.c.bf16 %v1569_v47, %v1569_v47 }
 0x753   : > { %2538 = vst.msk [vmem:[%s5178_s29 + $0xc] sm:$0xf] %vm2534_vm5, %v1570_v48 }
 0x760   : > { %v1457_v49 = vpop.xlane.xlu1 %1456 }
 0x761   : > { %3551 = vrcp.f32 %v1457_v49 }
 0x764   : > { %v1462_v50 = vpop.permute.xlu1 %1461 }
 0x765   : > { %v1467_v51 = vsel %vm1245_vm4, %v1462_v50, 0 }
 0x766   : > { %3150 = vmatpush3.bf16.msra.mxu0 %v1467_v51 }
 0x767   : > { %3161 = vmatprep.subr.bf16.mxu0 %v4335_v9 }
 0x768   : > { %v1572_v54 = vpop.permute.xlu1 %1571 }
 0x769   : > { %v1577_v56 = vsel %vm1245_vm4, %v1572_v54, 0 }
 0x76b   : > { %v3552_v52 = vpop.eup %3551 }
 0x76c   : > { %v1459_v53 = vmul.f32 %v3552_v52, %v3544_v32  ;;  %v3016_v52 = vld [vmem:[#allocation23] ss:$0 sm:$0xff] }
 0x76e   : > { %v1460_v55 = vpack.c.bf16 %v1459_v53, %v1459_v53 }
 0x770   : > { %3152 = vmatmul.mubr.msk.bf16.vlgmr.msra.gmra.mrb[8].mxu0 %vm1181_vm2, %v1460_v55  ;;  %2537 = vst.msk [vmem:[%s5178_s29 + $0x8] sm:$0xf] %vm2534_vm5, %v1460_v55 }
 0x771   : > { %3162 = vmatpush3.bf16.msra.mxu0 %v1577_v56  ;;  %3163 = vmatprep.mubr.msk.bf16.mxu0 %vm4336_vm1, %v4335_v9 }
 0x772   : > { %3175 = vmatprep.subr.bf16.mxu0 %v4335_v9 }
 0x778   : > { %3164 = vmatmul.mubr.msk.bf16.vlgmr.msra.gmra.mrb[12].mxu0 %vm1181_vm2, %v1570_v48  ;;  %v1721_v48 = vrot.slane %v5111_v18, %v1715_v44 }
 0x779   : > { %3179 = vmatprep.mubr.msk.bf16.mxu0 %vm4336_vm1, %v4335_v9  ;;  %3176 = vmatpush3.bf16.msra.mxu0 %v3525_v40 }
 0x77a   : > { %3177 = vmatprep.subr.bf16.mxu0 %v4335_v9 }
 0x77d   : > { %3178 = vmatpush3.bf16.msra.mxu0 %v3526_v31 }
 0x77e   : > { %3191 = vmatprep.subr.bf16.mxu0 %v4335_v9 }
 0x80e   : > { %v1283_v57 = vpop.f32.mrb[0].mxu0 }
 0x80f   : > { %v3129_v58 = vpop.f32.mrb[1].mxu0 }
 0x810   : > { %v1286_v59 = vpop.f32.mrb[2].mxu0 }
 0x811   : > { %v3130_v60 = vpop.f32.mrb[3].mxu0 }
 0x81f   : > { %v1393_v61 = vpop.f32.mrb[4].mxu0 }
 0x820   : > { %1620 = vrot.lane.b32.xlu0 %v1393_v61, %s4348_s10  ;;  %v3141_v62 = vpop.f32.mrb[5].mxu0  ;;  %v3012_v61 = vld [vmem:[#allocation20] ss:$0 sm:$0xff] }
 0x821   : > { %v1396_v63 = vpop.f32.mrb[6].mxu0 }
 0x822   : > { %v3142_v0 = vpop.f32.mrb[7].mxu0 }
 0x843   : > { %v1503_v4 = vpop.f32.mrb[8].mxu0 }
 0x844   : > { %1624 = vrot.lane.b32.xlu1 %v1503_v4, %s4349_s15  ;;  %v3153_v5 = vpop.f32.mrb[9].mxu0 }
 0x845   : > { %v1506_v6 = vpop.f32.mrb[10].mxu0 }
 0x846   : > { %v3154_v7 = vpop.f32.mrb[11].mxu0 }
 0x84b   : > { %v1613_v8 = vpop.f32.mrb[12].mxu0 }
 0x84c   : > { %1628 = vrot.lane.b32.xlu0 %v1613_v8, %s4350_s7  ;;  %v3165_v10 = vpop.f32.mrb[13].mxu0 }
 0x84d   : > { %v1616_v11 = vpop.f32.mrb[14].mxu0 }
 0x84e   : > { %v3166_v12 = vpop.f32.mrb[15].mxu0 }
 0x892   : > { %v1621_v13 = vpop.permute.xlu0 %1620 }
 0x893   : > { %v1631_v19 = vsel %vm1181_vm2, %v1283_v57, %v1621_v13 }
 0x8b6   : > { %v1625_v14 = vpop.permute.xlu1 %1624 }
 0x8b7   : > { %v1633_v20 = vsel %vm1632_vm6, %v1631_v19, %v1625_v14  ;;  %v1085_v19 = vld [vmem:[%s890_s26] sm:$0x1]  ;;  %s3054_s26 = sshll.u32 %s4491_s23, 8 }
 0x8be   : > { %v1629_v21 = vpop.permute.xlu0 %1628 }
 0x8bf   : > { %v1635_v22 = vsel %vm1634_vm7, %v1633_v20, %v1629_v21  ;;  %v1854_v20 = vunpack.c.l.bf16 %v1085_v19 }
 0x8c0   : > { %v1636_v23 = vpack.c.bf16 %v1635_v22, %v1635_v22 }
 0x8c1   : > { %vm1855_vm8 = vcmp.eq.f32.partialorder %v1854_v20, 0.0 }
 0x8c2   : > { %3172 = vmatmul.mubr.msk.bf16.vlgmr.msra.gmra.mrb[20].mxu1 %vm1087_vm0, %v1636_v23  ;;  %v1856_v21 = vsel %vm1855_vm8, -1e+09, %v4335_v9 }
 0x8c3   : > { %3187 = vmatprep.mubr.msk.bf16.mxu1 %vm4336_vm1, %v4335_v9  ;;  %3184 = vmatpush3.bf16.msra.mxu1 %v3522_v38  ;;  %v1860_v22 = vrot.slane %v1856_v21, %v5107_v16 }
 0x8c4   : > { %3185 = vmatprep.subr.bf16.mxu1 %v4335_v9 }
 0x995   : > { %v1686_v25 = vpop.f32.mrb[20].mxu1 }
 0x996   : > { %v1692_v26 = vadd.f32 %v1686_v25, %v5090_v1  ;;  %v3173_v27 = vpop.f32.mrb[21].mxu1  ;;  %v3523_v1 = vld [vmem:[#allocation22 + $0x8] sm:$0xff]  }
 0x997   : > { %v1689_v28 = vpop.f32.mrb[22].mxu1  ;;  %3186 = vmatpush3.bf16.msra.mxu1 %v3523_v1 }
 0x998   : > { %v5217_v29 = vadd.f32 %v3011_v24, %v1692_v26  ;;  %v3174_v30 = vpop.f32.mrb[23].mxu1  ;;  %3197 = vmatprep.subr.bf16.mxu1 %v4335_v9 }
 0x99a   : > { %v1700_v32 = vsel %vm1087_vm0, %v5217_v29, 0.0  ;;  %3188 = vmatmul.mubr.msk.bf16.vlgmr.msra.gmra.mrb[24].mxu1 %vm1087_vm0, %v3524_v39 }
 0x99b   : > { %1701 = vadd.xlane.f32.xlu1 %v1700_v32  ;;  %3199 = vmatprep.mubr.msk.bf16.mxu1 %vm4336_vm1, %v4335_v9 }
 0xa28   : > { %v1702_v33 = vpop.xlane.xlu1 %1701 }
 0xa29   : > { %v1703_v34 = vmul.f32 0.03125, %v1702_v33 }
 0xa2b   : > { %v1704_v35 = vsub.f32 %v5217_v29, %v1703_v34 }
 0xa2d   : > { %v1705_v36 = vmul.f32 %v1704_v35, %v1704_v35 }
 0xa2f   : > { %v1706_v37 = vsel %vm1087_vm0, %v1705_v36, 0.0 }
 0xa30   : > { %1707 = vadd.xlane.f32.xlu0 %v1706_v37 }
 0xa6d   : > { %v1846_v53 = vpop.f32.mrb[24].mxu1 }
 0xa6e   : > { %v1847_v54 = vadd.f32 %v3016_v52, %v1846_v53  ;;  %v3189_v55 = vpop.f32.mrb[25].mxu1 }
 0xa6f   : > { %v1849_v56 = vpop.f32.mrb[26].mxu1 }
 0xa70   : > { %v1850_v57 = vadd.f32 %v3016_v52, %v1849_v56  ;;  %v3190_v58 = vpop.f32.mrb[27].mxu1 }
 0xa72   : > { %v5237_v59 = vpack.c.bf16 %v1850_v57, %v1847_v54 }
 0xa74   : > { %1969 = vrot.lane.b32.xlu0 %v5237_v59, %s4337_s2  ;;  %v1865_v60 = vsel %vm1181_vm2, %v5237_v59, 0 }
 0xabd   : > { %v1708_v41 = vpop.xlane.xlu0 %1707 }
 0xabe   : > { %v1709_v42 = vmul.f32 0.03125, %v1708_v41 }
 0xac0   : > { %v1710_v43 = vadd.f32 1e-06, %v1709_v42 }
 0xac2   : > { %3553 = vrsqrt.f32 %v1710_v43 }
 0xacc   : > { %v3554_v46 = vpop.eup %3553 }
 0xacd   : > { %v1712_v47 = vmul.f32 %v3554_v46, %v1704_v35 }
 0xacf   : > { %v1717_v49 = vmul.f32 %v1716_v45, %v1712_v47 }
 0xad1   : > { %v1722_v50 = vadd.f32 %v1721_v48, %v1717_v49 }
 0xad3   : > { %v1723_v51 = vpack.c.bf16 %v1722_v50, %v1722_v50 }
 0xad5   : > { %3180 = vmatmul.mubr.msk.bf16.vlgmr.msra.gmra.mrb[16].mxu0 %vm1087_vm0, %v1723_v51 }
 0xad6   : > { %3193 = vmatprep.mubr.msk.bf16.mxu0 %vm4336_vm1, %v4335_v9  ;;  %3192 = vmatpush3.bf16.xpose.msra.mxu0 %v1865_v60 }
 0xad7   : > { %3203 = vmatprep.subr.bf16.mxu0 %v4335_v9 }
 0xae6   : > { %v1970_v2 = vpop.permute.xlu0 %1969 }
 0xae7   : > { %v1975_v6 = vsel %vm1181_vm2, %v1970_v2, 0 }
 0xba8   : > { %v1779_v62 = vpop.f32.mrb[16].mxu0 }
 0xba9   : > { %v1780_v63 = vadd.f32 %v3012_v61, %v1779_v62  ;;  %v3181_v0 = vpop.f32.mrb[17].mxu0 }
 0xbaa   : > { %v1782_v3 = vpop.f32.mrb[18].mxu0 }
 0xbab   : > { %v1785_v4 = vpack.c.bf16 %v1780_v63, %v1780_v63  ;;  %v3182_v5 = vpop.f32.mrb[19].mxu0 }
 0xbad   : > { %1967 = vrot.lane.b32.xlu1 %v1785_v4, %s4337_s2  ;;  %2075 = vrot.lane.b32.xlu0 %v1785_v4, %s4341_s24 }
 0xbae   : > { %3194 = vmatmul.mubr.msk.bf16.vlgmr.msra.gmra.mrb[20].mxu0 %vm1181_vm2, %v1785_v4 }
 0xbaf   : > { %3204 = vmatpush3.bf16.xpose.msra.mxu0 %v1975_v6  ;;  %3205 = vmatprep.mubr.msk.bf16.mxu0 %vm4336_vm1, %v4335_v9 }
 0xbb0   : > { %3215 = vmatprep.subr.bf16.mxu0 %v4335_v9 }
 0xbb1   : > { %2077 = vrot.lane.b32.xlu1 %v5237_v59, %s4341_s24  ;;  %2183 = vrot.lane.b32.xlu0 %v1785_v4, %s4343_s14  ;;  %s2581_s24 = sshll.u32 %s5178_s29, 4  ;;  %s5352_s24 = int_to_ptr.vmem [resolvable:$true] %s2581_s24 }
 0xbb5   : > { %2185 = vrot.lane.b32.xlu1 %v5237_v59, %s4343_s14  ;;  %s4141_s14 = scalar_lea.vmem %s5352_s24, 256 }
 0xbb6   : > { %p4142_p4 = scmp.ne.s32.totalorder %s5352_s24, %s4141_s14 }
 0xbb8   : > { %p4143_p11 = pnand %p4142_p4, %p5616_p1 }
 0xbba   : > { %p4144_p10 = pneg %p4143_p11 }
 0xc1f   : > { %v1968_v7 = vpop.permute.xlu1 %1967  ;;  %v2076_v12 = vpop.permute.xlu0 %2075 }
 0xc20   : > { %3206 = vmatmul.mubr.msk.bf16.vlgmr.msra.gmra.mrb[24].mxu0 %vm1181_vm2, %v1968_v7 }
 0xc21   : > { %3217 = vmatprep.mubr.msk.bf16.mxu0 %vm4336_vm1, %v4335_v9 }
 0xc23   : > { %v2078_v8 = vpop.permute.xlu1 %2077  ;;  %v2184_v14 = vpop.permute.xlu0 %2183 }
 0xc24   : > { %v2083_v10 = vsel %vm1181_vm2, %v2078_v8, 0 }
 0xc25   : > { %3216 = vmatpush3.bf16.xpose.msra.mxu0 %v2083_v10 }
 0xc26   : > { %3227 = vmatprep.subr.bf16.mxu0 %v4335_v9 }
 0xc27   : > { %v2186_v11 = vpop.permute.xlu1 %2185 }
 0xc28   : > { %v2191_v13 = vsel %vm1181_vm2, %v2186_v11, 0 }
 0xc2c   : > { %3218 = vmatmul.mubr.msk.bf16.vlgmr.msra.gmra.mrb[28].mxu0 %vm1181_vm2, %v2076_v12 }
 0xc2d   : > { %3228 = vmatpush3.bf16.xpose.msra.mxu0 %v2191_v13  ;;  %3229 = vmatprep.mubr.msk.bf16.mxu0 %vm4336_vm1, %v4335_v9 }
 0xc2e   : > { %3239 = vmatprep.subr.bf16.mxu0 %v4335_v9 }
 0xc34   : > { %3230 = vmatmul.mubr.msk.bf16.vlgmr.msra.gmra.mrb[32].mxu0 %vm1181_vm2, %v2184_v14 }
 0xc35   : > { %3243 = vmatprep.mubr.msk.bf16.mxu0 %vm4336_vm1, %v4335_v9 }
 0xc81   : > { %v1901_v23 = vpop.f32.mrb[20].mxu0 }
 0xc82   : > { %v1902_v24 = vadd.f32 %v1901_v23, %v1860_v22  ;;  %v3195_v25 = vpop.f32.mrb[21].mxu0 }
 0xc83   : > { %v1904_v26 = vpop.f32.mrb[22].mxu0 }
 0xc84   : > { %v3196_v27 = vpop.f32.mrb[23].mxu0  ;;  %v1907_v28 = vsel %vm1632_vm6, %v1902_v24, -inf }
 0xc85   : > { %1908 = vmax.xlane.f32.xlu1 %v1907_v28 }
 0xcf3   : > { %v2011_v30 = vpop.f32.mrb[24].mxu0 }
 0xcf4   : > { %v2012_v32 = vadd.f32 %v2011_v30, %v1860_v22  ;;  %v3207_v33 = vpop.f32.mrb[25].mxu0 }
 0xcf5   : > { %v2014_v34 = vpop.f32.mrb[26].mxu0 }
 0xcf6   : > { %v3208_v35 = vpop.f32.mrb[27].mxu0  ;;  %v2017_v36 = vsel %vm1632_vm6, %v2012_v32, -inf }
 0xcf7   : > { %2018 = vmax.xlane.f32.xlu0 %v2017_v36 }
 0xcff   : > { %v2119_v37 = vpop.f32.mrb[28].mxu0 }
 0xd00   : > { %v2120_v38 = vadd.f32 %v2119_v37, %v1860_v22  ;;  %v3219_v1 = vpop.f32.mrb[29].mxu0 }
 0xd01   : > { %v2122_v16 = vpop.f32.mrb[30].mxu0  ;;  %v3528_v1 = vld [vmem:[#allocation25 + $0x8] sm:$0xff]  }
 0xd02   : > { %v3220_v39 = vpop.f32.mrb[31].mxu0  ;;  %v2125_v40 = vsel %vm1632_vm6, %v2120_v38, -inf }
 0xd03   : > { %2126 = vmax.xlane.f32.xlu0 %v2125_v40 }
 0xd07   : > { %v2227_v31 = vpop.f32.mrb[32].mxu0 }
 0xd08   : > { %v2228_v41 = vadd.f32 %v2227_v31, %v1860_v22  ;;  %v3231_v42 = vpop.f32.mrb[33].mxu0 }
 0xd09   : > { %v2230_v43 = vpop.f32.mrb[34].mxu0 }
 0xd0a   : > { %v3232_v44 = vpop.f32.mrb[35].mxu0  ;;  %v2233_v45 = vsel %vm1632_vm6, %v2228_v41, -inf }
 0xd0b   : > { %2234 = vmax.xlane.f32.xlu1 %v2233_v45 }
 0xd12   : > { %v1909_v46 = vpop.xlane.xlu1 %1908 }
 0xd13   : > { %v1910_v47 = vsub.f32 %v1902_v24, %v1909_v46 }
 0xd15   : > { %v1911_v48 = vmul.f32 1.442695, %v1910_v47 }
 0xd17   : > { %3555 = vpow2.f32 %v1911_v48 }
 0xd21   : > { %v3556_v49 = vpop.eup %3555 }
 0xd22   : > { %v1913_v50 = vsel %vm1632_vm6, %v3556_v49, 0.0 }
 0xd23   : > { %1914 = vadd.xlane.f32.xlu0 %v1913_v50 }
 0xd84   : > { %v2019_v51 = vpop.xlane.xlu0 %2018 }
 0xd85   : > { %v2020_v52 = vsub.f32 %v2012_v32, %v2019_v51 }
 0xd87   : > { %v2021_v53 = vmul.f32 1.442695, %v2020_v52  ;;  %v3032_v52 = vld [vmem:[#allocation26] ss:$0 sm:$0xff] }
 0xd89   : > { %3557 = vpow2.f32 %v2021_v53 }
 0xd90   : > { %v2127_v54 = vpop.xlane.xlu0 %2126 }
 0xd91   : > { %v2128_v55 = vsub.f32 %v2120_v38, %v2127_v54  ;;  %v3527_v38 = vld [vmem:[#allocation25] sm:$0xff]  }
 0xd92   : > { %3240 = vmatpush3.bf16.msra.mxu0 %v3527_v38 }
 0xd93   : > { %v3558_v56 = vpop.eup %3557  ;;  %v2129_v57 = vmul.f32 1.442695, %v2128_v55  ;;  %3241 = vmatprep.subr.bf16.mxu0 %v4335_v9 }
 0xd94   : > { %v2023_v58 = vsel %vm1632_vm6, %v3558_v56, 0.0 }
 0xd95   : > { %3559 = vpow2.f32 %v2129_v57  ;;  %2024 = vadd.xlane.f32.xlu1 %v2023_v58 }
 0xd96   : > { %3242 = vmatpush3.bf16.msra.mxu0 %v3528_v1 }
 0xd97   : > { %3255 = vmatprep.subr.bf16.mxu0 %v4335_v9 }
 0xd98   : > { %v2235_v63 = vpop.xlane.xlu1 %2234 }
 0xd99   : > { %v2236_v0 = vsub.f32 %v2228_v41, %v2235_v63 }
 0xd9b   : > { %v2237_v2 = vmul.f32 1.442695, %v2236_v0 }
 0xd9f   : > { %v3560_v60 = vpop.eup %3559 }
 0xda0   : > { %v2131_v61 = vsel %vm1632_vm6, %v3560_v60, 0.0 }
 0xda1   : > { %2132 = vadd.xlane.f32.xlu0 %v2131_v61 }
 0xda6   : > { %2029 = vrot.lane.b32.xlu1 %v5237_v59, %s4339_s19  ;;  %s5615_s19 = sld [smem:[#allocation77_spill]] }
 0xdb0   : > { %v1915_v62 = vpop.xlane.xlu0 %1914 }
 0xdb1   : > { %3561 = vrcp.f32 %v1915_v62 }
 0xdb2   : > { %3563 = vpow2.f32 %v2237_v2 }
 0xdb7   : > { %1920 = vrot.lane.b32.xlu0 %v5237_v59, %s4338_s5 }
 0xdbb   : > { %v3562_v3 = vpop.eup %3561  ;;  %2245 = vrot.lane.b32.xlu0 %v5237_v59, %s4342_s8  ;;  %s2550_s8 = scalar_lea.sflag [#allocation36], %s5033_s16 }
 0xdbc   : > { %v1917_v4 = vmul.f32 %v3562_v3, %v3556_v49  ;;  %v3564_v6 = vpop.eup %3563  ;;  %v3529_v3 = vld [vmem:[#allocation28] sm:$0xff]  }
 0xdbd   : > { %v2239_v7 = vsel %vm1632_vm6, %v3564_v6, 0.0 }
 0xdbe   : > { %v1918_v5 = vpack.c.bf16 %v1917_v4, %v1917_v4  ;;  %v3531_v4 = vld [vmem:[#allocation31] sm:$0xff]  }
 0xdc0   : > { %2540 = vst.msk [vmem:[%s5288_s20] sm:$0xf] %vm2539_vm9, %v1918_v5 }
 0xdca   : > { %2240 = vadd.xlane.f32.xlu1 %v2239_v7 }
 0xddb   : > { %2137 = vrot.lane.b32.xlu1 %v5237_v59, %s4340_s11  ;;  %s5349_s11 = scalar_lea.hbm %s5615_s19, %s3054_s26 }
 0xe22   : > { %v2025_v8 = vpop.xlane.xlu1 %2024 }
 0xe23   : > { %3565 = vrcp.f32 %v2025_v8 }
 0xe26   : > { %v2030_v19 = vpop.permute.xlu1 %2029 }
 0xe2d   : > { %v3566_v10 = vpop.eup %3565 }
 0xe2e   : > { %v2027_v11 = vmul.f32 %v3566_v10, %v3558_v56  ;;  %v2133_v12 = vpop.xlane.xlu0 %2132  ;;  %v2385_v10 = vsub.s32 2, %v5104_v15  ;;  %v3033_v15 = vld [vmem:[#allocation29] ss:$0 sm:$0xff] }
 0xe2f   : > { %3567 = vrcp.f32 %v2133_v12 }
 0xe30   : > { %v2028_v13 = vpack.c.bf16 %v2027_v11, %v2027_v11  ;;  %v2386_v11 = vrot.slane %v5109_v17, %v2385_v10 }
 0xe32   : > { %v1921_v14 = vpop.permute.xlu0 %1920  ;;  %2541 = vst.msk [vmem:[%s5288_s20 + $0x4] sm:$0xf] %vm2539_vm9, %v2028_v13 }
 0xe33   : > { %3198 = vmatpush3.bf16.msra.mxu1 %v1921_v14  ;;  %v2391_v14 = vrot.slane %v5111_v18, %v2385_v10 }
 0xe34   : > { %3209 = vmatprep.subr.bf16.mxu1 %v4335_v9 }
 0xe36   : > { %3200 = vmatmul.mubr.msk.bf16.vlgmr.msra.gmra.mrb[28].mxu1 %vm1632_vm6, %v1918_v5  ;;  %v2246_v24 = vpop.permute.xlu0 %2245  ;;  %v3532_v5 = vld [vmem:[#allocation31 + $0x8] sm:$0xff]  }
 0xe37   : > { %3210 = vmatpush3.bf16.msra.mxu1 %v2030_v19  ;;  %3211 = vmatprep.mubr.msk.bf16.mxu1 %vm4336_vm1, %v4335_v9 }
 0xe38   : > { %3221 = vmatprep.subr.bf16.mxu1 %v4335_v9 }
 0xe39   : > { %v3568_v59 = vpop.eup %3567 }
 0xe3a   : > { %v2135_v20 = vmul.f32 %v3568_v59, %v3560_v60 }
 0xe3c   : > { %v2136_v21 = vpack.c.bf16 %v2135_v20, %v2135_v20 }
 0xe3e   : > { %3212 = vmatmul.mubr.msk.bf16.vlgmr.msra.gmra.mrb[32].mxu1 %vm1632_vm6, %v2028_v13  ;;  %2542 = vst.msk [vmem:[%s5288_s20 + $0x8] sm:$0xf] %vm2539_vm9, %v2136_v21 }
 0xe3f   : > { %3223 = vmatprep.mubr.msk.bf16.mxu1 %vm4336_vm1, %v4335_v9 }
 0xe57   : > { %v2241_v22 = vpop.xlane.xlu1 %2240 }
 0xe58   : > { %3569 = vrcp.f32 %v2241_v22  ;;  %v3534_v22 = vld [vmem:[#allocation31 + $0x18] sm:$0xff]  }
 0xe5b   : > { %v2138_v23 = vpop.permute.xlu1 %2137 }
 0xe5c   : > { %3222 = vmatpush3.bf16.msra.mxu1 %v2138_v23 }
 0xe5d   : > { %3233 = vmatprep.subr.bf16.mxu1 %v4335_v9 }
 0xe5f   : > { %3224 = vmatmul.mubr.msk.bf16.vlgmr.msra.gmra.mrb[36].mxu1 %vm1632_vm6, %v2136_v21  ;;  %v3533_v21 = vld [vmem:[#allocation31 + $0x10] sm:$0xff]  }
 0xe60   : > { %3234 = vmatpush3.bf16.msra.mxu1 %v2246_v24  ;;  %3235 = vmatprep.mubr.msk.bf16.mxu1 %vm4336_vm1, %v4335_v9 }
 0xe61   : > { %3247 = vmatprep.subr.bf16.mxu1 %v4335_v9 }
 0xe62   : > { %v3570_v25 = vpop.eup %3569 }
 0xe63   : > { %v2243_v26 = vmul.f32 %v3570_v25, %v3564_v6 }
 0xe65   : > { %v2244_v27 = vpack.c.bf16 %v2243_v26, %v2243_v26 }
 0xe67   : > { %3236 = vmatmul.mubr.msk.bf16.vlgmr.msra.gmra.mrb[40].mxu1 %vm1632_vm6, %v2244_v27  ;;  %2543 = vst.msk [vmem:[%s5288_s20 + $0xc] sm:$0xf] %vm2539_vm9, %v2244_v27 }
 0xe68   : > { %3251 = vmatprep.mubr.msk.bf16.mxu1 %vm4336_vm1, %v4335_v9  ;;  %3248 = vmatpush3.bf16.msra.mxu1 %v3529_v3 }
 0xe69   : > { %3249 = vmatprep.subr.bf16.mxu1 %v4335_v9 }
 0xf09   : > { %v1960_v28 = vpop.f32.mrb[28].mxu1 }
 0xf0a   : > { %v3201_v30 = vpop.f32.mrb[29].mxu1 }
 0xf0b   : > { %v1963_v32 = vpop.f32.mrb[30].mxu1 }
 0xf0c   : > { %v3202_v33 = vpop.f32.mrb[31].mxu1 }
 0xf11   : > { %v2069_v34 = vpop.f32.mrb[32].mxu1 }
 0xf12   : > { %2292 = vrot.lane.b32.xlu1 %v2069_v34, %s4348_s10  ;;  %v3213_v35 = vpop.f32.mrb[33].mxu1  ;;  %s4145_s10 = sshll.u32 %s4351_s17, 4  ;;  %s4146_s10 = int_to_ptr.vmem [resolvable:$false] %s4145_s10 }
 0xf13   : > { %v2072_v36 = vpop.f32.mrb[34].mxu1  ;;  %p4148_p7 = scmp.lt.s32.totalorder %s5352_s24, %s4146_s10 }
 0xf14   : > { %v3214_v37 = vpop.f32.mrb[35].mxu1 }
 0xf32   : > { %v2177_v16 = vpop.f32.mrb[36].mxu1 }
 0xf33   : > { %2296 = vrot.lane.b32.xlu0 %v2177_v16, %s4349_s15  ;;  %v3225_v39 = vpop.f32.mrb[37].mxu1  ;;  %s4147_s15 = scalar_lea.vmem %s4146_s10, 512 }
 0xf34   : > { %v2180_v40 = vpop.f32.mrb[38].mxu1  ;;  %p4149_p2 = scmp.lt.s32.totalorder %s4147_s15, %s4141_s14 }
 0xf35   : > { %v3226_v31 = vpop.f32.mrb[39].mxu1 }
 0xf36   : > { %p4150_p3 = por %p4149_p2, %p4148_p7 }
 0xf38   : > { %p4151_p5 = pnand %p4150_p3, %p4144_p10 }
 0xf3a   : > { %v2285_v41 = vpop.f32.mrb[40].mxu1 }
 0xf3b   : > { %2300 = vrot.lane.b32.xlu1 %v2285_v41, %s4350_s7  ;;  %v3237_v42 = vpop.f32.mrb[41].mxu1 }
 0xf3c   : > { %v2288_v43 = vpop.f32.mrb[42].mxu1 }
 0xf3d   : > { %v3238_v44 = vpop.f32.mrb[43].mxu1 }
 0xf84   : > { %v2293_v45 = vpop.permute.xlu1 %2292 }
 0xf85   : > { %v2303_v47 = vsel %vm1181_vm2, %v1960_v28, %v2293_v45 }
 0xfa5   : > { %v2297_v46 = vpop.permute.xlu0 %2296 }
 0xfa6   : > { %v2304_v48 = vsel %vm1632_vm6, %v2303_v47, %v2297_v46 }
 0xfad   : > { %v2301_v49 = vpop.permute.xlu1 %2300 }
 0xfae   : > { %v2305_v50 = vsel %vm1634_vm7, %v2304_v48, %v2301_v49 }
 0xfaf   : > { %v2306_v51 = vpack.c.bf16 %v2305_v50, %v2305_v50 }
 0xfb1   : > { %3244 = vmatmul.mubr.msk.bf16.vlgmr.msra.gmra.mrb[36].mxu0 %vm1087_vm0, %v2306_v51 }
 0xfb2   : > { %3263 = vmatprep.mubr.msk.bf16.mxu0 %vm4336_vm1, %v4335_v9  ;;  %3256 = vmatpush3.bf16.msra.mxu0 %v3531_v4 }
 0xfb3   : > { %3257 = vmatprep.subr.bf16.mxu0 %v4335_v9 }
 0xfb6   : > { %3258 = vmatpush3.bf16.msra.mxu0 %v3532_v5 }
 0xfb7   : > { %3259 = vmatprep.subr.bf16.mxu0 %v4335_v9 }
 0xfba   : > { %3260 = vmatpush3.bf16.msra.mxu0 %v3533_v21 }
 0xfbb   : > { %3261 = vmatprep.subr.bf16.mxu0 %v4335_v9 }
 0xfbe   : > { %3262 = vmatpush3.bf16.msra.mxu0 %v3534_v22 }
0x1084   : > { %v2356_v53 = vpop.f32.mrb[36].mxu0 }
0x1085   : > { %v2362_v54 = vadd.f32 %v2356_v53, %v5217_v29  ;;  %v3245_v55 = vpop.f32.mrb[37].mxu0  ;;  %v3530_v29 = vld [vmem:[#allocation28 + $0x8] sm:$0xff]  }
0x1086   : > { %v2359_v56 = vpop.f32.mrb[38].mxu0  ;;  %3250 = vmatpush3.bf16.msra.mxu1 %v3530_v29 }
0x1087   : > { %v5329_v57 = vadd.f32 %v3032_v52, %v2362_v54  ;;  %v3246_v58 = vpop.f32.mrb[39].mxu0 }
0x1089   : > { %v2370_v60 = vsel %vm1087_vm0, %v5329_v57, 0.0 }
0x108a   : > { %2371 = vadd.xlane.f32.xlu0 %v2370_v60 }
0x1117   : > { %v2372_v61 = vpop.xlane.xlu0 %2371 }
0x1118   : > { %v2373_v62 = vmul.f32 0.03125, %v2372_v61 }
0x111a   : > { %v2374_v63 = vsub.f32 %v5329_v57, %v2373_v62 }
0x111c   : > { %v2375_v0 = vmul.f32 %v2374_v63, %v2374_v63 }
0x111e   : > { %v2376_v2 = vsel %vm1087_vm0, %v2375_v0, 0.0 }
0x111f   : > { %2377 = vadd.xlane.f32.xlu1 %v2376_v2 }
0x11ac   : > { %v2378_v6 = vpop.xlane.xlu1 %2377 }
0x11ad   : > { %v2379_v7 = vmul.f32 0.03125, %v2378_v6 }
0x11af   : > { %v2380_v8 = vadd.f32 1e-06, %v2379_v7 }
0x11b1   : > { %3571 = vrsqrt.f32 %v2380_v8 }
0x11bb   : > { %v3572_v12 = vpop.eup %3571 }
0x11bc   : > { %v2382_v13 = vmul.f32 %v3572_v12, %v2374_v63 }
0x11be   : > { %v2387_v19 = vmul.f32 %v2386_v11, %v2382_v13 }
0x11c0   : > { %v2392_v59 = vadd.f32 %v2391_v14, %v2387_v19 }
0x11c2   : > { %v2393_v20 = vpack.c.bf16 %v2392_v59, %v2392_v59 }
0x11c4   : > { %3252 = vmatmul.mubr.msk.bf16.vlgmr.msra.gmra.mrb[44].mxu1 %vm1087_vm0, %v2393_v20 }
0x1297   : > { %v2449_v17 = vpop.f32.mrb[44].mxu1 }
0x1298   : > { %v2450_v23 = vadd.f32 %v3033_v15, %v2449_v17  ;;  %v3253_v18 = vpop.f32.mrb[45].mxu1 }
0x1299   : > { %v2452_v24 = vpop.f32.mrb[46].mxu1 }
0x129a   : > { %v2455_v25 = vmax.f32 %v2450_v23, 0.0  ;;  %v3254_v26 = vpop.f32.mrb[47].mxu1 }
0x129c   : > { %v2456_v27 = vpack.c.bf16 %v2455_v25, %v2455_v25 }
0x129e   : > { %3264 = vmatmul.mubr.msk.bf16.vlgmr.msra.gmra.mrb[40].mxu0 %vm2481_vm10, %v2456_v27 }
0x129f   : > { %4154 = shalt.err (!%p4151_p5)
}
0x12a0   : > { %s4155_s29 = scalar_lea.hbm %s5349_s11, 256  ;;  %s4159_s5 = scalar_lea.hbm %s5615_s19, 512 }
0x12a1   : > { %p4156_p0 = scmp.ne.s32.totalorder %s5349_s11, %s4155_s29  ;;  %p4160_p9 = scmp.lt.u32.totalorder %s5349_s11, %s5615_s19 }
0x12a2   : > { %p4161_p8 = scmp.lt.u32.totalorder %s4159_s5, %s4155_s29  ;;  %p4163_p4 = scmp.lt.u32.totalorder %s4155_s29, %s5349_s11 }
0x12a3   : > { %p4157_p13 = pnand %p4156_p0, %p5616_p1 }
0x12a4   : > { %p4162_p6 = por %p4161_p8, %p4160_p9 }
0x12a5   : > { %p4158_p12 = pneg %p4157_p13 }
0x12a6   : > { %p4164_p11 = por %p4163_p4, %p4162_p6 }
0x12a8   : > { %p4165_p10 = pnand %p4164_p11, %p4158_p12 }
0x12aa   : > { %4168 = shalt.err (!%p4165_p10)
}
0x12ab   : > { %s4352_s14 = smov 4   ;;  %s5617_s7 = sld [smem:[#allocation78_spill]] }
0x12ac   : > { %3340 = dma.vmem_to_hbm [thread:$0]  (%p5616_p1), %s5352_s24, 256, %s5349_s11, %s2550_s8, %s4344_s6, %s4344_s6, %s4352_s14  }
0x12ad   : > { %s2597_s5 = sshll.u32 %s5288_s20, 4  ;;  %s4353_s10 = smov [#allocation37]   ;;  %s5389_s5 = int_to_ptr.vmem [resolvable:$true] %s2597_s5 }
0x12ae   : > { %s4169_s17 = scalar_lea.vmem %s5389_s5, 256  ;;  %s4173_s0 = sshll.u32 %s4353_s10, 4  ;;  %s4174_s0 = int_to_ptr.vmem [resolvable:$false] %s4173_s0 }
0x12af   : > { %p4170_p7 = scmp.ne.s32.totalorder %s5389_s5, %s4169_s17  ;;  %s4175_s11 = scalar_lea.vmem %s4174_s0, 512 }
0x12b0   : > { %p4176_p5 = scmp.lt.s32.totalorder %s5389_s5, %s4174_s0  ;;  %p4177_p0 = scmp.lt.s32.totalorder %s4175_s11, %s4169_s17 }
0x12b1   : > { %s5386_s2 = scalar_lea.hbm %s5617_s7, %s3054_s26  ;;  %p4171_p2 = pnand %p4170_p7, %p5616_p1 }
0x12b2   : > { %p4178_p13 = por %p4177_p0, %p4176_p5 }
0x12b3   : > { %p4172_p3 = pneg %p4171_p2 }
0x12b5   : > { %p4179_p12 = pnand %p4178_p13, %p4172_p3 }
0x12b7   : > { %4182 = shalt.err (!%p4179_p12)
}
0x12b8   : > { %s4183_s20 = scalar_lea.hbm %s5386_s2, 256  ;;  %s4187_s15 = scalar_lea.hbm %s5617_s7, 512 }
0x12b9   : > { %p4184_p9 = scmp.ne.s32.totalorder %s5386_s2, %s4183_s20  ;;  %p4188_p4 = scmp.lt.u32.totalorder %s5386_s2, %s5617_s7 }
0x12ba   : > { %p4189_p11 = scmp.lt.u32.totalorder %s4187_s15, %s4183_s20  ;;  %p4191_p7 = scmp.lt.u32.totalorder %s4183_s20, %s5386_s2 }
0x12bb   : > { %p4185_p8 = pnand %p4184_p9, %p5616_p1 }
0x12bc   : > { %p4190_p10 = por %p4189_p11, %p4188_p4 }
0x12bd   : > { %p4186_p6 = pneg %p4185_p8 }
0x12be   : > { %p4192_p2 = por %p4191_p7, %p4190_p10 }
0x12c0   : > { %p4193_p3 = pnand %p4192_p2, %p4186_p6 }
0x12c2   : > { %4196 = shalt.err (!%p4193_p3)
}
0x12c3   : > { %3341 = dma.vmem_to_hbm [thread:$0]  (%p5616_p1), %s5389_s5, 256, %s5386_s2, %s2550_s8, %s4344_s6, %s4344_s6, %s4352_s14   ;;  %v3042_v9 = vld [vmem:[#allocation32] ss:$0 sm:$0xff] }
0x12c4   : > { %s3046_s17 = sshll.u32 %s4491_s23, 7  ;;  %s5618_s10 = sshll.u32 %s5022_s18, 3 }
0x12c5   : > { %s1024_s11 = scalar_lea.vmem [#allocation34], %s5618_s10  ;;  %s5619_s24 = sld [smem:[#allocation76_spill]] }
0x12c6   : > { %s2568_s20 = sshll.u32 %s1024_s11, 4  ;;  %s2545_s23 = scalar_lea.sflag [#allocation4], %s5022_s18  ;;  %s5426_s20 = int_to_ptr.vmem [resolvable:$true] %s2568_s20 }
0x12c7   : > { %s4197_s6 = scalar_lea.vmem %s5426_s20, 128  ;;  %s4354_s8 = smov [#allocation34]  }
0x12c8   : > { %p4198_p5 = scmp.ne.s32.totalorder %s5426_s20, %s4197_s6  ;;  %s4201_s14 = sshll.u32 %s4354_s8, 4  ;;  %s4202_s14 = int_to_ptr.vmem [resolvable:$false] %s4201_s14 }
0x12c9   : > { %s4203_s2 = scalar_lea.vmem %s4202_s14, 256  ;;  %p4204_p12 = scmp.lt.s32.totalorder %s5426_s20, %s4202_s14 }
0x12ca   : > { %p4199_p0 = pnand %p4198_p5, %p5616_p1  ;;  %p4205_p9 = scmp.lt.s32.totalorder %s4203_s2, %s4197_s6 }
0x12cb   : > { %s5424_s15 = scalar_lea.hbm %s5619_s24, %s3046_s17 }
0x12cc   : > { %p4200_p13 = pneg %p4199_p0  ;;  %p4206_p8 = por %p4205_p9, %p4204_p12 }
0x12ce   : > { %p4207_p6 = pnand %p4206_p8, %p4200_p13 }
0x1371   : > { %v2519_v28 = vpop.f32.mrb[40].mxu0 }
0x1372   : > { %v2525_v30 = vadd.f32 %v2519_v28, %v5329_v57  ;;  %v3265_v32 = vpop.f32.mrb[41].mxu0 }
0x1373   : > { %v2522_v33 = vpop.f32.mrb[42].mxu0 }
0x1374   : > { %v2532_v34 = vadd.f32 %v3042_v9, %v2525_v30  ;;  %v3266_v35 = vpop.f32.mrb[43].mxu0 }
0x1376   : > { %2533 = vst.msk [vmem:[%s1024_s11] sm:$0xff] %vm1087_vm0, %v2532_v34 }
0x1377   : > { %4210 = shalt.err (!%p4207_p6)
}
0x1378   : > { %s4211_s18 = scalar_lea.hbm %s5424_s15, 128  ;;  %s4215_s0 = scalar_lea.hbm %s5619_s24, 256 }
0x1379   : > { %p4212_p4 = scmp.ne.s32.totalorder %s5424_s15, %s4211_s18  ;;  %p4216_p7 = scmp.lt.u32.totalorder %s5424_s15, %s5619_s24 }
0x137a   : > { %p4217_p2 = scmp.lt.u32.totalorder %s4215_s0, %s4211_s18  ;;  %p4219_p5 = scmp.lt.u32.totalorder %s4211_s18, %s5424_s15 }
0x137b   : > { %p4213_p11 = pnand %p4212_p4, %p5616_p1 }
0x137c   : > { %p4218_p3 = por %p4217_p2, %p4216_p7 }
0x137d   : > { %p4214_p10 = pneg %p4213_p11 }
0x137e   : > { %p4220_p0 = por %p4219_p5, %p4218_p3 }
0x1380   : > { %p4221_p13 = pnand %p4220_p0, %p4214_p10 }
0x1382   : > { %4224 = shalt.err (!%p4221_p13)
}
0x1383   : > { %3339 = dma.vmem_to_hbm [thread:$0]  (%p5616_p1), %s5426_s20, 128, %s5424_s15, %s2545_s23  }
0x1384 PF: > { %s5620_s11 = sld [smem:[#allocation56_spill]]  ;;  %s2612_s16 = sand.u32 1, %s4299_s3  }
0x1385   : > { %p5622_p9 = scmp.ge.s32.totalorder %s4311_s30, 2  ;;  %s2613_s26 = scalar_lea.sflag [#allocation4], %s2612_s16 }
0x138a   : > { %p5621_p12 = scmp.ne.s32.totalorder %s5620_s11, 0 }
0x138c   : > { %p3408_p8 = pnand %p5622_p9, %p5621_p12 }
0x138e   : > { %4290 = dma.done.wait (!%p3408_p8), %s2613_s26, 128  }
0x138f   : > { %4292 = vsyncadd (!%p3408_p8), %s2613_s26, 4294967168  ;;  %s5623_s6 = sadd.s32 4294967294, %s4311_s30  }
0x1390   : > { %s2621_s8 = sand.u32 1, %s5623_s6  }
0x1391   : > { %s2622_s14 = scalar_lea.sflag [#allocation36], %s2621_s8 }
0x1392   : > { %4294 = dma.done.wait (!%p3408_p8), %s2622_s14, 512  }
0x1393   : > { %4296 = vsyncadd (!%p3408_p8), %s2622_s14, 4294966784  ;;  %s5624_s30 = sld [smem:[#allocation54_spill]]  ;;  %s5625_s27 = sld [smem:[#allocation52_spill]] }
0x1394   : > { %s5626_s29 = sld [smem:[#allocation55_spill]]  ;;  %s5627_s3 = smov %s4303_s28 }
0x1399   : > { %p53_p1 = scmp.ge.s32.totalorder %s5624_s30, 4   ;;  %s5628_s28 = smov %s5625_s27 }
0x139b   :  { %55 = sbr.rel (!%p53_p1) target bundleno = 42 (0x2a), region = 278 }
0x13a2   :  { %2636 = vsyncpa [#allocation3], 1 }
0x13a3   :  { %2638 = vsyncpa [#allocation3 + $0x1], 1 }
0x13a4   :  { %2639 = vsyncpa [#allocation6], 1 }
0x13a5   :  { %2641 = vsyncpa [#allocation6 + $0x1], 1 }
0x13a6   :  { %2642 = vsyncpa [#allocation9], 1 }
0x13a7   :  { %2644 = vsyncpa [#allocation9 + $0x1], 1 }
0x13a8   :  { %2645 = vsyncpa [#allocation12], 1 }
0x13a9   :  { %2646 = vsyncpa [#allocation15], 1 }
0x13aa   :  { %2647 = vsyncpa [#allocation18], 1 }
0x13ab   :  { %2648 = vsyncpa [#allocation21], 1 }
0x13ac   :  { %2649 = vsyncpa [#allocation24], 1 }
0x13ad   :  { %2650 = vsyncpa [#allocation27], 1 }
0x13ae   :  { %2651 = vsyncpa [#allocation30], 1 }
0x13af   :  { %2652 = vsyncpa [#allocation33], 1 }
0x13b0   :  { %2653 = vsyncpa [#allocation4], 1 }
0x13b1   :  { %2655 = vsyncpa [#allocation4 + $0x1], 1 }
0x13b2   :  { %2656 = vsyncpa [#allocation36], 1 }
0x13b3   :  { %2658 = vsyncpa [#allocation36 + $0x1], 1 }

</bundles_post_ra>
